<compile_context>
chip_gen: v5e
topology: v5e:2x2
jax: 0.10.0
libtpu: 0.0.40
codegen_flags: <defaults>
</compile_context>

<pallas_src>
import functools
import math

import jax
import jax.numpy as jnp
from jax.experimental import pallas as pl
from jax.experimental.pallas import tpu as pltpu

LN_EPS = 1e-6
MATMUL_DTYPE = jnp.bfloat16  # bf16 operands, f32 accumulation on the MXU


# =============================================================================
# In-kernel helpers
# =============================================================================

def _layernorm(x, g, b):
    x = x.astype(jnp.float32)
    mu = jnp.mean(x, axis=-1, keepdims=True)
    var = jnp.mean(jnp.square(x - mu), axis=-1, keepdims=True)
    return (x - mu) * jax.lax.rsqrt(var + LN_EPS) * g + b


# =============================================================================
# Pallas kernels
# =============================================================================

def _linear_kernel(x_ref, w_ref, b_ref, o_ref, *, activation):
    # y = act(x @ w + b); w arrives pre-cast to bf16, accumulation in f32.
    y = jnp.dot(x_ref[...].astype(MATMUL_DTYPE), w_ref[...],
                preferred_element_type=jnp.float32) + b_ref[...]
    if activation == "gelu":
        # TODO(synk): torch nn.GELU defaults to exact erf; tanh approximation used here.
        y = jax.nn.gelu(y, approximate=True)
    o_ref[...] = y.astype(o_ref.dtype)


def _ln_linear_kernel(x_ref, g_ref, b_ref, w_ref, wb_ref, o_ref):
    # Final norm + classification head (row-parallel).
    h = _layernorm(x_ref[...], g_ref[...], b_ref[...])
    y = jnp.dot(h.astype(MATMUL_DTYPE), w_ref[...],
                preferred_element_type=jnp.float32) + wb_ref[...]
    o_ref[...] = y.astype(o_ref.dtype)


def _ln_mlp_kernel(x_ref, g_ref, b_ref, w1_ref, b1_ref, w2_ref, b2_ref,
                   o_ref, xln_ref, acc_ref):
    # LN2 -> fc1 + GELU -> fc2 + bias + residual, hidden dim tiled over the
    # "arbitrary" grid axis with an f32 VMEM accumulator.
    c = pl.program_id(1)

    @pl.when(c == 0)
    def _():
        xln_ref[...] = _layernorm(x_ref[...], g_ref[...], b_ref[...]).astype(xln_ref.dtype)
        acc_ref[...] = jnp.zeros_like(acc_ref)

    h = jnp.dot(xln_ref[...], w1_ref[...],
                preferred_element_type=jnp.float32) + b1_ref[...]
    h = jax.nn.gelu(h, approximate=True)
    acc_ref[...] += jnp.dot(h.astype(MATMUL_DTYPE), w2_ref[...],
                            preferred_element_type=jnp.float32)

    @pl.when(c == pl.num_programs(1) - 1)
    def _():
        o_ref[...] = (acc_ref[...] + b2_ref[...]
                      + x_ref[...].astype(jnp.float32)).astype(o_ref.dtype)


def _attn_block_kernel(x_ref, g_ref, b_ref, wq_ref, wk_ref, wv_ref,
                       bq_ref, bk_ref, bv_ref, wo_ref, ob_ref, o_ref, *,
                       num_heads, head_dim, n_valid, scale):
    # One batch element per grid step:
    # LN1 -> q/k/v projections -> multi-head attention (batched einsums over heads,
    # bf16 operands / f32 accumulation) -> output projection + bias + residual.
    x = x_ref[...].astype(jnp.float32)                         # (n_pad, E)
    n_pad = x.shape[0]
    e = num_heads * head_dim

    xln = _layernorm(x, g_ref[...], b_ref[...]).astype(MATMUL_DTYPE)

    def _heads(w_ref_, b_ref_):                                # -> (H, n_pad, Dh) bf16
        y = jnp.dot(xln, w_ref_[...],
                    preferred_element_type=jnp.float32) + b_ref_[...]
        y = y.astype(MATMUL_DTYPE).reshape(n_pad, num_heads, head_dim)
        return jnp.transpose(y, (1, 0, 2))

    q = _heads(wq_ref, bq_ref)
    k = _heads(wk_ref, bk_ref)
    v = _heads(wv_ref, bv_ref)

    # TODO(synk): at production sequence lengths tile the KV axis flash-style instead
    # of materializing the full (H, N, N) score tensor.
    s = jnp.einsum('hqd,hkd->hqk', q, k,
                   preferred_element_type=jnp.float32) * scale
    key_valid = jax.lax.broadcasted_iota(jnp.int32, (1, n_pad), 1) < n_valid
    s = jnp.where(key_valid, s, -1e30)                         # mask padded key columns
    s = s - jnp.max(s, axis=-1, keepdims=True)
    p = jnp.exp(s)
    p = p * pl.reciprocal(jnp.sum(p, axis=-1, keepdims=True), approx=True)

    o = jnp.einsum('hqk,hkd->hqd', p.astype(MATMUL_DTYPE), v,
                   preferred_element_type=jnp.float32)
    attn = jnp.transpose(o, (1, 0, 2)).reshape(n_pad, e).astype(MATMUL_DTYPE)

    y = jnp.dot(attn, wo_ref[...], preferred_element_type=jnp.float32) \
        + ob_ref[...] + x
    o_ref[...] = y.astype(o_ref.dtype)


# =============================================================================
# Wrappers (row-tiled grids, bf16 VMEM-resident weights)
# =============================================================================

def _round_up(v, m):
    return ((v + m - 1) // m) * m


def _tile_rows(m, cap=256):
    """Return (tm, m_pad): row tile (multiple of 8, <= cap) and padded row count.

    Prefers >= 2 grid steps so v7x's two TensorCores both get work and the BlockSpec
    pipeline has something to overlap.
    """
    m8 = _round_up(max(m, 8), 8)
    if m8 >= 2 * cap:
        return cap, _round_up(m8, cap)
    if m8 >= 16:
        tm = _round_up((m8 + 1) // 2, 8)
        return tm, 2 * tm
    return m8, m8


def _pad_rows(x, m_pad):
    m = x.shape[0]
    if m_pad == m:
        return x
    return jnp.pad(x, ((0, m_pad - m), (0, 0)))


def _row_spec(tm, feat):
    return pl.BlockSpec((tm, feat), lambda i: (i, 0))


def _const_spec(shape):
    zeros = (0,) * len(shape)
    return pl.BlockSpec(shape, lambda *_: zeros)


_PARALLEL = pltpu.CompilerParams(dimension_semantics=("parallel",))


def linear(x, w, b, activation=None, tm_cap=256):
    m, k = x.shape
    n = w.shape[1]
    tm, m_pad = _tile_rows(m, tm_cap)
    xp = _pad_rows(x, m_pad)
    out = pl.pallas_call(
        functools.partial(_linear_kernel, activation=activation),
        grid=(m_pad // tm,),
        in_specs=[_row_spec(tm, k), _const_spec((k, n)), _const_spec((1, n))],
        out_specs=_row_spec(tm, n),
        out_shape=jax.ShapeDtypeStruct((m_pad, n), jnp.float32),
        compiler_params=_PARALLEL,
    )(xp, w.astype(MATMUL_DTYPE), b.reshape(1, n))
    return out[:m] if m_pad != m else out


def ln_linear(x, g, b, w, wb, tm_cap=256):
    m, e = x.shape
    n = w.shape[1]
    tm, m_pad = _tile_rows(m, tm_cap)
    xp = _pad_rows(x, m_pad)
    out = pl.pallas_call(
        _ln_linear_kernel,
        grid=(m_pad // tm,),
        in_specs=[_row_spec(tm, e), _const_spec((1, e)), _const_spec((1, e)),
                  _const_spec((e, n)), _const_spec((1, n))],
        out_specs=_row_spec(tm, n),
        out_shape=jax.ShapeDtypeStruct((m_pad, n), jnp.float32),
        compiler_params=_PARALLEL,
    )(xp, g.reshape(1, e), b.reshape(1, e), w.astype(MATMUL_DTYPE), wb.reshape(1, n))
    return out[:m] if m_pad != m else out


def ln_mlp(x, g, b, w1, b1, w2, b2, tm_cap=256, hid_chunk=512):
    m, e = x.shape
    hid = w1.shape[1]
    hc = min(hid, hid_chunk)
    assert hid % hc == 0
    tm, m_pad = _tile_rows(m, tm_cap)
    xp = _pad_rows(x, m_pad)
    out = pl.pallas_call(
        _ln_mlp_kernel,
        grid=(m_pad // tm, hid // hc),
        in_specs=[pl.BlockSpec((tm, e), lambda i, c: (i, 0)),
                  _const_spec((1, e)), _const_spec((1, e)),
                  pl.BlockSpec((e, hc), lambda i, c: (0, c)),
                  pl.BlockSpec((1, hc), lambda i, c: (0, c)),
                  pl.BlockSpec((hc, e), lambda i, c: (c, 0)),
                  _const_spec((1, e))],
        out_specs=pl.BlockSpec((tm, e), lambda i, c: (i, 0)),
        out_shape=jax.ShapeDtypeStruct((m_pad, e), jnp.float32),
        scratch_shapes=[pltpu.VMEM((tm, e), MATMUL_DTYPE),   # stashed LN(x)
                        pltpu.VMEM((tm, e), jnp.float32)],   # f32 accumulator
        compiler_params=pltpu.CompilerParams(
            dimension_semantics=("parallel", "arbitrary")),
        input_output_aliases={0: 0},                          # residual stream in-place
    )(xp, g.reshape(1, e), b.reshape(1, e),
      w1.astype(MATMUL_DTYPE), b1.reshape(1, hid),
      w2.astype(MATMUL_DTYPE), b2.reshape(1, e))
    return out[:m] if m_pad != m else out


def attention_block(x, ln_g, ln_b, qkv_w, qkv_b, proj_w, proj_b, *,
                    batch, n_pad, num_heads, n_valid):
    e = x.shape[1]
    dh = e // num_heads
    scale = 1.0 / math.sqrt(dh)
    wq, wk, wv = qkv_w[:, :e], qkv_w[:, e:2 * e], qkv_w[:, 2 * e:]
    bq, bk, bv = qkv_b[:e], qkv_b[e:2 * e], qkv_b[2 * e:]
    kern = functools.partial(_attn_block_kernel, num_heads=num_heads,
                             head_dim=dh, n_valid=n_valid, scale=scale)
    return pl.pallas_call(
        kern,
        grid=(batch,),
        in_specs=[pl.BlockSpec((n_pad, e), lambda bi: (bi, 0)),
                  _const_spec((1, e)), _const_spec((1, e)),
                  _const_spec((e, e)), _const_spec((e, e)), _const_spec((e, e)),
                  _const_spec((1, e)), _const_spec((1, e)), _const_spec((1, e)),
                  _const_spec((e, e)), _const_spec((1, e))],
        out_specs=pl.BlockSpec((n_pad, e), lambda bi: (bi, 0)),
        out_shape=jax.ShapeDtypeStruct((batch * n_pad, e), jnp.float32),
        compiler_params=_PARALLEL,
        input_output_aliases={0: 0},                          # residual stream in-place
    )(x, ln_g.reshape(1, e), ln_b.reshape(1, e),
      wq.astype(MATMUL_DTYPE), wk.astype(MATMUL_DTYPE), wv.astype(MATMUL_DTYPE),
      bq.reshape(1, e), bk.reshape(1, e), bv.reshape(1, e),
      proj_w.astype(MATMUL_DTYPE), proj_b.reshape(1, e))


# =============================================================================
# Parameters (deterministic, synthetic)
# =============================================================================

def init_params(key, *, spec_in, reduced, patch, embed, depth, num_heads,
                mlp_ratio, num_classes, num_tokens):
    del num_heads  # head count only affects the forward split, not the shapes

    def nrm(k, shape, std=0.02):
        return std * jax.random.normal(k, shape, jnp.float32)

    keys = jax.random.split(key, 8 + depth)
    params = {
        # SpectralAdapter: pointwise (1x1) spectral projection S -> reduced + GELU.
        # TODO(synk): SpectralAdapter definition not provided in the reference; modeled
        # as a 1x1 spectral-mixing conv with GELU producing `reduced_channels` maps.
        "spec_w": nrm(keys[0], (spec_in, reduced)),
        "spec_b": jnp.zeros((reduced,), jnp.float32),
        # PatchEmbed conv (kernel = stride = patch), flattened as (ph, pw, c) -> embed.
        # TODO(synk): real torch Conv2d flattens (c, kh, kw); permute before loading
        # pretrained weights.
        "pe_w": nrm(keys[1], (patch * patch * reduced, embed)),
        "pe_b": jnp.zeros((embed,), jnp.float32),
        "cls": nrm(keys[2], (1, 1, embed)),
        "pos": nrm(keys[3], (1, num_tokens, embed)),
        "norm_g": jnp.ones((embed,), jnp.float32),
        "norm_b": jnp.zeros((embed,), jnp.float32),
        "head_w": nrm(keys[4], (embed, num_classes)),
        "head_b": jnp.zeros((num_classes,), jnp.float32),
        "blocks": [],
    }
    hidden = int(embed * mlp_ratio)
    for d in range(depth):
        bk = jax.random.split(keys[8 + d], 4)
        params["blocks"].append({
            "ln1_g": jnp.ones((embed,), jnp.float32),
            "ln1_b": jnp.zeros((embed,), jnp.float32),
            "qkv_w": nrm(bk[0], (embed, 3 * embed)),
            "qkv_b": jnp.zeros((3 * embed,), jnp.float32),
            "proj_w": nrm(bk[1], (embed, embed)),
            "proj_b": jnp.zeros((embed,), jnp.float32),
            "ln2_g": jnp.ones((embed,), jnp.float32),
            "ln2_b": jnp.zeros((embed,), jnp.float32),
            "fc1_w": nrm(bk[2], (embed, hidden)),
            "fc1_b": jnp.zeros((hidden,), jnp.float32),
            "fc2_w": nrm(bk[3], (hidden, embed)),
            "fc2_b": jnp.zeros((embed,), jnp.float32),
        })
    return params


# =============================================================================
# Forward pass
# =============================================================================

def spec_vit_forward(params, x, *, patch, num_heads):
    B, S, H, W = x.shape
    gh, gw = H // patch, W // patch
    e = params["pe_w"].shape[1]
    assert e % num_heads == 0

    # --- SpectralAdapter: per-pixel 1x1 spectral conv + GELU (row-tiled kernel) ---
    xs = jnp.transpose(x, (0, 2, 3, 1)).reshape(B * H * W, S)       # NCHW -> (pixels, S)
    feat = linear(xs, params["spec_w"], params["spec_b"], activation="gelu")
    cr = feat.shape[1]

    # --- im2col (cheap wrapper glue) then PatchEmbed matmul kernel ---
    feat = feat.reshape(B, gh, patch, gw, patch, cr).transpose(0, 1, 3, 2, 4, 5)
    xp = feat.reshape(B * gh * gw, patch * patch * cr)
    tok = linear(xp, params["pe_w"], params["pe_b"])
    tok = tok.reshape(B, gh * gw, e)

    # --- cls token + learned positional embedding, pad tokens to a multiple of 8 ---
    # (at production sizes pad the sequence to a multiple of 128 for lane-dense scores)
    cls = jnp.broadcast_to(params["cls"], (B, 1, e))
    xseq = jnp.concatenate([cls, tok], axis=1) + params["pos"]
    nt = xseq.shape[1]
    nt_pad = _round_up(nt, 8)
    xseq = jnp.pad(xseq, ((0, 0), (0, nt_pad - nt), (0, 0)))
    flat = xseq.reshape(B * nt_pad, e)

    # --- Transformer blocks: 2 fused pallas_calls per block ---
    for blk in params["blocks"]:
        flat = attention_block(flat, blk["ln1_g"], blk["ln1_b"],
                               blk["qkv_w"], blk["qkv_b"],
                               blk["proj_w"], blk["proj_b"],
                               batch=B, n_pad=nt_pad, num_heads=num_heads, n_valid=nt)
        flat = ln_mlp(flat, blk["ln2_g"], blk["ln2_b"],
                      blk["fc1_w"], blk["fc1_b"], blk["fc2_w"], blk["fc2_b"])

    # --- final norm on the cls rows + classification head ---
    cls_rows = flat.reshape(B, nt_pad, e)[:, 0]
    logits = ln_linear(cls_rows, params["norm_g"], params["norm_b"],
                       params["head_w"], params["head_b"])
    return logits


# =============================================================================
# Main
# =============================================================================

if __name__ == "__main__":
    # Small, module-consistent config.  head_dim = embed/num_heads = 128, matching the
    # module's 768/6 default, so matmul dims and output stores are lane-dense.
    B, S, H, W = 2, 4, 16, 16          # input: [batch, spectral_depth, height, width]
    token_patch_size = 4
    reduced_channels = 8
    embed_dim = 256
    depth = 2
    num_heads = 2
    mlp_ratio = 4
    num_classes = 10
    num_tokens = 1 + (H // token_patch_size) * (W // token_patch_size)

    key = jax.random.PRNGKey(0)
    kx, kp = jax.random.split(key)
    x = jax.random.normal(kx, (B, S, H, W), jnp.float32)

    params = init_params(
        kp, spec_in=S, reduced=reduced_channels, patch=token_patch_size,
        embed=embed_dim, depth=depth, num_heads=num_heads, mlp_ratio=mlp_ratio,
        num_classes=num_classes, num_tokens=num_tokens)

    fwd = jax.jit(functools.partial(spec_vit_forward, patch=token_patch_size,
                                    num_heads=num_heads))
    out = fwd(params, x)
    out = jax.block_until_ready(out)
    assert out.shape == (B, num_classes), out.shape
    assert bool(jnp.all(jnp.isfinite(out)))
    print("KERNEL_OK")
</pallas_src>

<mosaic_0001>
module attributes {stable_mosaic.version = 11 : i64} {
  func.func @_linear_kernel(%arg0: i32, %arg1: memref<256x4xf32, #tpu.memory_space<vmem>>, %arg2: memref<4x8xbf16, #tpu.memory_space<vmem>>, %arg3: memref<1x8xf32, #tpu.memory_space<vmem>>, %arg4: memref<256x8xf32, #tpu.memory_space<vmem>>) attributes {dimension_semantics = [#tpu.dimension_semantics<parallel>], iteration_bounds = array<i64: 2>, scalar_prefetch = 0 : i64, scratch_operands = 0 : i64, tpu.core_type = #tpu.core_type<tc>, window_params = [{transform_indices = @transform_0, window_bounds = array<i64: 256, 4>}, {pipeline_mode = #tpu.pipeline_mode<synchronous>, transform_indices = @transform_1, window_bounds = array<i64: 4, 8>}, {pipeline_mode = #tpu.pipeline_mode<synchronous>, transform_indices = @transform_2, window_bounds = array<i64: 1, 8>}, {transform_indices = @transform_3, window_bounds = array<i64: 256, 8>}]} {
    %c0 = arith.constant 0 : index
    %c0_0 = arith.constant 0 : index
    %0 = vector.load %arg1[%c0, %c0_0] : memref<256x4xf32, #tpu.memory_space<vmem>>, vector<256x4xf32>
    %1 = arith.truncf %0 : vector<256x4xf32> to vector<256x4xbf16>
    %c0_1 = arith.constant 0 : index
    %c0_2 = arith.constant 0 : index
    %2 = vector.load %arg2[%c0_1, %c0_2] : memref<4x8xbf16, #tpu.memory_space<vmem>>, vector<4x8xbf16>
    %cst = arith.constant dense<0.000000e+00> : vector<256x8xf32>
    %3 = tpu.matmul %1, %2, %cst {dimension_numbers = #tpu.dot_dimension_numbers<[1], [0], [0], [1], [0, 0, 1, 1], [], []>} : vector<256x4xbf16>, vector<4x8xbf16>, vector<256x8xf32> -> vector<256x8xf32>
    %c0_3 = arith.constant 0 : index
    %c0_4 = arith.constant 0 : index
    %4 = vector.load %arg3[%c0_3, %c0_4] : memref<1x8xf32, #tpu.memory_space<vmem>>, vector<1x8xf32>
    %5 = vector.broadcast %4 : vector<1x8xf32> to vector<256x8xf32>
    %6 = arith.addf %3, %5 : vector<256x8xf32>
    %7 = arith.mulf %6, %6 : vector<256x8xf32>
    %8 = arith.mulf %6, %7 : vector<256x8xf32>
    %cst_5 = arith.constant 4.471500e-02 : f32
    %9 = vector.broadcast %cst_5 : f32 to vector<256x8xf32>
    %10 = arith.mulf %9, %8 : vector<256x8xf32>
    %11 = arith.addf %6, %10 : vector<256x8xf32>
    %cst_6 = arith.constant 0.797884583 : f32
    %12 = vector.broadcast %cst_6 : f32 to vector<256x8xf32>
    %13 = arith.mulf %12, %11 : vector<256x8xf32>
    %14 = math.tanh %13 : vector<256x8xf32>
    %cst_7 = arith.constant 1.000000e+00 : f32
    %15 = vector.broadcast %cst_7 : f32 to vector<256x8xf32>
    %16 = arith.addf %15, %14 : vector<256x8xf32>
    %cst_8 = arith.constant 5.000000e-01 : f32
    %17 = vector.broadcast %cst_8 : f32 to vector<256x8xf32>
    %18 = arith.mulf %17, %16 : vector<256x8xf32>
    %19 = arith.mulf %6, %18 : vector<256x8xf32>
    %c0_9 = arith.constant 0 : index
    %c0_10 = arith.constant 0 : index
    %20 = vector.load %arg4[%c0_9, %c0_10] : memref<256x8xf32, #tpu.memory_space<vmem>>, vector<256x8xf32>
    tpu.vector_store %arg4[%c0_9, %c0_10], %19 {strides = array<i32>} : memref<256x8xf32, #tpu.memory_space<vmem>>, vector<256x8xf32>,
    return
  }
  func.func @transform_0(%arg0: i32) -> (i32, i32) {
    %c0_i32 = arith.constant 0 : i32
    %c0_i32_0 = arith.constant 0 : i32
    return %arg0, %c0_i32 : i32, i32
  }
  func.func @transform_1(%arg0: i32) -> (i32, i32) {
    %c0_i32 = arith.constant 0 : i32
    %c0_i32_0 = arith.constant 0 : i32
    %c0_i32_1 = arith.constant 0 : i32
    return %c0_i32, %c0_i32_0 : i32, i32
  }
  func.func @transform_2(%arg0: i32) -> (i32, i32) {
    %c0_i32 = arith.constant 0 : i32
    %c0_i32_0 = arith.constant 0 : i32
    %c0_i32_1 = arith.constant 0 : i32
    return %c0_i32, %c0_i32_0 : i32, i32
  }
  func.func @transform_3(%arg0: i32) -> (i32, i32) {
    %c0_i32 = arith.constant 0 : i32
    %c0_i32_0 = arith.constant 0 : i32
    return %arg0, %c0_i32 : i32, i32
  }
}

module attributes {stable_mosaic.version = 11 : i64} {
  func.func @_linear_kernel(%arg0: i32, %arg1: memref<16x128xf32, #tpu.memory_space<vmem>>, %arg2: memref<128x256xbf16, #tpu.memory_space<vmem>>, %arg3: memref<1x256xf32, #tpu.memory_space<vmem>>, %arg4: memref<16x256xf32, #tpu.memory_space<vmem>>) attributes {dimension_semantics = [#tpu.dimension_semantics<parallel>], iteration_bounds = array<i64: 2>, scalar_prefetch = 0 : i64, scratch_operands = 0 : i64, tpu.core_type = #tpu.core_type<tc>, window_params = [{transform_indices = @transform_0, window_bounds = array<i64: 16, 128>}, {pipeline_mode = #tpu.pipeline_mode<synchronous>, transform_indices = @transform_1, window_bounds = array<i64: 128, 256>}, {pipeline_mode = #tpu.pipeline_mode<synchronous>, transform_indices = @transform_2, window_bounds = array<i64: 1, 256>}, {transform_indices = @transform_3, window_bounds = array<i64: 16, 256>}]} {
    %c0 = arith.constant 0 : index
    %c0_0 = arith.constant 0 : index
    %0 = vector.load %arg1[%c0, %c0_0] : memref<16x128xf32, #tpu.memory_space<vmem>>, vector<16x128xf32>
    %1 = arith.truncf %0 : vector<16x128xf32> to vector<16x128xbf16>
    %c0_1 = arith.constant 0 : index
    %c0_2 = arith.constant 0 : index
    %2 = vector.load %arg2[%c0_1, %c0_2] : memref<128x256xbf16, #tpu.memory_space<vmem>>, vector<128x256xbf16>
    %cst = arith.constant dense<0.000000e+00> : vector<16x256xf32>
    %3 = tpu.matmul %1, %2, %cst {dimension_numbers = #tpu.dot_dimension_numbers<[1], [0], [0], [1], [0, 0, 1, 1], [], []>} : vector<16x128xbf16>, vector<128x256xbf16>, vector<16x256xf32> -> vector<16x256xf32>
    %c0_3 = arith.constant 0 : index
    %c0_4 = arith.constant 0 : index
    %4 = vector.load %arg3[%c0_3, %c0_4] : memref<1x256xf32, #tpu.memory_space<vmem>>, vector<1x256xf32>
    %5 = vector.broadcast %4 : vector<1x256xf32> to vector<16x256xf32>
    %6 = arith.addf %3, %5 : vector<16x256xf32>
    %c0_5 = arith.constant 0 : index
    %c0_6 = arith.constant 0 : index
    %7 = vector.load %arg4[%c0_5, %c0_6] : memref<16x256xf32, #tpu.memory_space<vmem>>, vector<16x256xf32>
    tpu.vector_store %arg4[%c0_5, %c0_6], %6 {strides = array<i32>} : memref<16x256xf32, #tpu.memory_space<vmem>>, vector<16x256xf32>,
    return
  }
  func.func @transform_0(%arg0: i32) -> (i32, i32) {
    %c0_i32 = arith.constant 0 : i32
    %c0_i32_0 = arith.constant 0 : i32
    return %arg0, %c0_i32 : i32, i32
  }
  func.func @transform_1(%arg0: i32) -> (i32, i32) {
    %c0_i32 = arith.constant 0 : i32
    %c0_i32_0 = arith.constant 0 : i32
    %c0_i32_1 = arith.constant 0 : i32
    return %c0_i32, %c0_i32_0 : i32, i32
  }
  func.func @transform_2(%arg0: i32) -> (i32, i32) {
    %c0_i32 = arith.constant 0 : i32
    %c0_i32_0 = arith.constant 0 : i32
    %c0_i32_1 = arith.constant 0 : i32
    return %c0_i32, %c0_i32_0 : i32, i32
  }
  func.func @transform_3(%arg0: i32) -> (i32, i32) {
    %c0_i32 = arith.constant 0 : i32
    %c0_i32_0 = arith.constant 0 : i32
    return %arg0, %c0_i32 : i32, i32
  }
}

module attributes {stable_mosaic.version = 11 : i64} {
  func.func @_ln_mlp_kernel(%arg0: i32, %arg1: i32, %arg2: memref<24x256xf32, #tpu.memory_space<vmem>>, %arg3: memref<1x256xf32, #tpu.memory_space<vmem>>, %arg4: memref<1x256xf32, #tpu.memory_space<vmem>>, %arg5: memref<256x512xbf16, #tpu.memory_space<vmem>>, %arg6: memref<1x512xf32, #tpu.memory_space<vmem>>, %arg7: memref<512x256xbf16, #tpu.memory_space<vmem>>, %arg8: memref<1x256xf32, #tpu.memory_space<vmem>>, %arg9: memref<24x256xf32, #tpu.memory_space<vmem>>, %arg10: memref<24x256xbf16, #tpu.memory_space<vmem>>, %arg11: memref<24x256xf32, #tpu.memory_space<vmem>>) attributes {dimension_semantics = [#tpu.dimension_semantics<parallel>, #tpu.dimension_semantics<arbitrary>], iteration_bounds = array<i64: 2, 2>, scalar_prefetch = 0 : i64, scratch_operands = 2 : i64, tpu.core_type = #tpu.core_type<tc>, window_params = [{transform_indices = @transform_0, window_bounds = array<i64: 24, 256>}, {pipeline_mode = #tpu.pipeline_mode<synchronous>, transform_indices = @transform_1, window_bounds = array<i64: 1, 256>}, {pipeline_mode = #tpu.pipeline_mode<synchronous>, transform_indices = @transform_2, window_bounds = array<i64: 1, 256>}, {transform_indices = @transform_3, window_bounds = array<i64: 256, 512>}, {transform_indices = @transform_4, window_bounds = array<i64: 1, 512>}, {transform_indices = @transform_5, window_bounds = array<i64: 512, 256>}, {pipeline_mode = #tpu.pipeline_mode<synchronous>, transform_indices = @transform_6, window_bounds = array<i64: 1, 256>}, {transform_indices = @transform_7, window_bounds = array<i64: 24, 256>}]} {
    %c0_i32 = arith.constant 0 : i32
    %0 = arith.cmpi eq, %arg1, %c0_i32 : i32
    %1 = arith.extui %0 : i1 to i32
    %c0_i32_0 = arith.constant 0 : i32
    %2 = arith.cmpi ne, %1, %c0_i32_0 : i32
    scf.if %2 {
      %c0_18 = arith.constant 0 : index
      %c0_19 = arith.constant 0 : index
      %31 = vector.load %arg2[%c0_18, %c0_19] : memref<24x256xf32, #tpu.memory_space<vmem>>, vector<24x256xf32>
      %c0_20 = arith.constant 0 : index
      %c0_21 = arith.constant 0 : index
      %32 = vector.load %arg3[%c0_20, %c0_21] : memref<1x256xf32, #tpu.memory_space<vmem>>, vector<1x256xf32>
      %c0_22 = arith.constant 0 : index
      %c0_23 = arith.constant 0 : index
      %33 = vector.load %arg4[%c0_22, %c0_23] : memref<1x256xf32, #tpu.memory_space<vmem>>, vector<1x256xf32>
      %cst_24 = arith.constant dense<0.000000e+00> : vector<24xf32>
      %34 = vector.multi_reduction <add>, %31, %cst_24 [1] : vector<24x256xf32> to vector<24xf32>
      %35 = vector.shape_cast %34 : vector<24xf32> to vector<24x1xf32>
      %cst_25 = arith.constant 2.560000e+02 : f32
      %36 = vector.broadcast %cst_25 : f32 to vector<24x1xf32>
      %37 = arith.divf %35, %36 : vector<24x1xf32>
      %38 = vector.broadcast %37 : vector<24x1xf32> to vector<24x256xf32>
      %39 = arith.subf %31, %38 : vector<24x256xf32>
      %40 = arith.mulf %39, %39 : vector<24x256xf32>
      %cst_26 = arith.constant dense<0.000000e+00> : vector<24xf32>
      %41 = vector.multi_reduction <add>, %40, %cst_26 [1] : vector<24x256xf32> to vector<24xf32>
      %42 = vector.shape_cast %41 : vector<24xf32> to vector<24x1xf32>
      %cst_27 = arith.constant 2.560000e+02 : f32
      %43 = vector.broadcast %cst_27 : f32 to vector<24x1xf32>
      %44 = arith.divf %42, %43 : vector<24x1xf32>
      %45 = vector.broadcast %37 : vector<24x1xf32> to vector<24x256xf32>
      %46 = arith.subf %31, %45 : vector<24x256xf32>
      %cst_28 = arith.constant 9.99999997E-7 : f32
      %47 = vector.broadcast %cst_28 : f32 to vector<24x1xf32>
      %48 = arith.addf %44, %47 : vector<24x1xf32>
      %49 = math.rsqrt %48 : vector<24x1xf32>
      %50 = vector.broadcast %49 : vector<24x1xf32> to vector<24x256xf32>
      %51 = arith.mulf %46, %50 : vector<24x256xf32>
      %52 = vector.broadcast %32 : vector<1x256xf32> to vector<24x256xf32>
      %53 = arith.mulf %51, %52 : vector<24x256xf32>
      %54 = vector.broadcast %33 : vector<1x256xf32> to vector<24x256xf32>
      %55 = arith.addf %53, %54 : vector<24x256xf32>
      %56 = arith.truncf %55 : vector<24x256xf32> to vector<24x256xbf16>
      %c0_29 = arith.constant 0 : index
      %c0_30 = arith.constant 0 : index
      %57 = vector.load %arg10[%c0_29, %c0_30] : memref<24x256xbf16, #tpu.memory_space<vmem>>, vector<24x256xbf16>
      tpu.vector_store %arg10[%c0_29, %c0_30], %56 {strides = array<i32>} : memref<24x256xbf16, #tpu.memory_space<vmem>>, vector<24x256xbf16>,
      %cst_31 = arith.constant 0.000000e+00 : f32
      %58 = vector.broadcast %cst_31 : f32 to vector<24x256xf32>
      %c0_32 = arith.constant 0 : index
      %c0_33 = arith.constant 0 : index
      %59 = vector.load %arg11[%c0_32, %c0_33] : memref<24x256xf32, #tpu.memory_space<vmem>>, vector<24x256xf32>
      tpu.vector_store %arg11[%c0_32, %c0_33], %58 {strides = array<i32>} : memref<24x256xf32, #tpu.memory_space<vmem>>, vector<24x256xf32>,
    } else {
    }
    %c0 = arith.constant 0 : index
    %c0_1 = arith.constant 0 : index
    %3 = vector.load %arg10[%c0, %c0_1] : memref<24x256xbf16, #tpu.memory_space<vmem>>, vector<24x256xbf16>
    %c0_2 = arith.constant 0 : index
    %c0_3 = arith.constant 0 : index
    %4 = vector.load %arg5[%c0_2, %c0_3] : memref<256x512xbf16, #tpu.memory_space<vmem>>, vector<256x512xbf16>
    %cst = arith.constant dense<0.000000e+00> : vector<24x512xf32>
    %5 = tpu.matmul %3, %4, %cst {dimension_numbers = #tpu.dot_dimension_numbers<[1], [0], [0], [1], [0, 0, 1, 1], [], []>} : vector<24x256xbf16>, vector<256x512xbf16>, vector<24x512xf32> -> vector<24x512xf32>
    %c0_4 = arith.constant 0 : index
    %c0_5 = arith.constant 0 : index
    %6 = vector.load %arg6[%c0_4, %c0_5] : memref<1x512xf32, #tpu.memory_space<vmem>>, vector<1x512xf32>
    %7 = vector.broadcast %6 : vector<1x512xf32> to vector<24x512xf32>
    %8 = arith.addf %5, %7 : vector<24x512xf32>
    %9 = arith.mulf %8, %8 : vector<24x512xf32>
    %10 = arith.mulf %8, %9 : vector<24x512xf32>
    %cst_6 = arith.constant 4.471500e-02 : f32
    %11 = vector.broadcast %cst_6 : f32 to vector<24x512xf32>
    %12 = arith.mulf %11, %10 : vector<24x512xf32>
    %13 = arith.addf %8, %12 : vector<24x512xf32>
    %cst_7 = arith.constant 0.797884583 : f32
    %14 = vector.broadcast %cst_7 : f32 to vector<24x512xf32>
    %15 = arith.mulf %14, %13 : vector<24x512xf32>
    %16 = math.tanh %15 : vector<24x512xf32>
    %cst_8 = arith.constant 1.000000e+00 : f32
    %17 = vector.broadcast %cst_8 : f32 to vector<24x512xf32>
    %18 = arith.addf %17, %16 : vector<24x512xf32>
    %cst_9 = arith.constant 5.000000e-01 : f32
    %19 = vector.broadcast %cst_9 : f32 to vector<24x512xf32>
    %20 = arith.mulf %19, %18 : vector<24x512xf32>
    %21 = arith.mulf %8, %20 : vector<24x512xf32>
    %c0_10 = arith.constant 0 : index
    %c0_11 = arith.constant 0 : index
    %22 = vector.load %arg11[%c0_10, %c0_11] : memref<24x256xf32, #tpu.memory_space<vmem>>, vector<24x256xf32>
    %23 = arith.truncf %21 : vector<24x512xf32> to vector<24x512xbf16>
    %c0_12 = arith.constant 0 : index
    %c0_13 = arith.constant 0 : index
    %24 = vector.load %arg7[%c0_12, %c0_13] : memref<512x256xbf16, #tpu.memory_space<vmem>>, vector<512x256xbf16>
    %cst_14 = arith.constant dense<0.000000e+00> : vector<24x256xf32>
    %25 = tpu.matmul %23, %24, %cst_14 {dimension_numbers = #tpu.dot_dimension_numbers<[1], [0], [0], [1], [0, 0, 1, 1], [], []>} : vector<24x512xbf16>, vector<512x256xbf16>, vector<24x256xf32> -> vector<24x256xf32>
    %26 = arith.addf %22, %25 : vector<24x256xf32>
    %c0_15 = arith.constant 0 : index
    %c0_16 = arith.constant 0 : index
    %27 = vector.load %arg11[%c0_15, %c0_16] : memref<24x256xf32, #tpu.memory_space<vmem>>, vector<24x256xf32>
    tpu.vector_store %arg11[%c0_15, %c0_16], %26 {strides = array<i32>} : memref<24x256xf32, #tpu.memory_space<vmem>>, vector<24x256xf32>,
    %c1_i32 = arith.constant 1 : i32
    %28 = arith.cmpi eq, %arg1, %c1_i32 : i32
    %29 = arith.extui %28 : i1 to i32
    %c0_i32_17 = arith.constant 0 : i32
    %30 = arith.cmpi ne, %29, %c0_i32_17 : i32
    scf.if %30 {
      %c0_18 = arith.constant 0 : index
      %c0_19 = arith.constant 0 : index
      %31 = vector.load %arg11[%c0_18, %c0_19] : memref<24x256xf32, #tpu.memory_space<vmem>>, vector<24x256xf32>
      %c0_20 = arith.constant 0 : index
      %c0_21 = arith.constant 0 : index
      %32 = vector.load %arg8[%c0_20, %c0_21] : memref<1x256xf32, #tpu.memory_space<vmem>>, vector<1x256xf32>
      %33 = vector.broadcast %32 : vector<1x256xf32> to vector<24x256xf32>
      %34 = arith.addf %31, %33 : vector<24x256xf32>
      %c0_22 = arith.constant 0 : index
      %c0_23 = arith.constant 0 : index
      %35 = vector.load %arg2[%c0_22, %c0_23] : memref<24x256xf32, #tpu.memory_space<vmem>>, vector<24x256xf32>
      %36 = arith.addf %34, %35 : vector<24x256xf32>
      %c0_24 = arith.constant 0 : index
      %c0_25 = arith.constant 0 : index
      %37 = vector.load %arg9[%c0_24, %c0_25] : memref<24x256xf32, #tpu.memory_space<vmem>>, vector<24x256xf32>
      tpu.vector_store %arg9[%c0_24, %c0_25], %36 {strides = array<i32>} : memref<24x256xf32, #tpu.memory_space<vmem>>, vector<24x256xf32>,
    } else {
    }
    return
  }
  func.func @transform_0(%arg0: i32, %arg1: i32) -> (i32, i32) {
    %c0_i32 = arith.constant 0 : i32
    %c0_i32_0 = arith.constant 0 : i32
    return %arg0, %c0_i32 : i32, i32
  }
  func.func @transform_1(%arg0: i32, %arg1: i32) -> (i32, i32) {
    %c0_i32 = arith.constant 0 : i32
    %c0_i32_0 = arith.constant 0 : i32
    %c0_i32_1 = arith.constant 0 : i32
    return %c0_i32, %c0_i32_0 : i32, i32
  }
  func.func @transform_2(%arg0: i32, %arg1: i32) -> (i32, i32) {
    %c0_i32 = arith.constant 0 : i32
    %c0_i32_0 = arith.constant 0 : i32
    %c0_i32_1 = arith.constant 0 : i32
    return %c0_i32, %c0_i32_0 : i32, i32
  }
  func.func @transform_3(%arg0: i32, %arg1: i32) -> (i32, i32) {
    %c0_i32 = arith.constant 0 : i32
    %c0_i32_0 = arith.constant 0 : i32
    return %c0_i32, %arg1 : i32, i32
  }
  func.func @transform_4(%arg0: i32, %arg1: i32) -> (i32, i32) {
    %c0_i32 = arith.constant 0 : i32
    %c0_i32_0 = arith.constant 0 : i32
    return %c0_i32, %arg1 : i32, i32
  }
  func.func @transform_5(%arg0: i32, %arg1: i32) -> (i32, i32) {
    %c0_i32 = arith.constant 0 : i32
    %c0_i32_0 = arith.constant 0 : i32
    return %arg1, %c0_i32 : i32, i32
  }
  func.func @transform_6(%arg0: i32, %arg1: i32) -> (i32, i32) {
    %c0_i32 = arith.constant 0 : i32
    %c0_i32_0 = arith.constant 0 : i32
    %c0_i32_1 = arith.constant 0 : i32
    return %c0_i32, %c0_i32_0 : i32, i32
  }
  func.func @transform_7(%arg0: i32, %arg1: i32) -> (i32, i32) {
    %c0_i32 = arith.constant 0 : i32
    %c0_i32_0 = arith.constant 0 : i32
    return %arg0, %c0_i32 : i32, i32
  }
}

module attributes {stable_mosaic.version = 11 : i64} {
  func.func @_attn_block_kernel(%arg0: i32, %arg1: memref<24x256xf32, #tpu.memory_space<vmem>>, %arg2: memref<1x256xf32, #tpu.memory_space<vmem>>, %arg3: memref<1x256xf32, #tpu.memory_space<vmem>>, %arg4: memref<256x256xbf16, #tpu.memory_space<vmem>>, %arg5: memref<256x256xbf16, #tpu.memory_space<vmem>>, %arg6: memref<256x256xbf16, #tpu.memory_space<vmem>>, %arg7: memref<1x256xf32, #tpu.memory_space<vmem>>, %arg8: memref<1x256xf32, #tpu.memory_space<vmem>>, %arg9: memref<1x256xf32, #tpu.memory_space<vmem>>, %arg10: memref<256x256xbf16, #tpu.memory_space<vmem>>, %arg11: memref<1x256xf32, #tpu.memory_space<vmem>>, %arg12: memref<24x256xf32, #tpu.memory_space<vmem>>) attributes {dimension_semantics = [#tpu.dimension_semantics<parallel>], iteration_bounds = array<i64: 2>, scalar_prefetch = 0 : i64, scratch_operands = 0 : i64, tpu.core_type = #tpu.core_type<tc>, window_params = [{transform_indices = @transform_0, window_bounds = array<i64: 24, 256>}, {pipeline_mode = #tpu.pipeline_mode<synchronous>, transform_indices = @transform_1, window_bounds = array<i64: 1, 256>}, {pipeline_mode = #tpu.pipeline_mode<synchronous>, transform_indices = @transform_2, window_bounds = array<i64: 1, 256>}, {pipeline_mode = #tpu.pipeline_mode<synchronous>, transform_indices = @transform_3, window_bounds = array<i64: 256, 256>}, {pipeline_mode = #tpu.pipeline_mode<synchronous>, transform_indices = @transform_4, window_bounds = array<i64: 256, 256>}, {pipeline_mode = #tpu.pipeline_mode<synchronous>, transform_indices = @transform_5, window_bounds = array<i64: 256, 256>}, {pipeline_mode = #tpu.pipeline_mode<synchronous>, transform_indices = @transform_6, window_bounds = array<i64: 1, 256>}, {pipeline_mode = #tpu.pipeline_mode<synchronous>, transform_indices = @transform_7, window_bounds = array<i64: 1, 256>}, {pipeline_mode = #tpu.pipeline_mode<synchronous>, transform_indices = @transform_8, window_bounds = array<i64: 1, 256>}, {pipeline_mode = #tpu.pipeline_mode<synchronous>, transform_indices = @transform_9, window_bounds = array<i64: 256, 256>}, {pipeline_mode = #tpu.pipeline_mode<synchronous>, transform_indices = @transform_10, window_bounds = array<i64: 1, 256>}, {transform_indices = @transform_11, window_bounds = array<i64: 24, 256>}]} {
    %c0 = arith.constant 0 : index
    %c0_0 = arith.constant 0 : index
    %0 = vector.load %arg1[%c0, %c0_0] : memref<24x256xf32, #tpu.memory_space<vmem>>, vector<24x256xf32>
    %c0_1 = arith.constant 0 : index
    %c0_2 = arith.constant 0 : index
    %1 = vector.load %arg2[%c0_1, %c0_2] : memref<1x256xf32, #tpu.memory_space<vmem>>, vector<1x256xf32>
    %c0_3 = arith.constant 0 : index
    %c0_4 = arith.constant 0 : index
    %2 = vector.load %arg3[%c0_3, %c0_4] : memref<1x256xf32, #tpu.memory_space<vmem>>, vector<1x256xf32>
    %cst = arith.constant dense<0.000000e+00> : vector<24xf32>
    %3 = vector.multi_reduction <add>, %0, %cst [1] : vector<24x256xf32> to vector<24xf32>
    %4 = vector.shape_cast %3 : vector<24xf32> to vector<24x1xf32>
    %cst_5 = arith.constant 2.560000e+02 : f32
    %5 = vector.broadcast %cst_5 : f32 to vector<24x1xf32>
    %6 = arith.divf %4, %5 : vector<24x1xf32>
    %7 = vector.broadcast %6 : vector<24x1xf32> to vector<24x256xf32>
    %8 = arith.subf %0, %7 : vector<24x256xf32>
    %9 = arith.mulf %8, %8 : vector<24x256xf32>
    %cst_6 = arith.constant dense<0.000000e+00> : vector<24xf32>
    %10 = vector.multi_reduction <add>, %9, %cst_6 [1] : vector<24x256xf32> to vector<24xf32>
    %11 = vector.shape_cast %10 : vector<24xf32> to vector<24x1xf32>
    %cst_7 = arith.constant 2.560000e+02 : f32
    %12 = vector.broadcast %cst_7 : f32 to vector<24x1xf32>
    %13 = arith.divf %11, %12 : vector<24x1xf32>
    %14 = vector.broadcast %6 : vector<24x1xf32> to vector<24x256xf32>
    %15 = arith.subf %0, %14 : vector<24x256xf32>
    %cst_8 = arith.constant 9.99999997E-7 : f32
    %16 = vector.broadcast %cst_8 : f32 to vector<24x1xf32>
    %17 = arith.addf %13, %16 : vector<24x1xf32>
    %18 = math.rsqrt %17 : vector<24x1xf32>
    %19 = vector.broadcast %18 : vector<24x1xf32> to vector<24x256xf32>
    %20 = arith.mulf %15, %19 : vector<24x256xf32>
    %21 = vector.broadcast %1 : vector<1x256xf32> to vector<24x256xf32>
    %22 = arith.mulf %20, %21 : vector<24x256xf32>
    %23 = vector.broadcast %2 : vector<1x256xf32> to vector<24x256xf32>
    %24 = arith.addf %22, %23 : vector<24x256xf32>
    %25 = arith.truncf %24 : vector<24x256xf32> to vector<24x256xbf16>
    %c0_9 = arith.constant 0 : index
    %c0_10 = arith.constant 0 : index
    %26 = vector.load %arg4[%c0_9, %c0_10] : memref<256x256xbf16, #tpu.memory_space<vmem>>, vector<256x256xbf16>
    %cst_11 = arith.constant dense<0.000000e+00> : vector<24x256xf32>
    %27 = tpu.matmul %25, %26, %cst_11 {dimension_numbers = #tpu.dot_dimension_numbers<[1], [0], [0], [1], [0, 0, 1, 1], [], []>} : vector<24x256xbf16>, vector<256x256xbf16>, vector<24x256xf32> -> vector<24x256xf32>
    %c0_12 = arith.constant 0 : index
    %c0_13 = arith.constant 0 : index
    %28 = vector.load %arg7[%c0_12, %c0_13] : memref<1x256xf32, #tpu.memory_space<vmem>>, vector<1x256xf32>
    %29 = vector.broadcast %28 : vector<1x256xf32> to vector<24x256xf32>
    %30 = arith.addf %27, %29 : vector<24x256xf32>
    %31 = arith.truncf %30 : vector<24x256xf32> to vector<24x256xbf16>
    %32 = vector.shape_cast %31 : vector<24x256xbf16> to vector<24x2x128xbf16>
    %33 = tpu.transpose %32, [1, 0, 2] : vector<24x2x128xbf16> -> vector<2x24x128xbf16>
    %c0_14 = arith.constant 0 : index
    %c0_15 = arith.constant 0 : index
    %34 = vector.load %arg5[%c0_14, %c0_15] : memref<256x256xbf16, #tpu.memory_space<vmem>>, vector<256x256xbf16>
    %cst_16 = arith.constant dense<0.000000e+00> : vector<24x256xf32>
    %35 = tpu.matmul %25, %34, %cst_16 {dimension_numbers = #tpu.dot_dimension_numbers<[1], [0], [0], [1], [0, 0, 1, 1], [], []>} : vector<24x256xbf16>, vector<256x256xbf16>, vector<24x256xf32> -> vector<24x256xf32>
    %c0_17 = arith.constant 0 : index
    %c0_18 = arith.constant 0 : index
    %36 = vector.load %arg8[%c0_17, %c0_18] : memref<1x256xf32, #tpu.memory_space<vmem>>, vector<1x256xf32>
    %37 = vector.broadcast %36 : vector<1x256xf32> to vector<24x256xf32>
    %38 = arith.addf %35, %37 : vector<24x256xf32>
    %39 = arith.truncf %38 : vector<24x256xf32> to vector<24x256xbf16>
    %40 = vector.shape_cast %39 : vector<24x256xbf16> to vector<24x2x128xbf16>
    %41 = tpu.transpose %40, [1, 0, 2] : vector<24x2x128xbf16> -> vector<2x24x128xbf16>
    %c0_19 = arith.constant 0 : index
    %c0_20 = arith.constant 0 : index
    %42 = vector.load %arg6[%c0_19, %c0_20] : memref<256x256xbf16, #tpu.memory_space<vmem>>, vector<256x256xbf16>
    %cst_21 = arith.constant dense<0.000000e+00> : vector<24x256xf32>
    %43 = tpu.matmul %25, %42, %cst_21 {dimension_numbers = #tpu.dot_dimension_numbers<[1], [0], [0], [1], [0, 0, 1, 1], [], []>} : vector<24x256xbf16>, vector<256x256xbf16>, vector<24x256xf32> -> vector<24x256xf32>
    %c0_22 = arith.constant 0 : index
    %c0_23 = arith.constant 0 : index
    %44 = vector.load %arg9[%c0_22, %c0_23] : memref<1x256xf32, #tpu.memory_space<vmem>>, vector<1x256xf32>
    %45 = vector.broadcast %44 : vector<1x256xf32> to vector<24x256xf32>
    %46 = arith.addf %43, %45 : vector<24x256xf32>
    %47 = arith.truncf %46 : vector<24x256xf32> to vector<24x256xbf16>
    %48 = vector.shape_cast %47 : vector<24x256xbf16> to vector<24x2x128xbf16>
    %49 = tpu.transpose %48, [1, 0, 2] : vector<24x2x128xbf16> -> vector<2x24x128xbf16>
    "tpu.trace_start"() <{level = 10 : i32, message = "hqd,hkd->hqk"}> : () -> ()
    %cst_24 = arith.constant dense<0.000000e+00> : vector<2x24x24xf32>
    %50 = tpu.matmul %33, %41, %cst_24 {dimension_numbers = #tpu.dot_dimension_numbers<[2], [2], [1], [1], [0, 0, 0, 1, 1, 1], [0], [0]>} : vector<2x24x128xbf16>, vector<2x24x128xbf16>, vector<2x24x24xf32> -> vector<2x24x24xf32>
    "tpu.trace_stop"() : () -> ()
    %cst_25 = arith.constant 0.0883883461 : f32
    %51 = vector.broadcast %cst_25 : f32 to vector<2x24x24xf32>
    %52 = arith.mulf %50, %51 : vector<2x24x24xf32>
    %53 = tpu.iota {dimensions = array<i32: 1>} : vector<1x24xi32>
    %c17_i32 = arith.constant 17 : i32
    %54 = vector.broadcast %c17_i32 : i32 to vector<1x24xi32>
    %55 = arith.cmpi slt, %53, %54 : vector<1x24xi32>
    %cst_26 = arith.constant -1.000000e+30 : f32
    %56 = vector.shape_cast %55 : vector<1x24xi1> to vector<1x1x24xi1>
    %57 = vector.broadcast %56 : vector<1x1x24xi1> to vector<2x24x24xi1>
    %58 = vector.broadcast %cst_26 : f32 to vector<2x24x24xf32>
    %59 = arith.select %57, %52, %58 : vector<2x24x24xi1>, vector<2x24x24xf32>
    %cst_27 = arith.constant dense<0xFF800000> : vector<2x24xf32>
    %60 = vector.multi_reduction <maximumf>, %59, %cst_27 [2] : vector<2x24x24xf32> to vector<2x24xf32>
    %61 = vector.shape_cast %60 : vector<2x24xf32> to vector<2x24x1xf32>
    %62 = vector.broadcast %61 : vector<2x24x1xf32> to vector<2x24x24xf32>
    %63 = arith.subf %59, %62 : vector<2x24x24xf32>
    %64 = math.exp %63 : vector<2x24x24xf32>
    %cst_28 = arith.constant dense<0.000000e+00> : vector<2x24xf32>
    %65 = vector.multi_reduction <add>, %64, %cst_28 [2] : vector<2x24x24xf32> to vector<2x24xf32>
    %66 = vector.shape_cast %65 : vector<2x24xf32> to vector<2x24x1xf32>
    %67 = tpu.reciprocal %66 {approx = true} : vector<2x24x1xf32> -> vector<2x24x1xf32>
    %68 = vector.broadcast %67 : vector<2x24x1xf32> to vector<2x24x24xf32>
    %69 = arith.mulf %64, %68 : vector<2x24x24xf32>
    %70 = arith.truncf %69 : vector<2x24x24xf32> to vector<2x24x24xbf16>
    "tpu.trace_start"() <{level = 10 : i32, message = "hqk,hkd->hqd"}> : () -> ()
    %cst_29 = arith.constant dense<0.000000e+00> : vector<2x24x128xf32>
    %71 = tpu.matmul %70, %49, %cst_29 {dimension_numbers = #tpu.dot_dimension_numbers<[2], [1], [1], [2], [0, 0, 0, 1, 1, 2], [0], [0]>} : vector<2x24x24xbf16>, vector<2x24x128xbf16>, vector<2x24x128xf32> -> vector<2x24x128xf32>
    "tpu.trace_stop"() : () -> ()
    %72 = tpu.transpose %71, [1, 0, 2] : vector<2x24x128xf32> -> vector<24x2x128xf32>
    %73 = vector.shape_cast %72 : vector<24x2x128xf32> to vector<24x256xf32>
    %74 = arith.truncf %73 : vector<24x256xf32> to vector<24x256xbf16>
    %c0_30 = arith.constant 0 : index
    %c0_31 = arith.constant 0 : index
    %75 = vector.load %arg10[%c0_30, %c0_31] : memref<256x256xbf16, #tpu.memory_space<vmem>>, vector<256x256xbf16>
    %cst_32 = arith.constant dense<0.000000e+00> : vector<24x256xf32>
    %76 = tpu.matmul %74, %75, %cst_32 {dimension_numbers = #tpu.dot_dimension_numbers<[1], [0], [0], [1], [0, 0, 1, 1], [], []>} : vector<24x256xbf16>, vector<256x256xbf16>, vector<24x256xf32> -> vector<24x256xf32>
    %c0_33 = arith.constant 0 : index
    %c0_34 = arith.constant 0 : index
    %77 = vector.load %arg11[%c0_33, %c0_34] : memref<1x256xf32, #tpu.memory_space<vmem>>, vector<1x256xf32>
    %78 = vector.broadcast %77 : vector<1x256xf32> to vector<24x256xf32>
    %79 = arith.addf %76, %78 : vector<24x256xf32>
    %80 = arith.addf %79, %0 : vector<24x256xf32>
    %c0_35 = arith.constant 0 : index
    %c0_36 = arith.constant 0 : index
    %81 = vector.load %arg12[%c0_35, %c0_36] : memref<24x256xf32, #tpu.memory_space<vmem>>, vector<24x256xf32>
    tpu.vector_store %arg12[%c0_35, %c0_36], %80 {strides = array<i32>} : memref<24x256xf32, #tpu.memory_space<vmem>>, vector<24x256xf32>,
    return
  }
  func.func @transform_0(%arg0: i32) -> (i32, i32) {
    %c0_i32 = arith.constant 0 : i32
    %c0_i32_0 = arith.constant 0 : i32
    return %arg0, %c0_i32 : i32, i32
  }
  func.func @transform_1(%arg0: i32) -> (i32, i32) {
    %c0_i32 = arith.constant 0 : i32
    %c0_i32_0 = arith.constant 0 : i32
    %c0_i32_1 = arith.constant 0 : i32
    return %c0_i32, %c0_i32_0 : i32, i32
  }
  func.func @transform_2(%arg0: i32) -> (i32, i32) {
    %c0_i32 = arith.constant 0 : i32
    %c0_i32_0 = arith.constant 0 : i32
    %c0_i32_1 = arith.constant 0 : i32
    return %c0_i32, %c0_i32_0 : i32, i32
  }
  func.func @transform_3(%arg0: i32) -> (i32, i32) {
    %c0_i32 = arith.constant 0 : i32
    %c0_i32_0 = arith.constant 0 : i32
    %c0_i32_1 = arith.constant 0 : i32
    return %c0_i32, %c0_i32_0 : i32, i32
  }
  func.func @transform_4(%arg0: i32) -> (i32, i32) {
    %c0_i32 = arith.constant 0 : i32
    %c0_i32_0 = arith.constant 0 : i32
    %c0_i32_1 = arith.constant 0 : i32
    return %c0_i32, %c0_i32_0 : i32, i32
  }
  func.func @transform_5(%arg0: i32) -> (i32, i32) {
    %c0_i32 = arith.constant 0 : i32
    %c0_i32_0 = arith.constant 0 : i32
    %c0_i32_1 = arith.constant 0 : i32
    return %c0_i32, %c0_i32_0 : i32, i32
  }
  func.func @transform_6(%arg0: i32) -> (i32, i32) {
    %c0_i32 = arith.constant 0 : i32
    %c0_i32_0 = arith.constant 0 : i32
    %c0_i32_1 = arith.constant 0 : i32
    return %c0_i32, %c0_i32_0 : i32, i32
  }
  func.func @transform_7(%arg0: i32) -> (i32, i32) {
    %c0_i32 = arith.constant 0 : i32
    %c0_i32_0 = arith.constant 0 : i32
    %c0_i32_1 = arith.constant 0 : i32
    return %c0_i32, %c0_i32_0 : i32, i32
  }
  func.func @transform_8(%arg0: i32) -> (i32, i32) {
    %c0_i32 = arith.constant 0 : i32
    %c0_i32_0 = arith.constant 0 : i32
    %c0_i32_1 = arith.constant 0 : i32
    return %c0_i32, %c0_i32_0 : i32, i32
  }
  func.func @transform_9(%arg0: i32) -> (i32, i32) {
    %c0_i32 = arith.constant 0 : i32
    %c0_i32_0 = arith.constant 0 : i32
    %c0_i32_1 = arith.constant 0 : i32
    return %c0_i32, %c0_i32_0 : i32, i32
  }
  func.func @transform_10(%arg0: i32) -> (i32, i32) {
    %c0_i32 = arith.constant 0 : i32
    %c0_i32_0 = arith.constant 0 : i32
    %c0_i32_1 = arith.constant 0 : i32
    return %c0_i32, %c0_i32_0 : i32, i32
  }
  func.func @transform_11(%arg0: i32) -> (i32, i32) {
    %c0_i32 = arith.constant 0 : i32
    %c0_i32_0 = arith.constant 0 : i32
    return %arg0, %c0_i32 : i32, i32
  }
}

module attributes {stable_mosaic.version = 11 : i64} {
  func.func @_ln_linear_kernel(%arg0: i32, %arg1: memref<8x256xf32, #tpu.memory_space<vmem>>, %arg2: memref<1x256xf32, #tpu.memory_space<vmem>>, %arg3: memref<1x256xf32, #tpu.memory_space<vmem>>, %arg4: memref<256x10xbf16, #tpu.memory_space<vmem>>, %arg5: memref<1x10xf32, #tpu.memory_space<vmem>>, %arg6: memref<8x10xf32, #tpu.memory_space<vmem>>) attributes {dimension_semantics = [#tpu.dimension_semantics<parallel>], iteration_bounds = array<i64: 1>, scalar_prefetch = 0 : i64, scratch_operands = 0 : i64, tpu.core_type = #tpu.core_type<tc>, window_params = [{transform_indices = @transform_0, window_bounds = array<i64: 8, 256>}, {pipeline_mode = #tpu.pipeline_mode<synchronous>, transform_indices = @transform_1, window_bounds = array<i64: 1, 256>}, {pipeline_mode = #tpu.pipeline_mode<synchronous>, transform_indices = @transform_2, window_bounds = array<i64: 1, 256>}, {pipeline_mode = #tpu.pipeline_mode<synchronous>, transform_indices = @transform_3, window_bounds = array<i64: 256, 10>}, {pipeline_mode = #tpu.pipeline_mode<synchronous>, transform_indices = @transform_4, window_bounds = array<i64: 1, 10>}, {transform_indices = @transform_5, window_bounds = array<i64: 8, 10>}]} {
    %c0 = arith.constant 0 : index
    %c0_0 = arith.constant 0 : index
    %0 = vector.load %arg1[%c0, %c0_0] : memref<8x256xf32, #tpu.memory_space<vmem>>, vector<8x256xf32>
    %c0_1 = arith.constant 0 : index
    %c0_2 = arith.constant 0 : index
    %1 = vector.load %arg2[%c0_1, %c0_2] : memref<1x256xf32, #tpu.memory_space<vmem>>, vector<1x256xf32>
    %c0_3 = arith.constant 0 : index
    %c0_4 = arith.constant 0 : index
    %2 = vector.load %arg3[%c0_3, %c0_4] : memref<1x256xf32, #tpu.memory_space<vmem>>, vector<1x256xf32>
    %cst = arith.constant dense<0.000000e+00> : vector<8xf32>
    %3 = vector.multi_reduction <add>, %0, %cst [1] : vector<8x256xf32> to vector<8xf32>
    %4 = vector.shape_cast %3 : vector<8xf32> to vector<8x1xf32>
    %cst_5 = arith.constant 2.560000e+02 : f32
    %5 = vector.broadcast %cst_5 : f32 to vector<8x1xf32>
    %6 = arith.divf %4, %5 : vector<8x1xf32>
    %7 = vector.broadcast %6 : vector<8x1xf32> to vector<8x256xf32>
    %8 = arith.subf %0, %7 : vector<8x256xf32>
    %9 = arith.mulf %8, %8 : vector<8x256xf32>
    %cst_6 = arith.constant dense<0.000000e+00> : vector<8xf32>
    %10 = vector.multi_reduction <add>, %9, %cst_6 [1] : vector<8x256xf32> to vector<8xf32>
    %11 = vector.shape_cast %10 : vector<8xf32> to vector<8x1xf32>
    %cst_7 = arith.constant 2.560000e+02 : f32
    %12 = vector.broadcast %cst_7 : f32 to vector<8x1xf32>
    %13 = arith.divf %11, %12 : vector<8x1xf32>
    %14 = vector.broadcast %6 : vector<8x1xf32> to vector<8x256xf32>
    %15 = arith.subf %0, %14 : vector<8x256xf32>
    %cst_8 = arith.constant 9.99999997E-7 : f32
    %16 = vector.broadcast %cst_8 : f32 to vector<8x1xf32>
    %17 = arith.addf %13, %16 : vector<8x1xf32>
    %18 = math.rsqrt %17 : vector<8x1xf32>
    %19 = vector.broadcast %18 : vector<8x1xf32> to vector<8x256xf32>
    %20 = arith.mulf %15, %19 : vector<8x256xf32>
    %21 = vector.broadcast %1 : vector<1x256xf32> to vector<8x256xf32>
    %22 = arith.mulf %20, %21 : vector<8x256xf32>
    %23 = vector.broadcast %2 : vector<1x256xf32> to vector<8x256xf32>
    %24 = arith.addf %22, %23 : vector<8x256xf32>
    %25 = arith.truncf %24 : vector<8x256xf32> to vector<8x256xbf16>
    %c0_9 = arith.constant 0 : index
    %c0_10 = arith.constant 0 : index
    %26 = vector.load %arg4[%c0_9, %c0_10] : memref<256x10xbf16, #tpu.memory_space<vmem>>, vector<256x10xbf16>
    %cst_11 = arith.constant dense<0.000000e+00> : vector<8x10xf32>
    %27 = tpu.matmul %25, %26, %cst_11 {dimension_numbers = #tpu.dot_dimension_numbers<[1], [0], [0], [1], [0, 0, 1, 1], [], []>} : vector<8x256xbf16>, vector<256x10xbf16>, vector<8x10xf32> -> vector<8x10xf32>
    %c0_12 = arith.constant 0 : index
    %c0_13 = arith.constant 0 : index
    %28 = vector.load %arg5[%c0_12, %c0_13] : memref<1x10xf32, #tpu.memory_space<vmem>>, vector<1x10xf32>
    %29 = vector.broadcast %28 : vector<1x10xf32> to vector<8x10xf32>
    %30 = arith.addf %27, %29 : vector<8x10xf32>
    %c0_14 = arith.constant 0 : index
    %c0_15 = arith.constant 0 : index
    %31 = vector.load %arg6[%c0_14, %c0_15] : memref<8x10xf32, #tpu.memory_space<vmem>>, vector<8x10xf32>
    tpu.vector_store %arg6[%c0_14, %c0_15], %30 {strides = array<i32>} : memref<8x10xf32, #tpu.memory_space<vmem>>, vector<8x10xf32>,
    return
  }
  func.func @transform_0(%arg0: i32) -> (i32, i32) {
    %c0_i32 = arith.constant 0 : i32
    %c0_i32_0 = arith.constant 0 : i32
    return %arg0, %c0_i32 : i32, i32
  }
  func.func @transform_1(%arg0: i32) -> (i32, i32) {
    %c0_i32 = arith.constant 0 : i32
    %c0_i32_0 = arith.constant 0 : i32
    %c0_i32_1 = arith.constant 0 : i32
    return %c0_i32, %c0_i32_0 : i32, i32
  }
  func.func @transform_2(%arg0: i32) -> (i32, i32) {
    %c0_i32 = arith.constant 0 : i32
    %c0_i32_0 = arith.constant 0 : i32
    %c0_i32_1 = arith.constant 0 : i32
    return %c0_i32, %c0_i32_0 : i32, i32
  }
  func.func @transform_3(%arg0: i32) -> (i32, i32) {
    %c0_i32 = arith.constant 0 : i32
    %c0_i32_0 = arith.constant 0 : i32
    %c0_i32_1 = arith.constant 0 : i32
    return %c0_i32, %c0_i32_0 : i32, i32
  }
  func.func @transform_4(%arg0: i32) -> (i32, i32) {
    %c0_i32 = arith.constant 0 : i32
    %c0_i32_0 = arith.constant 0 : i32
    %c0_i32_1 = arith.constant 0 : i32
    return %c0_i32, %c0_i32_0 : i32, i32
  }
  func.func @transform_5(%arg0: i32) -> (i32, i32) {
    %c0_i32 = arith.constant 0 : i32
    %c0_i32_0 = arith.constant 0 : i32
    return %arg0, %c0_i32 : i32, i32
  }
}

</mosaic_0001>

<bundles_post_ra>
// kernel: spec_vit_forward.8
= control target key start
LH: loop header
LB: loop body
LE: loop exit
PB: predicated region body
PF: predicated region fallthrough
CT: control target
= control target key end

     0   :  { %s500_s12 = smov 0   ;;  %s622_s0 = inlined_call_operand.vmem [shape: f32[32,128], index: 0, kind: input, shape index: {}]   ;;  %s623_s1 = inlined_call_operand.vmem [shape: bf16[128,256], index: 1, kind: input, shape index: {}]   ;;  %s624_s2 = inlined_call_operand.vmem [shape: f32[1,256], index: 2, kind: input, shape index: {}]   ;;  %s625_s3 = inlined_call_operand.vmem [shape: f32[32,256], index: 3, kind: output, shape index: {}]  }
   0x1 LB: > { %s371_s13 = sadd.s32 4294967295, %s478_s12   ;;  %p375_p0 = scmp.ge.s32.totalorder %s478_s12, 1  ;;  %s478_s12 = sphi %s500_s12, %s13_s12  }
   0x2   : > { %p138_p1 = scmp.lt.s32.totalorder %s478_s12, 3 }
   0x4   : > { %p139_p2 = pnand %p375_p0, %p138_p1 }
   0x5   : > { %s376_s21 = sshll.u32 (!%p139_p2), %s371_s13, 1 }
   0x6   : > { %142 = sbr.rel (%p139_p2) target bundleno = 183 (0xb7), region = 32  ;;  %p164_p3 = scmp.lt.s32.totalorder (!%p139_p2), %s376_s21, 3 }
   0xb   : > { %v439_v0 = vld [vmem:[%s623_s1 + $0x70] sm:$0xf]  ;;  %v463_v1 = vld [vmem:[%s623_s1 + $0x74] sm:$0xf0]  ;;  %v462_v2 = vld [vmem:[%s623_s1 + $0x74] sm:$0xf] }
   0xc   : > { %v440_v3 = vor.u32 %v463_v1, %v439_v0  ;;  %v441_v4 = vld [vmem:[%s623_s1 + $0x78] sm:$0xf0]  ;;  %v431_v5 = vld [vmem:[%s623_s1 + $0x60] sm:$0xf]  ;;  %v461_v6 = vld [vmem:[%s623_s1 + $0x64] sm:$0xf0] }
   0xd   : > { %v444_v7 = vor.u32 %v462_v2, %v441_v4  ;;  %v460_v8 = vld [vmem:[%s623_s1 + $0x64] sm:$0xf]  ;;  %v433_v9 = vld [vmem:[%s623_s1 + $0x68] sm:$0xf0]  ;;  %v432_v10 = vor.u32 %v461_v6, %v431_v5  ;;  %v423_v12 = vld [vmem:[%s623_s1 + $0x50] sm:$0xf] }
   0xe   : > { %281 = vmatpush.bf16.msra.mxu0 %v440_v3  ;;  %v436_v11 = vor.u32 %v460_v8, %v433_v9  ;;  %v459_v13 = vld [vmem:[%s623_s1 + $0x54] sm:$0xf0]  ;;  %v458_v14 = vld [vmem:[%s623_s1 + $0x54] sm:$0xf]  ;;  %v425_v15 = vld [vmem:[%s623_s1 + $0x58] sm:$0xf0] }
   0xf   : > { %295 = vmatpush.bf16.msra.mxu1 %v444_v7  ;;  %v424_v16 = vor.u32 %v459_v13, %v423_v12  ;;  %v428_v17 = vor.u32 %v458_v14, %v425_v15  ;;  %v415_v18 = vld [vmem:[%s623_s1 + $0x40] sm:$0xf]  ;;  %v457_v19 = vld [vmem:[%s623_s1 + $0x44] sm:$0xf0]  ;;  %v456_v20 = vld [vmem:[%s623_s1 + $0x44] sm:$0xf] }
  0x10   : > { %v417_v21 = vld [vmem:[%s623_s1 + $0x48] sm:$0xf0]  ;;  %v416_v22 = vor.u32 %v457_v19, %v415_v18  ;;  %v407_v24 = vld [vmem:[%s623_s1 + $0x30] sm:$0xf]  ;;  %v455_v25 = vld [vmem:[%s623_s1 + $0x34] sm:$0xf0] }
  0x11   : > { %v420_v23 = vor.u32 %v456_v20, %v417_v21  ;;  %v454_v26 = vld [vmem:[%s623_s1 + $0x34] sm:$0xf]  ;;  %v409_v27 = vld [vmem:[%s623_s1 + $0x38] sm:$0xf0]  ;;  %v408_v28 = vor.u32 %v455_v25, %v407_v24  ;;  %v399_v30 = vld [vmem:[%s623_s1 + $0x20] sm:$0xf] }
  0x12   : > { %282 = vmatpush.bf16.msra.mxu0 %v432_v10  ;;  %v412_v29 = vor.u32 %v454_v26, %v409_v27  ;;  %v453_v31 = vld [vmem:[%s623_s1 + $0x24] sm:$0xf0]  ;;  %v452_v32 = vld [vmem:[%s623_s1 + $0x24] sm:$0xf]  ;;  %v401_v33 = vld [vmem:[%s623_s1 + $0x28] sm:$0xf0] }
  0x13   : > { %296 = vmatpush.bf16.msra.mxu1 %v436_v11  ;;  %s627_s21 = smov (!%p164_p3, %s376_s21), 3  ;;  %v400_v34 = vor.u32 %v453_v31, %v399_v30  ;;  %v404_v35 = vor.u32 %v452_v32, %v401_v33  ;;  %v391_v36 = vld [vmem:[%s623_s1 + $0x10] sm:$0xf]  ;;  %v451_v37 = vld [vmem:[%s623_s1 + $0x14] sm:$0xf0] }
  0x14   : > { %v450_v38 = vld [vmem:[%s623_s1 + $0x14] sm:$0xf]  ;;  %v393_v39 = vld [vmem:[%s623_s1 + $0x18] sm:$0xf0]  ;;  %s377_s20 = sshll.u32 %s627_s21, 3  ;;  %v392_v40 = vor.u32 %v451_v37, %v391_v36  ;;  %s447_s7 = sshll.u32 %s627_s21, 4 }
  0x15   : > { %v396_v41 = vor.u32 %v450_v38, %v393_v39  ;;  %v383_v42 = vld [vmem:[%s623_s1] sm:$0xf]  ;;  %v449_v43 = vld [vmem:[%s623_s1 + $0x4] sm:$0xf0]  ;;  %s167_s28 = scalar_lea.vmem %s622_s0, %s377_s20  ;;  %v448_v44 = vld [vmem:[%s623_s1 + $0x4] sm:$0xf]  ;;  %s174_s10 = scalar_lea.vmem %s625_s3, %s447_s7 }
  0x16   : > { %283 = vmatpush.bf16.msra.mxu0 %v424_v16  ;;  %v385_v45 = vld [vmem:[%s623_s1 + $0x8] sm:$0xf0]  ;;  %v384_v46 = vor.u32 %v449_v43, %v383_v42  ;;  %v176_v47 = vld [vmem:[%s167_s28] sm:$0xff] }
  0x17   : > { %297 = vmatpush.bf16.msra.mxu1 %v428_v17  ;;  %v177_v48 = vld [vmem:[%s167_s28 + $0x8] sm:$0xff]  ;;  %v388_v49 = vor.u32 %v448_v44, %v385_v45  ;;  %v195_v51 = vld [vmem:[%s624_s2] sm:$0x3] }
  0x18   : > { %v178_v50 = vpack.c.bf16 %v177_v48, %v176_v47  ;;  %v197_v52 = vperm.slane %v195_v51, 0  ;;  %v198_v53 = vperm.slane %v195_v51, 1 }
  0x1a   : > { %284 = vmatpush.bf16.msra.mxu0 %v416_v22 }
  0x1b   : > { %298 = vmatpush.bf16.msra.mxu1 %v420_v23 }
  0x1e   : > { %285 = vmatpush.bf16.msra.mxu0 %v408_v28 }
  0x1f   : > { %299 = vmatpush.bf16.msra.mxu1 %v412_v29 }
  0x22   : > { %286 = vmatpush.bf16.msra.mxu0 %v400_v34 }
  0x23   : > { %300 = vmatpush.bf16.msra.mxu1 %v404_v35 }
  0x26   : > { %287 = vmatpush.bf16.msra.mxu0 %v392_v40 }
  0x27   : > { %301 = vmatpush.bf16.msra.mxu1 %v396_v41 }
  0x2a   : > { %288 = vmatpush.bf16.msra.mxu0 %v384_v46 }
  0x2b   : > { %302 = vmatpush.bf16.msra.mxu1 %v388_v49 }
  0x2d   : > { %289 = vmatmul.bf16.vlgmr.msra.gmra.mxu0 %v178_v50 }
  0x2e   : > { %303 = vmatmul.bf16.vlgmr.msra.gmra.mxu1 %v178_v50 }
  0xaa   : > { %v290_v54 = vpop.f32.mrf.mxu0 }
  0xab   : > { %v291_v55 = vadd.f32 %v290_v54, %v197_v52  ;;  %v304_v56 = vpop.f32.mrf.mxu1 }
  0xac   : > { %v305_v57 = vadd.f32 %v304_v56, %v198_v53 }
  0xad   : > { %309 = vst [vmem:[%s174_s10] sm:$0xff] %v291_v55 }
  0xae   : > { %310 = vst [vmem:[%s174_s10 + $0x8] sm:$0xff] %v305_v57 }
  0xb2   : > { %v292_v58 = vpop.f32.mrf.mxu0 }
  0xb3   : > { %v293_v59 = vadd.f32 %v292_v58, %v197_v52  ;;  %v306_v60 = vpop.f32.mrf.mxu1 }
  0xb4   : > { %v307_v61 = vadd.f32 %v306_v60, %v198_v53 }
  0xb5   : > { %311 = vst [vmem:[%s174_s10 + $0x10] sm:$0xff] %v293_v59 }
  0xb6   : > { %312 = vst [vmem:[%s174_s10 + $0x18] sm:$0xff] %v307_v61 }
  0xb7 PF: > { %s13_s12 = sadd.s32 1, %s478_s12  }
  0xb8   : > { %p10_p4 = scmp.ge.s32.totalorder %s13_s12, 4  }
  0xba   :  { %12 = sbr.rel (!%p10_p4) target bundleno = 1 (0x1), region = 62 }

// kernel: spec_vit_forward.7
= control target key start
LH: loop header
LB: loop body
LE: loop exit
PB: predicated region body
PF: predicated region fallthrough
CT: control target
= control target key end

     0   :  { %s878_s12 = smov 0   ;;  %s1282_s0 = inlined_call_operand.vmem [shape: f32[512,4], index: 0, kind: input, shape index: {}]   ;;  %s1283_s1 = inlined_call_operand.vmem [shape: bf16[4,8], index: 1, kind: input, shape index: {}]   ;;  %s1284_s2 = inlined_call_operand.vmem [shape: f32[1,8], index: 2, kind: input, shape index: {}]   ;;  %s1285_s3 = inlined_call_operand.vmem [shape: f32[512,8], index: 3, kind: output, shape index: {}]  }
   0x1 LB: > { %s747_s13 = sadd.s32 4294967295, %s856_s12   ;;  %p751_p0 = scmp.ge.s32.totalorder %s856_s12, 1  ;;  %s856_s12 = sphi %s878_s12, %s13_s12  }
   0x2   : > { %p138_p1 = scmp.lt.s32.totalorder %s856_s12, 3 }
   0x4   : > { %p139_p2 = pnand %p751_p0, %p138_p1 }
   0x5   : > { %s752_s16 = sshll.u32 (!%p139_p2), %s747_s13, 5 }
   0x6   : > { %142 = sbr.rel (%p139_p2) target bundleno = 245 (0xf5), region = 32  ;;  %p163_p3 = scmp.lt.s32.totalorder (!%p139_p2), %s752_s16, 63 }
   0xb   : > { %v223_v0 = vld [vmem:[%s1283_s1] sm:$0x3]  ;;  %vm277_vm0 = vcmask 1041408   ;;  %s1287_s16 = smov (!%p163_p3, %s752_s16), 63  ;;  %vm228_vm1 = vcmask 31744   ;;  %vm658_vm2 = vcmask 64512  }
   0xc   : > { %v279_v1 = vsel %vm277_vm0, %v223_v0, 0  ;;  %s753_s17 = sshll.u32 %s1287_s16, 3  ;;  %v950_v50 = vld [vmem:[%s1284_s2] ss:$0 sm:$0xff] }
   0xd   : > { %288 = vmatpush.bf16.msra.mxu0 %v279_v1  ;;  %774 = vmatpush.bf16.msra.mxu1 %v279_v1  ;;  %s897_s20 = scalar_lea.vmem %s1282_s0, %s753_s17  ;;  %s1022_s25 = scalar_lea.vmem %s1285_s3, %s753_s17 }
   0xe   : > { %775 = vmatpush.bf16.msra.mxu2 %v279_v1  ;;  %776 = vmatpush.bf16.msra.mxu3 %v279_v1  ;;  %v175_v2 = vld [vmem:[%s897_s20] sm:$0xff]  ;;  %v176_v3 = vld [vmem:[%s897_s20 + $0x8] sm:$0xff]  ;;  %v177_v14 = vld [vmem:[%s897_s20 + $0x10] sm:$0xff] }
   0xf   : > { %v183_v4 = vld [vmem:[%s897_s20 + $0x40] sm:$0xff]  ;;  %v207_v5 = vpack.c.bf16 %v176_v3, %v175_v2  ;;  %v184_v6 = vld [vmem:[%s897_s20 + $0x48] sm:$0xff]  ;;  %v178_v15 = vld [vmem:[%s897_s20 + $0x18] sm:$0xff] }
  0x10   : > { %v191_v7 = vld [vmem:[%s897_s20 + $0x80] sm:$0xff]  ;;  %v192_v8 = vld [vmem:[%s897_s20 + $0x88] sm:$0xff]  ;;  %v211_v9 = vpack.c.bf16 %v184_v6, %v183_v4  ;;  %v185_v16 = vld [vmem:[%s897_s20 + $0x50] sm:$0xff]  ;;  %v208_v22 = vpack.c.bf16 %v178_v15, %v177_v14 }
  0x11   : > { %v215_v10 = vpack.c.bf16 %v192_v8, %v191_v7  ;;  %v199_v11 = vld [vmem:[%s897_s20 + $0xc0] sm:$0xff]  ;;  %v200_v12 = vld [vmem:[%s897_s20 + $0xc8] sm:$0xff]  ;;  %756 = vmatmul.msk.bf16.vlgmr.msra.gmra.mxu0 %vm228_vm1, %v207_v5  ;;  %v186_v17 = vld [vmem:[%s897_s20 + $0x58] sm:$0xff] }
  0x12   : > { %v219_v13 = vpack.c.bf16 %v200_v12, %v199_v11  ;;  %760 = vmatmul.msk.bf16.vlgmr.msra.gmra.mxu1 %vm228_vm1, %v211_v9  ;;  %v193_v18 = vld [vmem:[%s897_s20 + $0x90] sm:$0xff]  ;;  %v194_v19 = vld [vmem:[%s897_s20 + $0x98] sm:$0xff]  ;;  %v212_v23 = vpack.c.bf16 %v186_v17, %v185_v16  ;;  %v179_v26 = vld [vmem:[%s897_s20 + $0x20] sm:$0xff] }
  0x13   : > { %764 = vmatmul.msk.bf16.vlgmr.msra.gmra.mxu2 %vm228_vm1, %v215_v10  ;;  %v201_v20 = vld [vmem:[%s897_s20 + $0xd0] sm:$0xff]  ;;  %v202_v21 = vld [vmem:[%s897_s20 + $0xd8] sm:$0xff]  ;;  %v216_v24 = vpack.c.bf16 %v194_v19, %v193_v18  ;;  %v180_v27 = vld [vmem:[%s897_s20 + $0x28] sm:$0xff] }
  0x14   : > { %768 = vmatmul.msk.bf16.vlgmr.msra.gmra.mxu3 %vm228_vm1, %v219_v13  ;;  %v220_v25 = vpack.c.bf16 %v202_v21, %v201_v20  ;;  %v187_v28 = vld [vmem:[%s897_s20 + $0x60] sm:$0xff]  ;;  %v188_v29 = vld [vmem:[%s897_s20 + $0x68] sm:$0xff]  ;;  %v209_v34 = vpack.c.bf16 %v180_v27, %v179_v26  ;;  %v181_v38 = vld [vmem:[%s897_s20 + $0x30] sm:$0xff] }
  0x15   : > { %v195_v30 = vld [vmem:[%s897_s20 + $0xa0] sm:$0xff]  ;;  %v196_v31 = vld [vmem:[%s897_s20 + $0xa8] sm:$0xff]  ;;  %v213_v35 = vpack.c.bf16 %v188_v29, %v187_v28  ;;  %v182_v39 = vld [vmem:[%s897_s20 + $0x38] sm:$0xff] }
  0x16   : > { %v203_v32 = vld [vmem:[%s897_s20 + $0xe0] sm:$0xff]  ;;  %v204_v33 = vld [vmem:[%s897_s20 + $0xe8] sm:$0xff]  ;;  %v217_v36 = vpack.c.bf16 %v196_v31, %v195_v30  ;;  %v189_v40 = vld [vmem:[%s897_s20 + $0x70] sm:$0xff]  ;;  %v210_v46 = vpack.c.bf16 %v182_v39, %v181_v38 }
  0x17   : > { %v221_v37 = vpack.c.bf16 %v204_v33, %v203_v32  ;;  %v190_v41 = vld [vmem:[%s897_s20 + $0x78] sm:$0xff]  ;;  %v197_v42 = vld [vmem:[%s897_s20 + $0xb0] sm:$0xff] }
  0x18   : > { %v198_v43 = vld [vmem:[%s897_s20 + $0xb8] sm:$0xff]  ;;  %v205_v44 = vld [vmem:[%s897_s20 + $0xf0] sm:$0xff]  ;;  %v214_v47 = vpack.c.bf16 %v190_v41, %v189_v40 }
  0x19   : > { %v206_v45 = vld [vmem:[%s897_s20 + $0xf8] sm:$0xff]  ;;  %v218_v48 = vpack.c.bf16 %v198_v43, %v197_v42 }
  0x1a   : > { %v222_v49 = vpack.c.bf16 %v206_v45, %v205_v44 }
  0x21   : > { %757 = vmatmul.msk.bf16.gmra.mxu0 %vm228_vm1, %v208_v22 }
  0x22   : > { %761 = vmatmul.msk.bf16.gmra.mxu1 %vm228_vm1, %v212_v23 }
  0x23   : > { %765 = vmatmul.msk.bf16.gmra.mxu2 %vm228_vm1, %v216_v24 }
  0x24   : > { %769 = vmatmul.msk.bf16.gmra.mxu3 %vm228_vm1, %v220_v25 }
  0x31   : > { %758 = vmatmul.msk.bf16.gmra.mxu0 %vm228_vm1, %v209_v34 }
  0x32   : > { %762 = vmatmul.msk.bf16.gmra.mxu1 %vm228_vm1, %v213_v35 }
  0x33   : > { %766 = vmatmul.msk.bf16.gmra.mxu2 %vm228_vm1, %v217_v36 }
  0x34   : > { %770 = vmatmul.msk.bf16.gmra.mxu3 %vm228_vm1, %v221_v37 }
  0x41   : > { %759 = vmatmul.msk.bf16.gmra.mxu0 %vm228_vm1, %v210_v46 }
  0x42   : > { %763 = vmatmul.msk.bf16.gmra.mxu1 %vm228_vm1, %v214_v47 }
  0x43   : > { %767 = vmatmul.msk.bf16.gmra.mxu2 %vm228_vm1, %v218_v48 }
  0x44   : > { %771 = vmatmul.msk.bf16.gmra.mxu3 %vm228_vm1, %v222_v49 }
  0x8e   : > { %v290_v51 = vpop.f32.mrf.mxu0 }
  0x8f   : > { %v953_v52 = vadd.f32 %v950_v50, %v290_v51  ;;  %v310_v53 = vpop.f32.mrf.mxu1 }
  0x90   : > { %v956_v54 = vadd.f32 %v950_v50, %v310_v53 }
  0x91   : > { %v370_v55 = vmul.f32 %v953_v52, %v953_v52 }
  0x92   : > { %v378_v56 = vmul.f32 %v956_v54, %v956_v54 }
  0x93   : > { %v402_v57 = vmul.f32 %v370_v55, %v953_v52 }
  0x94   : > { %v410_v58 = vmul.f32 %v378_v56, %v956_v54 }
  0x95   : > { %v434_v59 = vmul.f32 0.044715, %v402_v57 }
  0x96   : > { %v330_v60 = vpop.f32.mrf.mxu2  ;;  %v442_v61 = vmul.f32 0.044715, %v410_v58  ;;  %v292_v0 = vpop.f32.mrf.mxu0 }
  0x97   : > { %v965_v62 = vadd.f32 %v950_v50, %v330_v60  ;;  %v350_v63 = vpop.f32.mrf.mxu3  ;;  %v466_v1 = vadd.f32 %v434_v59, %v953_v52  ;;  %v972_v3 = vadd.f32 %v950_v50, %v292_v0  ;;  %v312_v4 = vpop.f32.mrf.mxu1 }
  0x98   : > { %v969_v2 = vadd.f32 %v950_v50, %v350_v63  ;;  %v474_v5 = vadd.f32 %v442_v61, %v956_v54  ;;  %v978_v7 = vadd.f32 %v950_v50, %v312_v4 }
  0x99   : > { %v386_v6 = vmul.f32 %v965_v62, %v965_v62  ;;  %v498_v8 = vmul.f32 0.7978846, %v466_v1  ;;  %v371_v10 = vmul.f32 %v972_v3, %v972_v3 }
  0x9a   : > { %v394_v9 = vmul.f32 %v969_v2, %v969_v2  ;;  %v506_v11 = vmul.f32 0.7978846, %v474_v5  ;;  %v379_v13 = vmul.f32 %v978_v7, %v978_v7 }
  0x9b   : > { %v418_v12 = vmul.f32 %v386_v6, %v965_v62  ;;  %786 = vtanh.f32 %v498_v8  ;;  %v403_v15 = vmul.f32 %v371_v10, %v972_v3 }
  0x9c   : > { %v426_v14 = vmul.f32 %v394_v9, %v969_v2  ;;  %788 = vtanh.f32 %v506_v11  ;;  %v411_v17 = vmul.f32 %v379_v13, %v978_v7 }
  0x9d   : > { %v450_v16 = vmul.f32 0.044715, %v418_v12  ;;  %v435_v19 = vmul.f32 0.044715, %v403_v15 }
  0x9e   : > { %v458_v18 = vmul.f32 0.044715, %v426_v14  ;;  %v332_v20 = vpop.f32.mrf.mxu2  ;;  %v443_v22 = vmul.f32 0.044715, %v411_v17  ;;  %v295_v25 = vpop.f32.mrf.mxu0 }
  0x9f   : > { %v482_v21 = vadd.f32 %v450_v16, %v965_v62  ;;  %v992_v23 = vadd.f32 %v950_v50, %v332_v20  ;;  %v352_v24 = vpop.f32.mrf.mxu3  ;;  %v467_v27 = vadd.f32 %v435_v19, %v972_v3  ;;  %v1000_v29 = vadd.f32 %v950_v50, %v295_v25  ;;  %v315_v30 = vpop.f32.mrf.mxu1 }
  0xa0   : > { %v490_v26 = vadd.f32 %v458_v18, %v969_v2  ;;  %v997_v28 = vadd.f32 %v950_v50, %v352_v24  ;;  %v475_v32 = vadd.f32 %v443_v22, %v978_v7  ;;  %v1006_v34 = vadd.f32 %v950_v50, %v315_v30 }
  0xa1   : > { %v514_v31 = vmul.f32 0.7978846, %v482_v21  ;;  %v387_v33 = vmul.f32 %v992_v23, %v992_v23  ;;  %v787_v35 = vpop.eup %786  ;;  %v499_v37 = vmul.f32 0.7978846, %v467_v27  ;;  %v372_v39 = vmul.f32 %v1000_v29, %v1000_v29 }
  0xa2   : > { %v522_v36 = vmul.f32 0.7978846, %v490_v26  ;;  %v395_v38 = vmul.f32 %v997_v28, %v997_v28  ;;  %v789_v40 = vpop.eup %788  ;;  %v562_v41 = vadd.f32 1.0, %v787_v35  ;;  %v507_v42 = vmul.f32 0.7978846, %v475_v32 }
  0xa3   : > { %790 = vtanh.f32 %v514_v31  ;;  %v419_v43 = vmul.f32 %v387_v33, %v992_v23  ;;  %v570_v44 = vadd.f32 1.0, %v789_v40  ;;  %v404_v46 = vmul.f32 %v372_v39, %v1000_v29 }
  0xa4   : > { %792 = vtanh.f32 %v522_v36  ;;  %v427_v45 = vmul.f32 %v395_v38, %v997_v28  ;;  %v594_v47 = vmul.f32 0.5, %v562_v41  ;;  %v380_v49 = vmul.f32 %v1006_v34, %v1006_v34 }
  0xa5   : > { %794 = vtanh.f32 %v499_v37  ;;  %v451_v48 = vmul.f32 0.044715, %v419_v43  ;;  %v602_v51 = vmul.f32 0.5, %v570_v44  ;;  %v436_v55 = vmul.f32 0.044715, %v404_v46 }
  0xa6   : > { %796 = vtanh.f32 %v507_v42  ;;  %v459_v53 = vmul.f32 0.044715, %v427_v45  ;;  %v335_v56 = vpop.f32.mrf.mxu2  ;;  %v626_v57 = vmul.f32 %v594_v47, %v953_v52  ;;  %v412_v59 = vmul.f32 %v380_v49, %v1006_v34  ;;  %v297_v63 = vpop.f32.mrf.mxu0 }
  0xa7   : > { %v483_v58 = vadd.f32 %v451_v48, %v992_v23  ;;  %v1028_v60 = vadd.f32 %v950_v50, %v335_v56  ;;  %v355_v61 = vpop.f32.mrf.mxu3  ;;  %v634_v0 = vmul.f32 %v602_v51, %v956_v54  ;;  %v468_v4 = vadd.f32 %v436_v55, %v1000_v29  ;;  %v317_v11 = vpop.f32.mrf.mxu1 }
  0xa8   : > { %v491_v1 = vadd.f32 %v459_v53, %v997_v28  ;;  %v1034_v5 = vadd.f32 %v950_v50, %v355_v61  ;;  %659 = vst.msk [vmem:[%s1022_s25] sm:$0xff] %vm658_vm2, %v626_v57  ;;  %v444_v8 = vmul.f32 0.044715, %v412_v59  ;;  %v1041_v10 = vadd.f32 %v950_v50, %v297_v63 }
  0xa9   : > { %v791_v52 = vpop.eup %790  ;;  %v515_v6 = vmul.f32 0.7978846, %v483_v58  ;;  %v388_v9 = vmul.f32 %v1028_v60, %v1028_v60  ;;  %667 = vst.msk [vmem:[%s1022_s25 + $0x40] sm:$0xff] %vm658_vm2, %v634_v0  ;;  %v500_v14 = vmul.f32 0.7978846, %v468_v4  ;;  %v1060_v42 = vadd.f32 %v950_v50, %v317_v11 }
  0xaa   : > { %v793_v54 = vpop.eup %792  ;;  %v578_v12 = vadd.f32 1.0, %v791_v52  ;;  %v523_v13 = vmul.f32 0.7978846, %v491_v1  ;;  %v396_v15 = vmul.f32 %v1034_v5, %v1034_v5  ;;  %v476_v18 = vadd.f32 %v444_v8, %v1006_v34 }
  0xab   : > { %v795_v16 = vpop.eup %794  ;;  %v586_v17 = vadd.f32 1.0, %v793_v54  ;;  %798 = vtanh.f32 %v515_v6  ;;  %v420_v19 = vmul.f32 %v388_v9, %v1028_v60  ;;  %v373_v38 = vmul.f32 %v1041_v10, %v1041_v10 }
  0xac   : > { %v797_v20 = vpop.eup %796  ;;  %v610_v21 = vmul.f32 0.5, %v578_v12  ;;  %v563_v22 = vadd.f32 1.0, %v795_v16  ;;  %800 = vtanh.f32 %v523_v13  ;;  %v428_v24 = vmul.f32 %v396_v15, %v1034_v5 }
  0xad   : > { %v618_v25 = vmul.f32 0.5, %v586_v17  ;;  %v571_v26 = vadd.f32 1.0, %v797_v20  ;;  %802 = vtanh.f32 %v500_v14  ;;  %v508_v27 = vmul.f32 0.7978846, %v476_v18 }
  0xae   : > { %v642_v30 = vmul.f32 %v610_v21, %v965_v62  ;;  %v595_v31 = vmul.f32 0.5, %v563_v22  ;;  %v452_v32 = vmul.f32 0.044715, %v420_v19  ;;  %v460_v33 = vmul.f32 0.044715, %v428_v24  ;;  %v337_v35 = vpop.f32.mrf.mxu2  ;;  %v300_v53 = vpop.f32.mrf.mxu0 }
  0xaf   : > { %v650_v36 = vmul.f32 %v618_v25, %v969_v2  ;;  %v603_v37 = vmul.f32 0.5, %v571_v26  ;;  %804 = vtanh.f32 %v508_v27  ;;  %v357_v39 = vpop.f32.mrf.mxu3  ;;  %v405_v44 = vmul.f32 %v373_v38, %v1041_v10  ;;  %v320_v59 = vpop.f32.mrf.mxu1 }
  0xb0   : > { %675 = vst.msk [vmem:[%s1022_s25 + $0x80] sm:$0xff] %vm658_vm2, %v642_v30  ;;  %v627_v40 = vmul.f32 %v595_v31, %v972_v3  ;;  %v484_v62 = vadd.f32 %v452_v32, %v1028_v60  ;;  %v492_v41 = vadd.f32 %v460_v33, %v1034_v5  ;;  %v1067_v45 = vadd.f32 %v950_v50, %v337_v35 }
  0xb1   : > { %v799_v2 = vpop.eup %798  ;;  %683 = vst.msk [vmem:[%s1022_s25 + $0xc0] sm:$0xff] %vm658_vm2, %v650_v36  ;;  %v635_v43 = vmul.f32 %v603_v37, %v978_v7  ;;  %v1070_v3 = vadd.f32 %v950_v50, %v357_v39  ;;  %v381_v51 = vmul.f32 %v1060_v42, %v1060_v42  ;;  %v437_v56 = vmul.f32 0.044715, %v405_v44 }
  0xb2   : > { %v801_v46 = vpop.eup %800  ;;  %660 = vst.msk [vmem:[%s1022_s25 + $0x8] sm:$0xff] %vm658_vm2, %v627_v40  ;;  %v579_v47 = vadd.f32 1.0, %v799_v2  ;;  %v516_v48 = vmul.f32 0.7978846, %v484_v62  ;;  %v524_v49 = vmul.f32 0.7978846, %v492_v41  ;;  %v389_v57 = vmul.f32 %v1067_v45, %v1067_v45 }
  0xb3   : > { %v803_v55 = vpop.eup %802  ;;  %668 = vst.msk [vmem:[%s1022_s25 + $0x48] sm:$0xff] %vm658_vm2, %v635_v43  ;;  %v587_v7 = vadd.f32 1.0, %v801_v46  ;;  %v397_v58 = vmul.f32 %v1070_v3, %v1070_v3  ;;  %v413_v0 = vmul.f32 %v381_v51, %v1060_v42  ;;  %v469_v52 = vadd.f32 %v437_v56, %v1041_v10 }
  0xb4   : > { %v611_v61 = vmul.f32 0.5, %v579_v47  ;;  %v564_v63 = vadd.f32 1.0, %v803_v55  ;;  %806 = vtanh.f32 %v516_v48  ;;  %v421_v6 = vmul.f32 %v389_v57, %v1067_v45 }
  0xb5   : > { %v805_v1 = vpop.eup %804  ;;  %v619_v4 = vmul.f32 0.5, %v587_v7  ;;  %808 = vtanh.f32 %v524_v49  ;;  %v445_v54 = vmul.f32 0.044715, %v413_v0  ;;  %v501_v14 = vmul.f32 0.7978846, %v469_v52 }
  0xb6   : > { %v643_v8 = vmul.f32 %v611_v61, %v992_v23  ;;  %v596_v9 = vmul.f32 0.5, %v564_v63  ;;  %v572_v11 = vadd.f32 1.0, %v805_v1  ;;  %v340_v12 = vpop.f32.mrf.mxu2  ;;  %v453_v15 = vmul.f32 0.044715, %v421_v6  ;;  %v302_v38 = vpop.f32.mrf.mxu0 }
  0xb7   : > { %v651_v13 = vmul.f32 %v619_v4, %v997_v28  ;;  %v429_v16 = vmul.f32 %v397_v58, %v1070_v3  ;;  %v477_v19 = vadd.f32 %v445_v54, %v1060_v42  ;;  %v1093_v23 = vadd.f32 %v950_v50, %v300_v53  ;;  %v360_v22 = vpop.f32.mrf.mxu3  ;;  %v322_v41 = vpop.f32.mrf.mxu1 }
  0xb8   : > { %676 = vst.msk [vmem:[%s1022_s25 + $0x88] sm:$0xff] %vm658_vm2, %v643_v8  ;;  %v628_v17 = vmul.f32 %v596_v9, %v1000_v29  ;;  %v604_v18 = vmul.f32 0.5, %v572_v11  ;;  %810 = vtanh.f32 %v501_v14  ;;  %v485_v28 = vadd.f32 %v453_v15, %v1067_v45 }
  0xb9   : > { %684 = vst.msk [vmem:[%s1022_s25 + $0xc8] sm:$0xff] %vm658_vm2, %v651_v13  ;;  %v461_v20 = vmul.f32 0.044715, %v429_v16  ;;  %v1099_v21 = vadd.f32 %v950_v50, %v320_v59  ;;  %v509_v25 = vmul.f32 0.7978846, %v477_v19  ;;  %v374_v26 = vmul.f32 %v1093_v23, %v1093_v23 }
  0xba   : > { %v807_v24 = vpop.eup %806  ;;  %661 = vst.msk [vmem:[%s1022_s25 + $0x10] sm:$0xff] %vm658_vm2, %v628_v17  ;;  %v636_v29 = vmul.f32 %v604_v18, %v1006_v34  ;;  %v1107_v27 = vadd.f32 %v950_v50, %v340_v12  ;;  %v517_v32 = vmul.f32 0.7978846, %v485_v28  ;;  %v1120_v46 = vadd.f32 %v950_v50, %v360_v22 }
  0xbb   : > { %v809_v30 = vpop.eup %808  ;;  %v580_v31 = vadd.f32 1.0, %v807_v24  ;;  %v493_v33 = vadd.f32 %v461_v20, %v1070_v3  ;;  %v382_v35 = vmul.f32 %v1099_v21, %v1099_v21  ;;  %812 = vtanh.f32 %v509_v25 }
  0xbc   : > { %669 = vst.msk [vmem:[%s1022_s25 + $0x50] sm:$0xff] %vm658_vm2, %v636_v29  ;;  %v588_v36 = vadd.f32 1.0, %v809_v30  ;;  %v406_v34 = vmul.f32 %v374_v26, %v1093_v23  ;;  %v390_v37 = vmul.f32 %v1107_v27, %v1107_v27  ;;  %814 = vtanh.f32 %v517_v32 }
  0xbd   : > { %v612_v39 = vmul.f32 0.5, %v580_v31  ;;  %v525_v40 = vmul.f32 0.7978846, %v493_v33  ;;  %v414_v62 = vmul.f32 %v382_v35, %v1099_v21  ;;  %v1124_v51 = vadd.f32 %v950_v50, %v302_v38 }
  0xbe   : > { %v620_v2 = vmul.f32 0.5, %v588_v36  ;;  %v438_v43 = vmul.f32 0.044715, %v406_v34  ;;  %v422_v44 = vmul.f32 %v390_v37, %v1107_v27  ;;  %v811_v47 = vpop.eup %810  ;;  %v342_v53 = vpop.f32.mrf.mxu2  ;;  %v398_v59 = vmul.f32 %v1120_v46, %v1120_v46 }
  0xbf   : > { %v644_v48 = vmul.f32 %v612_v39, %v1028_v60  ;;  %816 = vtanh.f32 %v525_v40  ;;  %v446_v49 = vmul.f32 0.044715, %v414_v62  ;;  %v565_v7 = vadd.f32 1.0, %v811_v47  ;;  %v362_v54 = vpop.f32.mrf.mxu3  ;;  %v305_v22 = vpop.f32.mrf.mxu0 }
  0xc0   : > { %v652_v55 = vmul.f32 %v620_v2, %v1034_v5  ;;  %v470_v56 = vadd.f32 %v438_v43, %v1093_v23  ;;  %v454_v57 = vmul.f32 0.044715, %v422_v44  ;;  %v375_v60 = vmul.f32 %v1124_v51, %v1124_v51  ;;  %v325_v26 = vpop.f32.mrf.mxu1 }
  0xc1   : > { %677 = vst.msk [vmem:[%s1022_s25 + $0x90] sm:$0xff] %vm658_vm2, %v644_v48  ;;  %v478_v58 = vadd.f32 %v446_v49, %v1099_v21  ;;  %v1136_v61 = vadd.f32 %v950_v50, %v322_v41  ;;  %v813_v63 = vpop.eup %812  ;;  %v597_v5 = vmul.f32 0.5, %v565_v7  ;;  %v1142_v4 = vadd.f32 %v950_v50, %v342_v53 }
  0xc2   : > { %685 = vst.msk [vmem:[%s1022_s25 + $0xd0] sm:$0xff] %vm658_vm2, %v652_v55  ;;  %v502_v0 = vmul.f32 0.7978846, %v470_v56  ;;  %v486_v1 = vadd.f32 %v454_v57, %v1107_v27  ;;  %v815_v52 = vpop.eup %814  ;;  %v573_v6 = vadd.f32 1.0, %v813_v63  ;;  %v430_v9 = vmul.f32 %v398_v59, %v1120_v46 }
  0xc3   : > { %v510_v8 = vmul.f32 0.7978846, %v478_v58  ;;  %v407_v11 = vmul.f32 %v375_v60, %v1124_v51  ;;  %v629_v12 = vmul.f32 %v597_v5, %v1041_v10  ;;  %v581_v13 = vadd.f32 1.0, %v815_v52 }
  0xc4   : > { %818 = vtanh.f32 %v502_v0  ;;  %v518_v14 = vmul.f32 0.7978846, %v486_v1  ;;  %v605_v16 = vmul.f32 0.5, %v573_v6  ;;  %v462_v17 = vmul.f32 0.044715, %v430_v9 }
  0xc5   : > { %v817_v15 = vpop.eup %816  ;;  %820 = vtanh.f32 %v510_v8  ;;  %v439_v18 = vmul.f32 0.044715, %v407_v11  ;;  %662 = vst.msk [vmem:[%s1022_s25 + $0x18] sm:$0xff] %vm658_vm2, %v629_v12  ;;  %v613_v19 = vmul.f32 0.5, %v581_v13  ;;  %v383_v20 = vmul.f32 %v1136_v61, %v1136_v61 }
  0xc6   : > { %v589_v28 = vadd.f32 1.0, %v817_v15  ;;  %822 = vtanh.f32 %v518_v14  ;;  %v637_v10 = vmul.f32 %v605_v16, %v1060_v42  ;;  %v494_v24 = vadd.f32 %v462_v17, %v1120_v46  ;;  %v345_v49 = vpop.f32.mrf.mxu2 }
  0xc7   : > { %v471_v29 = vadd.f32 %v439_v18, %v1124_v51  ;;  %v391_v25 = vmul.f32 %v1142_v4, %v1142_v4  ;;  %v645_v30 = vmul.f32 %v613_v19, %v1067_v45  ;;  %v415_v32 = vmul.f32 %v383_v20, %v1136_v61  ;;  %v365_v57 = vpop.f32.mrf.mxu3  ;;  %v307_v11 = vpop.f32.mrf.mxu0 }
  0xc8   : > { %v621_v31 = vmul.f32 0.5, %v589_v28  ;;  %v1159_v33 = vadd.f32 %v950_v50, %v362_v54  ;;  %670 = vst.msk [vmem:[%s1022_s25 + $0x58] sm:$0xff] %vm658_vm2, %v637_v10  ;;  %v526_v35 = vmul.f32 0.7978846, %v494_v24  ;;  %v1165_v34 = vadd.f32 %v950_v50, %v305_v22  ;;  %v327_v20 = vpop.f32.mrf.mxu1 }
  0xc9   : > { %v503_v42 = vmul.f32 0.7978846, %v471_v29  ;;  %v423_v36 = vmul.f32 %v391_v25, %v1142_v4  ;;  %678 = vst.msk [vmem:[%s1022_s25 + $0x98] sm:$0xff] %vm658_vm2, %v645_v30  ;;  %v447_v38 = vmul.f32 0.044715, %v415_v32  ;;  %v1173_v40 = vadd.f32 %v950_v50, %v325_v26 }
  0xca   : > { %v819_v37 = vpop.eup %818  ;;  %v653_v45 = vmul.f32 %v621_v31, %v1070_v3  ;;  %v399_v39 = vmul.f32 %v1159_v33, %v1159_v33  ;;  %824 = vtanh.f32 %v526_v35  ;;  %v376_v43 = vmul.f32 %v1165_v34, %v1165_v34 }
  0xcb   : > { %v821_v62 = vpop.eup %820  ;;  %v566_v41 = vadd.f32 1.0, %v819_v37  ;;  %v455_v2 = vmul.f32 0.044715, %v423_v36  ;;  %826 = vtanh.f32 %v503_v42  ;;  %v479_v3 = vadd.f32 %v447_v38, %v1136_v61 }
  0xcc   : > { %v823_v44 = vpop.eup %822  ;;  %686 = vst.msk [vmem:[%s1022_s25 + $0xd8] sm:$0xff] %vm658_vm2, %v653_v45  ;;  %v574_v47 = vadd.f32 1.0, %v821_v62  ;;  %v431_v48 = vmul.f32 %v399_v39, %v1159_v33  ;;  %v408_v56 = vmul.f32 %v376_v43, %v1165_v34  ;;  %v384_v63 = vmul.f32 %v1173_v40, %v1173_v40 }
  0xcd   : > { %v598_v53 = vmul.f32 0.5, %v566_v41  ;;  %v582_v55 = vadd.f32 1.0, %v823_v44  ;;  %v487_v7 = vadd.f32 %v455_v2, %v1142_v4  ;;  %v511_v59 = vmul.f32 0.7978846, %v479_v3 }
  0xce   : > { %v606_v58 = vmul.f32 0.5, %v574_v47  ;;  %v463_v60 = vmul.f32 0.044715, %v431_v48  ;;  %v440_v52 = vmul.f32 0.044715, %v408_v56  ;;  %v416_v9 = vmul.f32 %v384_v63, %v1173_v40  ;;  %v347_v36 = vpop.f32.mrf.mxu2 }
  0xcf   : > { %v630_v5 = vmul.f32 %v598_v53, %v1093_v23  ;;  %v614_v0 = vmul.f32 0.5, %v582_v55  ;;  %v519_v1 = vmul.f32 0.7978846, %v487_v7  ;;  %828 = vtanh.f32 %v511_v59  ;;  %v367_v41 = vpop.f32.mrf.mxu3 }
  0xd0   : > { %v638_v6 = vmul.f32 %v606_v58, %v1099_v21  ;;  %v495_v8 = vadd.f32 %v463_v60, %v1159_v33  ;;  %v825_v54 = vpop.eup %824  ;;  %v472_v23 = vadd.f32 %v440_v52, %v1165_v34  ;;  %v1194_v13 = vadd.f32 %v950_v50, %v345_v49 }
  0xd1   : > { %663 = vst.msk [vmem:[%s1022_s25 + $0x20] sm:$0xff] %vm658_vm2, %v630_v5  ;;  %v646_v12 = vmul.f32 %v614_v0, %v1107_v27  ;;  %830 = vtanh.f32 %v519_v1  ;;  %v827_v14 = vpop.eup %826  ;;  %v590_v21 = vadd.f32 1.0, %v825_v54  ;;  %v448_v16 = vmul.f32 0.044715, %v416_v9 }
  0xd2   : > { %671 = vst.msk [vmem:[%s1022_s25 + $0x60] sm:$0xff] %vm658_vm2, %v638_v6  ;;  %v527_v15 = vmul.f32 0.7978846, %v495_v8  ;;  %v1199_v17 = vadd.f32 %v950_v50, %v365_v57  ;;  %v567_v18 = vadd.f32 1.0, %v827_v14  ;;  %v504_v19 = vmul.f32 0.7978846, %v472_v23 }
  0xd3   : > { %679 = vst.msk [vmem:[%s1022_s25 + $0xa0] sm:$0xff] %vm658_vm2, %v646_v12  ;;  %v392_v27 = vmul.f32 %v1194_v13, %v1194_v13  ;;  %v1206_v28 = vadd.f32 %v950_v50, %v307_v11  ;;  %v622_v22 = vmul.f32 0.5, %v590_v21  ;;  %v480_v10 = vadd.f32 %v448_v16, %v1173_v40 }
  0xd4   : > { %832 = vtanh.f32 %v527_v15  ;;  %v400_v24 = vmul.f32 %v1199_v17, %v1199_v17  ;;  %v599_v29 = vmul.f32 0.5, %v567_v18  ;;  %v1217_v42 = vadd.f32 %v950_v50, %v327_v20 }
  0xd5   : > { %834 = vtanh.f32 %v504_v19  ;;  %v424_v25 = vmul.f32 %v392_v27, %v1194_v13  ;;  %v377_v26 = vmul.f32 %v1206_v28, %v1206_v28  ;;  %v829_v30 = vpop.eup %828  ;;  %v654_v31 = vmul.f32 %v622_v22, %v1120_v46 }
  0xd6   : > { %v512_v32 = vmul.f32 0.7978846, %v480_v10  ;;  %v432_v35 = vmul.f32 %v400_v24, %v1199_v17  ;;  %v631_v45 = vmul.f32 %v599_v29, %v1124_v51  ;;  %v575_v38 = vadd.f32 1.0, %v829_v30 }
  0xd7   : > { %v831_v37 = vpop.eup %830  ;;  %v456_v39 = vmul.f32 0.044715, %v424_v25  ;;  %v409_v62 = vmul.f32 %v377_v26, %v1206_v28  ;;  %687 = vst.msk [vmem:[%s1022_s25 + $0xe0] sm:$0xff] %vm658_vm2, %v654_v31  ;;  %v385_v43 = vmul.f32 %v1217_v42, %v1217_v42  ;;  %v1229_v51 = vadd.f32 %v950_v50, %v347_v36 }
  0xd8   : > { %v583_v2 = vadd.f32 1.0, %v831_v37  ;;  %836 = vtanh.f32 %v512_v32  ;;  %v464_v46 = vmul.f32 0.044715, %v432_v35  ;;  %664 = vst.msk [vmem:[%s1022_s25 + $0x28] sm:$0xff] %vm658_vm2, %v631_v45  ;;  %v607_v44 = vmul.f32 0.5, %v575_v38 }
  0xd9   : > { %v488_v47 = vadd.f32 %v456_v39, %v1194_v13  ;;  %v441_v3 = vmul.f32 0.044715, %v409_v62  ;;  %v417_v55 = vmul.f32 %v385_v43, %v1217_v42  ;;  %v1234_v7 = vadd.f32 %v950_v50, %v367_v41 }
  0xda   : > { %v833_v48 = vpop.eup %832  ;;  %v615_v49 = vmul.f32 0.5, %v583_v2  ;;  %v496_v53 = vadd.f32 %v464_v46, %v1199_v17  ;;  %v639_v57 = vmul.f32 %v607_v44, %v1136_v61  ;;  %v393_v6 = vmul.f32 %v1229_v51, %v1229_v51 }
  0xdb   : > { %v835_v56 = vpop.eup %834  ;;  %v591_v58 = vadd.f32 1.0, %v833_v48  ;;  %v520_v59 = vmul.f32 0.7978846, %v488_v47  ;;  %v473_v60 = vadd.f32 %v441_v3, %v1206_v28  ;;  %v449_v1 = vmul.f32 0.044715, %v417_v55 }
  0xdc   : > { %v647_v63 = vmul.f32 %v615_v49, %v1142_v4  ;;  %v568_v5 = vadd.f32 1.0, %v835_v56  ;;  %v528_v0 = vmul.f32 0.7978846, %v496_v53  ;;  %672 = vst.msk [vmem:[%s1022_s25 + $0x68] sm:$0xff] %vm658_vm2, %v639_v57  ;;  %v401_v9 = vmul.f32 %v1234_v7, %v1234_v7 }
  0xdd   : > { %v623_v52 = vmul.f32 0.5, %v591_v58  ;;  %838 = vtanh.f32 %v520_v59  ;;  %v505_v50 = vmul.f32 0.7978846, %v473_v60  ;;  %v481_v4 = vadd.f32 %v449_v1, %v1217_v42 }
  0xde   : > { %v837_v8 = vpop.eup %836  ;;  %680 = vst.msk [vmem:[%s1022_s25 + $0xa8] sm:$0xff] %vm658_vm2, %v647_v63  ;;  %v600_v61 = vmul.f32 0.5, %v568_v5  ;;  %840 = vtanh.f32 %v528_v0  ;;  %v425_v12 = vmul.f32 %v393_v6, %v1229_v51  ;;  %v433_v21 = vmul.f32 %v401_v9, %v1234_v7 }
  0xdf   : > { %v655_v11 = vmul.f32 %v623_v52, %v1159_v33  ;;  %v576_v54 = vadd.f32 1.0, %v837_v8  ;;  %842 = vtanh.f32 %v505_v50  ;;  %v513_v14 = vmul.f32 0.7978846, %v481_v4 }
  0xe0   : > { %v632_v23 = vmul.f32 %v600_v61, %v1165_v34  ;;  %v457_v16 = vmul.f32 0.044715, %v425_v12  ;;  %v465_v18 = vmul.f32 0.044715, %v433_v21 }
  0xe1   : > { %688 = vst.msk [vmem:[%s1022_s25 + $0xe8] sm:$0xff] %vm658_vm2, %v655_v11  ;;  %v608_v15 = vmul.f32 0.5, %v576_v54  ;;  %844 = vtanh.f32 %v513_v14 }
  0xe2   : > { %665 = vst.msk [vmem:[%s1022_s25 + $0x30] sm:$0xff] %vm658_vm2, %v632_v23  ;;  %v489_v27 = vadd.f32 %v457_v16, %v1229_v51  ;;  %v497_v34 = vadd.f32 %v465_v18, %v1234_v7 }
  0xe3   : > { %v839_v19 = vpop.eup %838  ;;  %v640_v33 = vmul.f32 %v608_v15, %v1173_v40 }
  0xe4   : > { %v841_v20 = vpop.eup %840  ;;  %v584_v22 = vadd.f32 1.0, %v839_v19  ;;  %v521_v29 = vmul.f32 0.7978846, %v489_v27  ;;  %v529_v30 = vmul.f32 0.7978846, %v497_v34 }
  0xe5   : > { %v843_v10 = vpop.eup %842  ;;  %673 = vst.msk [vmem:[%s1022_s25 + $0x70] sm:$0xff] %vm658_vm2, %v640_v33  ;;  %v592_v24 = vadd.f32 1.0, %v841_v20 }
  0xe6   : > { %v616_v25 = vmul.f32 0.5, %v584_v22  ;;  %v569_v26 = vadd.f32 1.0, %v843_v10  ;;  %846 = vtanh.f32 %v521_v29 }
  0xe7   : > { %v624_v31 = vmul.f32 0.5, %v592_v24  ;;  %v845_v40 = vpop.eup %844  ;;  %848 = vtanh.f32 %v529_v30 }
  0xe8   : > { %v648_v32 = vmul.f32 %v616_v25, %v1194_v13  ;;  %v601_v35 = vmul.f32 0.5, %v569_v26  ;;  %v577_v37 = vadd.f32 1.0, %v845_v40 }
  0xe9   : > { %v656_v36 = vmul.f32 %v624_v31, %v1199_v17 }
  0xea   : > { %681 = vst.msk [vmem:[%s1022_s25 + $0xb0] sm:$0xff] %vm658_vm2, %v648_v32  ;;  %v633_v45 = vmul.f32 %v601_v35, %v1206_v28  ;;  %v609_v38 = vmul.f32 0.5, %v577_v37 }
  0xeb   : > { %689 = vst.msk [vmem:[%s1022_s25 + $0xf0] sm:$0xff] %vm658_vm2, %v656_v36 }
  0xec   : > { %666 = vst.msk [vmem:[%s1022_s25 + $0x38] sm:$0xff] %vm658_vm2, %v633_v45  ;;  %v847_v39 = vpop.eup %846  ;;  %v641_v62 = vmul.f32 %v609_v38, %v1217_v42 }
  0xed   : > { %v849_v13 = vpop.eup %848  ;;  %v585_v41 = vadd.f32 1.0, %v847_v39 }
  0xee   : > { %674 = vst.msk [vmem:[%s1022_s25 + $0x78] sm:$0xff] %vm658_vm2, %v641_v62  ;;  %v593_v17 = vadd.f32 1.0, %v849_v13 }
  0xef   : > { %v617_v2 = vmul.f32 0.5, %v585_v41 }
  0xf0   : > { %v625_v46 = vmul.f32 0.5, %v593_v17 }
  0xf1   : > { %v649_v43 = vmul.f32 %v617_v2, %v1229_v51 }
  0xf2   : > { %v657_v44 = vmul.f32 %v625_v46, %v1234_v7 }
  0xf3   : > { %682 = vst.msk [vmem:[%s1022_s25 + $0xb8] sm:$0xff] %vm658_vm2, %v649_v43 }
  0xf4   : > { %690 = vst.msk [vmem:[%s1022_s25 + $0xf8] sm:$0xff] %vm658_vm2, %v657_v44 }
  0xf5 PF: > { %s13_s12 = sadd.s32 1, %s856_s12  }
  0xf6   : > { %p10_p4 = scmp.ge.s32.totalorder %s13_s12, 4  }
  0xf8   :  { %12 = sbr.rel (!%p10_p4) target bundleno = 1 (0x1), region = 62 }

// kernel: spec_vit_forward.10
= control target key start
LH: loop header
LB: loop body
LE: loop exit
PB: predicated region body
PF: predicated region fallthrough
CT: control target
= control target key end

     0   :  { %s3569_s0 = inlined_call_operand.vmem [shape: f32[48,256], index: 0, kind: input, shape index: {}, may-alias: {0,7}]   ;;  %s3570_s1 = inlined_call_operand.vmem [shape: f32[1,256], index: 1, kind: input, shape index: {}]   ;;  %s3571_s2 = inlined_call_operand.vmem [shape: f32[1,256], index: 2, kind: input, shape index: {}]   ;;  %s3572_s3 = inlined_call_operand.vmem [shape: bf16[256,1024], index: 3, kind: input, shape index: {}]   ;;  %s3573_s4 = inlined_call_operand.vmem [shape: f32[1,1024], index: 4, kind: input, shape index: {}]   ;;  %s3574_s5 = inlined_call_operand.vmem [shape: bf16[1024,256], index: 5, kind: input, shape index: {}]   ;;  %s3575_s6 = inlined_call_operand.vmem [shape: f32[1,256], index: 6, kind: input, shape index: {}]   ;;  %s3576_s7 = inlined_call_operand.vmem [shape: f32[48,256], index: 7, kind: output, shape index: {}, may-alias: {0,7}]  }
   0x1   :  { %3578 = sst [smem:[#allocation7_spill]] %s3572_s3 }
   0x2   :  { %s2870_s24 = smov 0   ;;  %s2872_s25 = smov 0  }
   0x3   :  { %s2874_s26 = smov 0   ;;  %s2876_s27 = smov 0  }
   0x4   :  { %s2878_s28 = smov 0   ;;  %s2880_s29 = smov 0  }
   0x5   :  { %s2882_s30 = smov 0  }
   0x6 LB: > { %s26_s8 = sadd.s32 1, %s2818_s28  ;;  %s29_s9 = sadd.s32 1, %s2822_s29  ;;  %s2826_s30 = sphi %s2882_s30, %s17_s30   ;;  %s2822_s29 = sphi %s2880_s29, %s3589_s29   ;;  %s2818_s28 = sphi %s2878_s28, %s3588_s28   ;;  %s2814_s27 = sphi %s2876_s27, %s3587_s27   ;;  %s2810_s26 = sphi %s2874_s26, %s3586_s26   ;;  %s2806_s25 = sphi %s2872_s25, %s3585_s25   ;;  %s2802_s24 = sphi %s2870_s24, %s3584_s24  }
   0x7   : > { %p27_p0 = scmp.ge.s32.totalorder %s26_s8, 2  ;;  %s104_s10 = sadd.s32 1, %s2806_s25 }
   0x8   : > { %p111_p1 = scmp.ne.s32.totalorder %s2806_s25, %s2802_s24  ;;  %p112_p2 = scmp.eq.s32.totalorder %s2826_s30, 0 }
   0x9   : > { %s3591_s8 = smov (%p27_p0, %s26_s8), 0  ;;  %s3593_s9 = smov (!%p27_p0, %s29_s9), %s2822_s29 }
   0xa   : > { %3579 = sst [smem:[#allocation5_spill]] %s3591_s8  ;;  %s101_s11 = ssub.s32 %s2818_s28, %s3591_s8 }
   0xb   : > { %p113_p3 = por %p112_p2, %p111_p1  ;;  %p31_p4 = scmp.ge.s32.totalorder %s3593_s9, 2 }
   0xc   : > { %p102_p5 = scmp.eq.s32.totalorder %s101_s11, 0  ;;  %p2010_p6 = scmp.ge.s32.totalorder %s2826_s30, 4 }
   0xd   : > { %s3595_s9 = smov (%p31_p4, %s3593_s9), 0 }
   0xe   : > { %3580 = sst [smem:[#allocation6_spill]] %s3595_s9  ;;  %245 = sbr.rel (%p2010_p6) target bundleno = 93 (0x5d), region = 28 }
   0xf   : > { %s2919_s12 = scalar_select %p102_p5, %s2806_s25, %s104_s10  }
  0x13   : > { %258 = sbr.rel (!%p113_p3) target bundleno = 93 (0x5d), region = 36  ;;  %s260_s13 = sand.u32 (%p113_p3), 1, %s2806_s25  }
  0x14   : > { %s2548_s14 = sshll.u32 (%p113_p3), %s2818_s28, 4  ;;  %s2011_s15 = sshll.u32 (%p113_p3), %s260_s13, 9 }
  0x15   : > { %s3581_s3 = sld [smem:[#allocation7_spill]] (%p113_p3)  ;;  %s2932_s19 = scalar_lea.vmem (%p113_p3), [#allocation4], %s2011_s15 }
  0x1b   : > { %s2927_s18 = scalar_lea.vmem %s3581_s3, %s2548_s14 }
  0x1c   : > { %v278_v0 = vld [vmem:[%s2927_s18] sm:$0xff]  ;;  %v280_v1 = vld [vmem:[%s2927_s18 + $0x8] sm:$0xff] }
  0x1d   : > { %v282_v2 = vld [vmem:[%s2927_s18 + $0x20] sm:$0xff]  ;;  %279 = vst [vmem:[%s2932_s19] sm:$0xff] %v278_v0  ;;  %v284_v3 = vld [vmem:[%s2927_s18 + $0x28] sm:$0xff] }
  0x1e   : > { %281 = vst [vmem:[%s2932_s19 + $0x8] sm:$0xff] %v280_v1  ;;  %v286_v4 = vld [vmem:[%s2927_s18 + $0x40] sm:$0xff]  ;;  %v288_v5 = vld [vmem:[%s2927_s18 + $0x48] sm:$0xff] }
  0x1f   : > { %283 = vst [vmem:[%s2932_s19 + $0x10] sm:$0xff] %v282_v2  ;;  %v290_v6 = vld [vmem:[%s2927_s18 + $0x60] sm:$0xff]  ;;  %v292_v7 = vld [vmem:[%s2927_s18 + $0x68] sm:$0xff] }
  0x20   : > { %285 = vst [vmem:[%s2932_s19 + $0x18] sm:$0xff] %v284_v3  ;;  %v294_v8 = vld [vmem:[%s2927_s18 + $0x80] sm:$0xff]  ;;  %v296_v9 = vld [vmem:[%s2927_s18 + $0x88] sm:$0xff] }
  0x21   : > { %287 = vst [vmem:[%s2932_s19 + $0x20] sm:$0xff] %v286_v4  ;;  %v298_v10 = vld [vmem:[%s2927_s18 + $0xa0] sm:$0xff]  ;;  %v300_v11 = vld [vmem:[%s2927_s18 + $0xa8] sm:$0xff] }
  0x22   : > { %289 = vst [vmem:[%s2932_s19 + $0x28] sm:$0xff] %v288_v5  ;;  %v302_v12 = vld [vmem:[%s2927_s18 + $0xc0] sm:$0xff]  ;;  %v304_v13 = vld [vmem:[%s2927_s18 + $0xc8] sm:$0xff] }
  0x23   : > { %291 = vst [vmem:[%s2932_s19 + $0x30] sm:$0xff] %v290_v6  ;;  %v306_v14 = vld [vmem:[%s2927_s18 + $0xe0] sm:$0xff]  ;;  %v308_v15 = vld [vmem:[%s2927_s18 + $0xe8] sm:$0xff] }
  0x24   : > { %293 = vst [vmem:[%s2932_s19 + $0x38] sm:$0xff] %v292_v7  ;;  %v310_v16 = vld [vmem:[%s2927_s18 + $0x100] sm:$0xff]  ;;  %v312_v17 = vld [vmem:[%s2927_s18 + $0x108] sm:$0xff] }
  0x25   : > { %295 = vst [vmem:[%s2932_s19 + $0x40] sm:$0xff] %v294_v8  ;;  %v314_v18 = vld [vmem:[%s2927_s18 + $0x120] sm:$0xff]  ;;  %v316_v19 = vld [vmem:[%s2927_s18 + $0x128] sm:$0xff] }
  0x26   : > { %297 = vst [vmem:[%s2932_s19 + $0x48] sm:$0xff] %v296_v9  ;;  %v318_v20 = vld [vmem:[%s2927_s18 + $0x140] sm:$0xff]  ;;  %v320_v21 = vld [vmem:[%s2927_s18 + $0x148] sm:$0xff] }
  0x27   : > { %299 = vst [vmem:[%s2932_s19 + $0x50] sm:$0xff] %v298_v10  ;;  %v322_v22 = vld [vmem:[%s2927_s18 + $0x160] sm:$0xff]  ;;  %v324_v23 = vld [vmem:[%s2927_s18 + $0x168] sm:$0xff] }
  0x28   : > { %301 = vst [vmem:[%s2932_s19 + $0x58] sm:$0xff] %v300_v11  ;;  %v326_v24 = vld [vmem:[%s2927_s18 + $0x180] sm:$0xff]  ;;  %v328_v25 = vld [vmem:[%s2927_s18 + $0x188] sm:$0xff] }
  0x29   : > { %303 = vst [vmem:[%s2932_s19 + $0x60] sm:$0xff] %v302_v12  ;;  %v330_v26 = vld [vmem:[%s2927_s18 + $0x1a0] sm:$0xff]  ;;  %v332_v27 = vld [vmem:[%s2927_s18 + $0x1a8] sm:$0xff] }
  0x2a   : > { %305 = vst [vmem:[%s2932_s19 + $0x68] sm:$0xff] %v304_v13  ;;  %v334_v28 = vld [vmem:[%s2927_s18 + $0x1c0] sm:$0xff]  ;;  %v336_v29 = vld [vmem:[%s2927_s18 + $0x1c8] sm:$0xff] }
  0x2b   : > { %307 = vst [vmem:[%s2932_s19 + $0x70] sm:$0xff] %v306_v14  ;;  %v338_v30 = vld [vmem:[%s2927_s18 + $0x1e0] sm:$0xff]  ;;  %v340_v31 = vld [vmem:[%s2927_s18 + $0x1e8] sm:$0xff] }
  0x2c   : > { %309 = vst [vmem:[%s2932_s19 + $0x78] sm:$0xff] %v308_v15  ;;  %v342_v32 = vld [vmem:[%s2927_s18 + $0x200] sm:$0xff]  ;;  %v344_v33 = vld [vmem:[%s2927_s18 + $0x208] sm:$0xff] }
  0x2d   : > { %311 = vst [vmem:[%s2932_s19 + $0x80] sm:$0xff] %v310_v16  ;;  %v346_v34 = vld [vmem:[%s2927_s18 + $0x220] sm:$0xff]  ;;  %v348_v35 = vld [vmem:[%s2927_s18 + $0x228] sm:$0xff] }
  0x2e   : > { %313 = vst [vmem:[%s2932_s19 + $0x88] sm:$0xff] %v312_v17  ;;  %v350_v36 = vld [vmem:[%s2927_s18 + $0x240] sm:$0xff]  ;;  %v352_v37 = vld [vmem:[%s2927_s18 + $0x248] sm:$0xff] }
  0x2f   : > { %315 = vst [vmem:[%s2932_s19 + $0x90] sm:$0xff] %v314_v18  ;;  %v354_v38 = vld [vmem:[%s2927_s18 + $0x260] sm:$0xff]  ;;  %v356_v39 = vld [vmem:[%s2927_s18 + $0x268] sm:$0xff] }
  0x30   : > { %317 = vst [vmem:[%s2932_s19 + $0x98] sm:$0xff] %v316_v19  ;;  %v358_v40 = vld [vmem:[%s2927_s18 + $0x280] sm:$0xff]  ;;  %v360_v41 = vld [vmem:[%s2927_s18 + $0x288] sm:$0xff] }
  0x31   : > { %319 = vst [vmem:[%s2932_s19 + $0xa0] sm:$0xff] %v318_v20  ;;  %v362_v42 = vld [vmem:[%s2927_s18 + $0x2a0] sm:$0xff]  ;;  %v364_v43 = vld [vmem:[%s2927_s18 + $0x2a8] sm:$0xff] }
  0x32   : > { %321 = vst [vmem:[%s2932_s19 + $0xa8] sm:$0xff] %v320_v21  ;;  %v366_v44 = vld [vmem:[%s2927_s18 + $0x2c0] sm:$0xff]  ;;  %v368_v45 = vld [vmem:[%s2927_s18 + $0x2c8] sm:$0xff] }
  0x33   : > { %323 = vst [vmem:[%s2932_s19 + $0xb0] sm:$0xff] %v322_v22  ;;  %v370_v46 = vld [vmem:[%s2927_s18 + $0x2e0] sm:$0xff]  ;;  %v372_v47 = vld [vmem:[%s2927_s18 + $0x2e8] sm:$0xff] }
  0x34   : > { %325 = vst [vmem:[%s2932_s19 + $0xb8] sm:$0xff] %v324_v23  ;;  %v374_v48 = vld [vmem:[%s2927_s18 + $0x300] sm:$0xff]  ;;  %v376_v49 = vld [vmem:[%s2927_s18 + $0x308] sm:$0xff] }
  0x35   : > { %327 = vst [vmem:[%s2932_s19 + $0xc0] sm:$0xff] %v326_v24  ;;  %v378_v50 = vld [vmem:[%s2927_s18 + $0x320] sm:$0xff]  ;;  %v380_v51 = vld [vmem:[%s2927_s18 + $0x328] sm:$0xff] }
  0x36   : > { %329 = vst [vmem:[%s2932_s19 + $0xc8] sm:$0xff] %v328_v25  ;;  %v382_v52 = vld [vmem:[%s2927_s18 + $0x340] sm:$0xff]  ;;  %v384_v53 = vld [vmem:[%s2927_s18 + $0x348] sm:$0xff] }
  0x37   : > { %331 = vst [vmem:[%s2932_s19 + $0xd0] sm:$0xff] %v330_v26  ;;  %v386_v54 = vld [vmem:[%s2927_s18 + $0x360] sm:$0xff]  ;;  %v388_v55 = vld [vmem:[%s2927_s18 + $0x368] sm:$0xff] }
  0x38   : > { %333 = vst [vmem:[%s2932_s19 + $0xd8] sm:$0xff] %v332_v27  ;;  %v390_v56 = vld [vmem:[%s2927_s18 + $0x380] sm:$0xff]  ;;  %v392_v57 = vld [vmem:[%s2927_s18 + $0x388] sm:$0xff] }
  0x39   : > { %335 = vst [vmem:[%s2932_s19 + $0xe0] sm:$0xff] %v334_v28  ;;  %v394_v58 = vld [vmem:[%s2927_s18 + $0x3a0] sm:$0xff]  ;;  %v396_v59 = vld [vmem:[%s2927_s18 + $0x3a8] sm:$0xff] }
  0x3a   : > { %337 = vst [vmem:[%s2932_s19 + $0xe8] sm:$0xff] %v336_v29  ;;  %v398_v60 = vld [vmem:[%s2927_s18 + $0x3c0] sm:$0xff]  ;;  %v400_v61 = vld [vmem:[%s2927_s18 + $0x3c8] sm:$0xff] }
  0x3b   : > { %339 = vst [vmem:[%s2932_s19 + $0xf0] sm:$0xff] %v338_v30  ;;  %v402_v62 = vld [vmem:[%s2927_s18 + $0x3e0] sm:$0xff]  ;;  %v404_v63 = vld [vmem:[%s2927_s18 + $0x3e8] sm:$0xff] }
  0x3c   : > { %341 = vst [vmem:[%s2932_s19 + $0xf8] sm:$0xff] %v340_v31 }
  0x3d   : > { %343 = vst [vmem:[%s2932_s19 + $0x100] sm:$0xff] %v342_v32 }
  0x3e   : > { %345 = vst [vmem:[%s2932_s19 + $0x108] sm:$0xff] %v344_v33 }
  0x3f   : > { %347 = vst [vmem:[%s2932_s19 + $0x110] sm:$0xff] %v346_v34 }
  0x40   : > { %349 = vst [vmem:[%s2932_s19 + $0x118] sm:$0xff] %v348_v35 }
  0x41   : > { %351 = vst [vmem:[%s2932_s19 + $0x120] sm:$0xff] %v350_v36 }
  0x42   : > { %353 = vst [vmem:[%s2932_s19 + $0x128] sm:$0xff] %v352_v37 }
  0x43   : > { %355 = vst [vmem:[%s2932_s19 + $0x130] sm:$0xff] %v354_v38 }
  0x44   : > { %357 = vst [vmem:[%s2932_s19 + $0x138] sm:$0xff] %v356_v39 }
  0x45   : > { %359 = vst [vmem:[%s2932_s19 + $0x140] sm:$0xff] %v358_v40 }
  0x46   : > { %361 = vst [vmem:[%s2932_s19 + $0x148] sm:$0xff] %v360_v41 }
  0x47   : > { %363 = vst [vmem:[%s2932_s19 + $0x150] sm:$0xff] %v362_v42 }
  0x48   : > { %365 = vst [vmem:[%s2932_s19 + $0x158] sm:$0xff] %v364_v43 }
  0x49   : > { %367 = vst [vmem:[%s2932_s19 + $0x160] sm:$0xff] %v366_v44 }
  0x4a   : > { %369 = vst [vmem:[%s2932_s19 + $0x168] sm:$0xff] %v368_v45 }
  0x4b   : > { %371 = vst [vmem:[%s2932_s19 + $0x170] sm:$0xff] %v370_v46 }
  0x4c   : > { %373 = vst [vmem:[%s2932_s19 + $0x178] sm:$0xff] %v372_v47 }
  0x4d   : > { %375 = vst [vmem:[%s2932_s19 + $0x180] sm:$0xff] %v374_v48 }
  0x4e   : > { %377 = vst [vmem:[%s2932_s19 + $0x188] sm:$0xff] %v376_v49 }
  0x4f   : > { %379 = vst [vmem:[%s2932_s19 + $0x190] sm:$0xff] %v378_v50 }
  0x50   : > { %381 = vst [vmem:[%s2932_s19 + $0x198] sm:$0xff] %v380_v51 }
  0x51   : > { %383 = vst [vmem:[%s2932_s19 + $0x1a0] sm:$0xff] %v382_v52 }
  0x52   : > { %385 = vst [vmem:[%s2932_s19 + $0x1a8] sm:$0xff] %v384_v53 }
  0x53   : > { %387 = vst [vmem:[%s2932_s19 + $0x1b0] sm:$0xff] %v386_v54 }
  0x54   : > { %389 = vst [vmem:[%s2932_s19 + $0x1b8] sm:$0xff] %v388_v55 }
  0x55   : > { %391 = vst [vmem:[%s2932_s19 + $0x1c0] sm:$0xff] %v390_v56 }
  0x56   : > { %393 = vst [vmem:[%s2932_s19 + $0x1c8] sm:$0xff] %v392_v57 }
  0x57   : > { %395 = vst [vmem:[%s2932_s19 + $0x1d0] sm:$0xff] %v394_v58 }
  0x58   : > { %397 = vst [vmem:[%s2932_s19 + $0x1d8] sm:$0xff] %v396_v59 }
  0x59   : > { %399 = vst [vmem:[%s2932_s19 + $0x1e0] sm:$0xff] %v398_v60 }
  0x5a   : > { %401 = vst [vmem:[%s2932_s19 + $0x1e8] sm:$0xff] %v400_v61 }
  0x5b   : > { %403 = vst [vmem:[%s2932_s19 + $0x1f0] sm:$0xff] %v402_v62 }
  0x5c   : > { %405 = vst [vmem:[%s2932_s19 + $0x1f8] sm:$0xff] %v404_v63 }
  0x5d PF: > { %p2014_p7 = scmp.ge.s32.totalorder %s2826_s30, 1  ;;  %p428_p8 = scmp.lt.s32.totalorder %s2826_s30, 5 }
  0x5f   : > { %p429_p9 = pnand %p2014_p7, %p428_p8 }
  0x60   : > { %s435_s20 = sand.u32 (!%p429_p9), 1, %s2802_s24   ;;  %s483_s21 = smul.u32 (!%p429_p9), 3, %s2814_s27 }
  0x61   : > { %432 = sbr.rel (%p429_p9) target bundleno = 840 (0x348), region = 67  ;;  %s2015_s22 = sshll.u32 (!%p429_p9), %s435_s20, 9 }
  0x62   : > { %s2018_s23 = sshll.u32 (!%p429_p9), %s2810_s26, 2  ;;  %p484_p10 = scmp.lt.s32.totalorder (!%p429_p9), %s483_s21, 5 }
  0x63   : > { %p492_p11 = scmp.lt.s32.totalorder (!%p429_p9), %s2018_s23, 7  ;;  %s2019_s10 = sshll.u32 (!%p429_p9), %s2810_s26, 6 }
  0x64   : > { %p497_p12 = scmp.lt.s32.totalorder (!%p429_p9), %s2019_s10, 127  ;;  %s3086_s8 = scalar_lea.vmem (!%p429_p9), [#allocation4], %s2015_s22 }
  0x65   : > { %p2024_p13 = scmp.ne.s32.totalorder (!%p429_p9), %s2810_s26, 0 }
  0x66   : > { %s3597_s21 = smov (!%p484_p10, %s483_s21), 5  ;;  %s3599_s23 = smov (!%p492_p11, %s2018_s23), 7 }
  0x67   : > { %s2549_s11 = sshll.u32 %s3597_s21, 4  ;;  %s494_s24 = scalar_lea.vmem %s3573_s4, %s3599_s23 }
  0x68   : > { %s3070_s15 = scalar_lea.vmem %s3569_s0, %s2549_s11  ;;  %s3601_s10 = smov (!%p497_p12, %s2019_s10), 127 }
  0x69   : > { %s3079_s19 = scalar_lea.vmem %s3576_s7, %s2549_s11  ;;  %s2550_s20 = sshll.u32 %s3601_s10, 3 }
  0x6a   : > { %s3084_s21 = scalar_lea.vmem %s3574_s5, %s2550_s20  ;;  %513 = sbr.rel (%p2024_p13) target bundleno = 401 (0x191), region = 75 }
  0x6f   : > { %v514_v0 = vld [vmem:[%s3070_s15] sm:$0xff]  ;;  %v515_v1 = vld [vmem:[%s3070_s15 + $0x8] sm:$0xff]  ;;  %v516_v6 = vld [vmem:[%s3070_s15 + $0x10] sm:$0xff]  ;;  %v2828_v9 = vmov 256.0   ;;  %v2829_v46 = vmov 0.0  }
  0x70   : > { %v522_v2 = vadd.f32 %v515_v1, %v514_v0  ;;  %v518_v3 = vld [vmem:[%s3070_s15 + $0x20] sm:$0xff]  ;;  %v519_v4 = vld [vmem:[%s3070_s15 + $0x28] sm:$0xff]  ;;  %v517_v7 = vld [vmem:[%s3070_s15 + $0x18] sm:$0xff]  ;;  %2740 = vrcp.f32 %v2828_v9  ;;  %632 = vst [vmem:[#allocation3 + $0x28] sm:$0xff] %v2829_v46 }
  0x71   : > { %v528_v5 = vadd.f32 %v519_v4, %v518_v3  ;;  %v525_v8 = vadd.f32 %v517_v7, %v516_v6  ;;  %633 = vst [vmem:[#allocation3 + $0x10] sm:$0xff] %v2829_v46  ;;  %v520_v50 = vld [vmem:[%s3570_s1] sm:$0x3] }
  0x72   : > { %523 = vadd.xlane.f32.xlu0 %v522_v2  ;;  %634 = vst [vmem:[#allocation3 + $0x8] sm:$0xff] %v2829_v46  ;;  %v521_v54 = vld [vmem:[%s3571_s2] sm:$0x3]  ;;  %v605_v57 = vperm.slane %v520_v50, 0  ;;  %v606_v58 = vperm.slane %v520_v50, 1 }
  0x73   : > { %529 = vadd.xlane.f32.xlu1 %v528_v5  ;;  %635 = vst [vmem:[#allocation3] sm:$0xff] %v2829_v46  ;;  %v616_v61 = vperm.slane %v521_v54, 0  ;;  %v617_v62 = vperm.slane %v521_v54, 1 }
  0x74   : > { %636 = vst [vmem:[#allocation3 + $0x18] sm:$0xff] %v2829_v46 }
  0x75   : > { %637 = vst [vmem:[#allocation3 + $0x20] sm:$0xff] %v2829_v46 }
  0x76   : > { %v2741_v10 = vpop.eup %2740 }
  0x77   : > { %v532_v11 = vmul.f32 256.0, %v2741_v10  ;;  %vm536_vm0 = vweird.f32 %v2741_v10 }
  0x79   : > { %v533_v12 = vsub.f32 1.0, %v532_v11 }
  0x7a   : > { %526 = vadd.xlane.f32.xlu0 %v525_v8 }
  0x7b   : > { %v534_v13 = vmul.f32 %v2741_v10, %v533_v12 }
  0x7d   : > { %v535_v14 = vadd.f32 %v2741_v10, %v534_v13 }
  0x7f   : > { %v537_v15 = vsel %vm536_vm0, %v2741_v10, %v535_v14 }
  0xe5   : > { %v524_v16 = vpop.xlane.xlu0 %523 }
  0xe6   : > { %v538_v17 = vmul.f32 %v537_v15, %v524_v16  ;;  %v530_v22 = vpop.xlane.xlu1 %529 }
  0xe7   : > { %v540_v26 = vmul.f32 %v537_v15, %v530_v22 }
  0xe8   : > { %v541_v18 = vsub.f32 %v514_v0, %v538_v17  ;;  %v542_v19 = vsub.f32 %v515_v1, %v538_v17 }
  0xe9   : > { %v3099_v29 = vsub.f32 %v518_v3, %v540_v26  ;;  %v3101_v30 = vsub.f32 %v519_v4, %v540_v26 }
  0xea   : > { %v547_v20 = vmul.f32 %v541_v18, %v541_v18  ;;  %v548_v21 = vmul.f32 %v542_v19, %v542_v19 }
  0xeb   : > { %v551_v34 = vmul.f32 %v3099_v29, %v3099_v29  ;;  %v552_v35 = vmul.f32 %v3101_v30, %v3101_v30 }
  0xec   : > { %v553_v23 = vadd.f32 %v548_v21, %v547_v20 }
  0xed   : > { %v527_v24 = vpop.xlane.xlu0 %526  ;;  %v559_v36 = vadd.f32 %v552_v35, %v551_v34 }
  0xee   : > { %v539_v25 = vmul.f32 %v537_v15, %v527_v24  ;;  %554 = vadd.xlane.f32.xlu1 %v553_v23 }
  0xf0   : > { %v3095_v27 = vsub.f32 %v516_v6, %v539_v25  ;;  %v3097_v28 = vsub.f32 %v517_v7, %v539_v25 }
  0xf2   : > { %v549_v31 = vmul.f32 %v3095_v27, %v3095_v27  ;;  %v550_v32 = vmul.f32 %v3097_v28, %v3097_v28 }
  0xf4   : > { %v556_v33 = vadd.f32 %v550_v32, %v549_v31 }
  0xf6   : > { %557 = vadd.xlane.f32.xlu2 %v556_v33 }
  0xfe   : > { %560 = vadd.xlane.f32.xlu2 %v559_v36 }
 0x161   : > { %v555_v37 = vpop.xlane.xlu1 %554 }
 0x162   : > { %v562_v38 = vmul.f32 %v555_v37, %v537_v15 }
 0x164   : > { %v565_v39 = vadd.f32 1e-06, %v562_v38 }
 0x166   : > { %2742 = vrsqrt.f32 %v565_v39  ;;  %vm574_vm2 = vweird.f32 %v565_v39 }
 0x169   : > { %v558_v40 = vpop.xlane.xlu2 %557 }
 0x16a   : > { %v563_v41 = vmul.f32 %v558_v40, %v537_v15 }
 0x16c   : > { %v2743_v42 = vpop.eup %2742  ;;  %v566_v43 = vadd.f32 1e-06, %v563_v41 }
 0x16d   : > { %v569_v44 = vmul.f32 %v2743_v42, %v565_v39  ;;  %vm575_vm1 = vweird.f32 %v2743_v42 }
 0x16e   : > { %2744 = vrsqrt.f32 %v566_v43  ;;  %vm576_vm3 = vmor %vm574_vm2, %vm575_vm1  ;;  %vm584_vm5 = vweird.f32 %v566_v43 }
 0x16f   : > { %v570_v45 = vmul.f32 %v2743_v42, %v569_v44 }
 0x171   : > { %v571_v47 = vmul.f32 0.5, %v570_v45  ;;  %v561_v48 = vpop.xlane.xlu2 %560 }
 0x172   : > { %v564_v49 = vmul.f32 %v561_v48, %v537_v15 }
 0x173   : > { %v572_v51 = vsub.f32 1.5, %v571_v47 }
 0x174   : > { %v2745_v52 = vpop.eup %2744  ;;  %v567_v53 = vadd.f32 1e-06, %v564_v49 }
 0x175   : > { %v573_v55 = vmul.f32 %v2743_v42, %v572_v51  ;;  %v579_v56 = vmul.f32 %v2745_v52, %v566_v43  ;;  %vm585_vm4 = vweird.f32 %v2745_v52 }
 0x176   : > { %2746 = vrsqrt.f32 %v567_v53  ;;  %vm586_vm6 = vmor %vm584_vm5, %vm585_vm4  ;;  %vm594_vm8 = vweird.f32 %v567_v53 }
 0x177   : > { %v577_v59 = vsel %vm576_vm3, %v2743_v42, %v573_v55  ;;  %v580_v60 = vmul.f32 %v2745_v52, %v579_v56 }
 0x178   : > { %v598_v63 = vmul.f32 %v577_v59, %v541_v18  ;;  %v599_v0 = vmul.f32 %v577_v59, %v542_v19 }
 0x179   : > { %v581_v1 = vmul.f32 0.5, %v580_v60 }
 0x17a   : > { %v609_v2 = vmul.f32 %v605_v57, %v598_v63  ;;  %v610_v3 = vmul.f32 %v606_v58, %v599_v0 }
 0x17b   : > { %v582_v4 = vsub.f32 1.5, %v581_v1 }
 0x17c   : > { %v2747_v5 = vpop.eup %2746  ;;  %v620_v6 = vadd.f32 %v616_v61, %v609_v2  ;;  %v621_v7 = vadd.f32 %v617_v62, %v610_v3 }
 0x17d   : > { %v583_v8 = vmul.f32 %v2745_v52, %v582_v4  ;;  %v589_v9 = vmul.f32 %v2747_v5, %v567_v53  ;;  %vm595_vm7 = vweird.f32 %v2747_v5 }
 0x17e   : > { %v626_v10 = vpack.c.bf16 %v621_v7, %v620_v6  ;;  %vm596_vm9 = vmor %vm594_vm8, %vm595_vm7 }
 0x17f   : > { %v587_v11 = vsel %vm586_vm6, %v2745_v52, %v583_v8  ;;  %v590_v12 = vmul.f32 %v2747_v5, %v589_v9 }
 0x180   : > { %629 = vst [vmem:[#allocation2] sm:$0xff] %v626_v10  ;;  %v600_v13 = vmul.f32 %v587_v11, %v3095_v27  ;;  %v601_v14 = vmul.f32 %v587_v11, %v3097_v28 }
 0x181   : > { %v591_v15 = vmul.f32 0.5, %v590_v12 }
 0x182   : > { %v611_v16 = vmul.f32 %v605_v57, %v600_v13  ;;  %v612_v17 = vmul.f32 %v606_v58, %v601_v14 }
 0x183   : > { %v592_v18 = vsub.f32 1.5, %v591_v15 }
 0x184   : > { %v622_v19 = vadd.f32 %v616_v61, %v611_v16  ;;  %v623_v20 = vadd.f32 %v617_v62, %v612_v17 }
 0x185   : > { %v593_v21 = vmul.f32 %v2747_v5, %v592_v18 }
 0x186   : > { %v627_v22 = vpack.c.bf16 %v623_v20, %v622_v19 }
 0x187   : > { %v597_v23 = vsel %vm596_vm9, %v2747_v5, %v593_v21 }
 0x188   : > { %630 = vst [vmem:[#allocation2 + $0x8] sm:$0xff] %v627_v22  ;;  %v602_v24 = vmul.f32 %v597_v23, %v3099_v29  ;;  %v603_v25 = vmul.f32 %v597_v23, %v3101_v30 }
 0x18a   : > { %v613_v26 = vmul.f32 %v605_v57, %v602_v24  ;;  %v614_v27 = vmul.f32 %v606_v58, %v603_v25 }
 0x18c   : > { %v624_v28 = vadd.f32 %v616_v61, %v613_v26  ;;  %v625_v31 = vadd.f32 %v617_v62, %v614_v27 }
 0x18e   : > { %v628_v32 = vpack.c.bf16 %v625_v31, %v624_v28 }
 0x190   : > { %631 = vst [vmem:[#allocation2 + $0x10] sm:$0xff] %v628_v32 }
 0x191 PF: > { %v2147_v29 = vld [vmem:[%s3086_s8 + $0xe0] sm:$0xf]  ;;  %v2584_v30 = vld [vmem:[%s3086_s8 + $0xec] sm:$0xf0]  ;;  %v2582_v36 = vld [vmem:[%s3086_s8 + $0xe4] sm:$0xf] }
 0x192   : > { %v2275_v33 = vld [vmem:[%s3086_s8 + $0x1e0] sm:$0xf]  ;;  %v2148_v34 = vor.u32 %v2584_v30, %v2147_v29  ;;  %v2616_v35 = vld [vmem:[%s3086_s8 + $0x1ec] sm:$0xf0]  ;;  %v2149_v37 = vld [vmem:[%s3086_s8 + $0xf0] sm:$0xf0] }
 0x193   : > { %v2276_v38 = vor.u32 %v2616_v35, %v2275_v33  ;;  %v2152_v39 = vor.u32 %v2582_v36, %v2149_v37  ;;  %v2614_v40 = vld [vmem:[%s3086_s8 + $0x1e4] sm:$0xf]  ;;  %v2277_v41 = vld [vmem:[%s3086_s8 + $0x1f0] sm:$0xf0]  ;;  %v2131_v42 = vld [vmem:[%s3086_s8 + $0xc0] sm:$0xf] }
 0x194   : > { %1052 = vmatpush.bf16.msra.mxu0 %v2148_v34  ;;  %v2280_v43 = vor.u32 %v2614_v40, %v2277_v41  ;;  %v2580_v44 = vld [vmem:[%s3086_s8 + $0xcc] sm:$0xf0]  ;;  %v2259_v45 = vld [vmem:[%s3086_s8 + $0x1c0] sm:$0xf]  ;;  %v2578_v49 = vld [vmem:[%s3086_s8 + $0xc4] sm:$0xf] }
 0x195   : > { %v2612_v46 = vld [vmem:[%s3086_s8 + $0x1cc] sm:$0xf0]  ;;  %1070 = vmatpush.bf16.msra.mxu1 %v2276_v38  ;;  %1088 = vmatpush.bf16.msra.mxu2 %v2152_v39  ;;  %v2132_v47 = vor.u32 %v2580_v44, %v2131_v42  ;;  %v2133_v50 = vld [vmem:[%s3086_s8 + $0xd0] sm:$0xf0]  ;;  %v2610_v51 = vld [vmem:[%s3086_s8 + $0x1c4] sm:$0xf] }
 0x196   : > { %v2260_v48 = vor.u32 %v2612_v46, %v2259_v45  ;;  %1106 = vmatpush.bf16.msra.mxu3 %v2280_v43  ;;  %v2136_v52 = vor.u32 %v2578_v49, %v2133_v50  ;;  %v2261_v53 = vld [vmem:[%s3086_s8 + $0x1d0] sm:$0xf0]  ;;  %v2115_v54 = vld [vmem:[%s3086_s8 + $0xa0] sm:$0xf]  ;;  %v2576_v55 = vld [vmem:[%s3086_s8 + $0xac] sm:$0xf0] }
 0x197   : > { %v2264_v56 = vor.u32 %v2610_v51, %v2261_v53  ;;  %v2243_v57 = vld [vmem:[%s3086_s8 + $0x1a0] sm:$0xf]  ;;  %v2608_v58 = vld [vmem:[%s3086_s8 + $0x1ac] sm:$0xf0]  ;;  %v2574_v59 = vld [vmem:[%s3086_s8 + $0xa4] sm:$0xf]  ;;  %v2116_v60 = vor.u32 %v2576_v55, %v2115_v54 }
 0x198   : > { %1053 = vmatpush.bf16.msra.mxu0 %v2132_v47  ;;  %v2117_v61 = vld [vmem:[%s3086_s8 + $0xb0] sm:$0xf0]  ;;  %v2606_v62 = vld [vmem:[%s3086_s8 + $0x1a4] sm:$0xf]  ;;  %v2244_v0 = vor.u32 %v2608_v58, %v2243_v57  ;;  %v2099_v2 = vld [vmem:[%s3086_s8 + $0x80] sm:$0xf] }
 0x199   : > { %v2245_v63 = vld [vmem:[%s3086_s8 + $0x1b0] sm:$0xf0]  ;;  %1071 = vmatpush.bf16.msra.mxu1 %v2260_v48  ;;  %1089 = vmatpush.bf16.msra.mxu2 %v2136_v52  ;;  %v2120_v1 = vor.u32 %v2574_v59, %v2117_v61  ;;  %v2572_v3 = vld [vmem:[%s3086_s8 + $0x8c] sm:$0xf0]  ;;  %v2227_v4 = vld [vmem:[%s3086_s8 + $0x180] sm:$0xf] }
 0x19a   : > { %1107 = vmatpush.bf16.msra.mxu3 %v2264_v56  ;;  %v2248_v5 = vor.u32 %v2606_v62, %v2245_v63  ;;  %v2604_v6 = vld [vmem:[%s3086_s8 + $0x18c] sm:$0xf0]  ;;  %v2570_v7 = vld [vmem:[%s3086_s8 + $0x84] sm:$0xf]  ;;  %v2101_v8 = vld [vmem:[%s3086_s8 + $0x90] sm:$0xf0]  ;;  %v2100_v11 = vor.u32 %v2572_v3, %v2099_v2 }
 0x19b   : > { %v2602_v9 = vld [vmem:[%s3086_s8 + $0x184] sm:$0xf]  ;;  %v2229_v10 = vld [vmem:[%s3086_s8 + $0x190] sm:$0xf0]  ;;  %v2228_v12 = vor.u32 %v2604_v6, %v2227_v4  ;;  %v2104_v13 = vor.u32 %v2570_v7, %v2101_v8  ;;  %v2083_v14 = vld [vmem:[%s3086_s8 + $0x60] sm:$0xf] }
 0x19c   : > { %1054 = vmatpush.bf16.msra.mxu0 %v2116_v60  ;;  %v2568_v15 = vld [vmem:[%s3086_s8 + $0x6c] sm:$0xf0]  ;;  %v2211_v16 = vld [vmem:[%s3086_s8 + $0x160] sm:$0xf]  ;;  %v2232_v17 = vor.u32 %v2602_v9, %v2229_v10  ;;  %v2566_v19 = vld [vmem:[%s3086_s8 + $0x64] sm:$0xf] }
 0x19d   : > { %1072 = vmatpush.bf16.msra.mxu1 %v2244_v0  ;;  %1090 = vmatpush.bf16.msra.mxu2 %v2120_v1  ;;  %v2600_v18 = vld [vmem:[%s3086_s8 + $0x16c] sm:$0xf0]  ;;  %v2085_v20 = vld [vmem:[%s3086_s8 + $0x70] sm:$0xf0]  ;;  %v2598_v21 = vld [vmem:[%s3086_s8 + $0x164] sm:$0xf]  ;;  %v2084_v23 = vor.u32 %v2568_v15, %v2083_v14 }
 0x19e   : > { %1108 = vmatpush.bf16.msra.mxu3 %v2248_v5  ;;  %v2213_v22 = vld [vmem:[%s3086_s8 + $0x170] sm:$0xf0]  ;;  %v2212_v24 = vor.u32 %v2600_v18, %v2211_v16  ;;  %v2088_v25 = vor.u32 %v2566_v19, %v2085_v20  ;;  %v2067_v26 = vld [vmem:[%s3086_s8 + $0x40] sm:$0xf]  ;;  %v2564_v27 = vld [vmem:[%s3086_s8 + $0x4c] sm:$0xf0] }
 0x19f   : > { %v2195_v28 = vld [vmem:[%s3086_s8 + $0x140] sm:$0xf]  ;;  %v2216_v31 = vor.u32 %v2598_v21, %v2213_v22  ;;  %v2596_v32 = vld [vmem:[%s3086_s8 + $0x14c] sm:$0xf0]  ;;  %v2562_v29 = vld [vmem:[%s3086_s8 + $0x44] sm:$0xf]  ;;  %v2068_v35 = vor.u32 %v2564_v27, %v2067_v26 }
 0x1a0   : > { %1055 = vmatpush.bf16.msra.mxu0 %v2100_v11  ;;  %v2069_v30 = vld [vmem:[%s3086_s8 + $0x50] sm:$0xf0]  ;;  %v2594_v33 = vld [vmem:[%s3086_s8 + $0x144] sm:$0xf]  ;;  %v2196_v36 = vor.u32 %v2596_v32, %v2195_v28  ;;  %v2051_v38 = vld [vmem:[%s3086_s8 + $0x20] sm:$0xf] }
 0x1a1   : > { %1073 = vmatpush.bf16.msra.mxu1 %v2228_v12  ;;  %1091 = vmatpush.bf16.msra.mxu2 %v2104_v13  ;;  %v2197_v34 = vld [vmem:[%s3086_s8 + $0x150] sm:$0xf0]  ;;  %v2072_v37 = vor.u32 %v2562_v29, %v2069_v30  ;;  %v2560_v39 = vld [vmem:[%s3086_s8 + $0x2c] sm:$0xf0]  ;;  %v2179_v40 = vld [vmem:[%s3086_s8 + $0x120] sm:$0xf] }
 0x1a2   : > { %1109 = vmatpush.bf16.msra.mxu3 %v2232_v17  ;;  %v2200_v41 = vor.u32 %v2594_v33, %v2197_v34  ;;  %v2592_v42 = vld [vmem:[%s3086_s8 + $0x12c] sm:$0xf0]  ;;  %v2558_v43 = vld [vmem:[%s3086_s8 + $0x24] sm:$0xf]  ;;  %v2053_v44 = vld [vmem:[%s3086_s8 + $0x30] sm:$0xf0]  ;;  %v2052_v47 = vor.u32 %v2560_v39, %v2051_v38 }
 0x1a3   : > { %v2590_v45 = vld [vmem:[%s3086_s8 + $0x124] sm:$0xf]  ;;  %v2181_v46 = vld [vmem:[%s3086_s8 + $0x130] sm:$0xf0]  ;;  %v2035_v48 = vld [vmem:[%s3086_s8] sm:$0xf]  ;;  %v2180_v50 = vor.u32 %v2592_v42, %v2179_v40  ;;  %v2056_v51 = vor.u32 %v2558_v43, %v2053_v44 }
 0x1a4   : > { %1056 = vmatpush.bf16.msra.mxu0 %v2084_v23  ;;  %v2556_v49 = vld [vmem:[%s3086_s8 + $0xc] sm:$0xf0]  ;;  %v2163_v52 = vld [vmem:[%s3086_s8 + $0x100] sm:$0xf]  ;;  %v2554_v54 = vld [vmem:[%s3086_s8 + $0x4] sm:$0xf]  ;;  %v2184_v55 = vor.u32 %v2590_v45, %v2181_v46 }
 0x1a5   : > { %1074 = vmatpush.bf16.msra.mxu1 %v2212_v24  ;;  %1092 = vmatpush.bf16.msra.mxu2 %v2088_v25  ;;  %v2588_v53 = vld [vmem:[%s3086_s8 + $0x10c] sm:$0xf0]  ;;  %v2037_v56 = vld [vmem:[%s3086_s8 + $0x10] sm:$0xf0]  ;;  %v2586_v57 = vld [vmem:[%s3086_s8 + $0x104] sm:$0xf]  ;;  %v2036_v62 = vor.u32 %v2556_v49, %v2035_v48 }
 0x1a6   : > { %1110 = vmatpush.bf16.msra.mxu3 %v2216_v31  ;;  %v2165_v58 = vld [vmem:[%s3086_s8 + $0x110] sm:$0xf0]  ;;  %v2027_v59 = vld [vmem:[#allocation2] sm:$0xf]  ;;  %v2583_v60 = vld [vmem:[%s3086_s8 + $0xec] sm:$0xf]  ;;  %v2164_v2 = vor.u32 %v2588_v53, %v2163_v52  ;;  %v2040_v3 = vor.u32 %v2554_v54, %v2037_v56 }
 0x1a7   : > { %v2157_v61 = vld [vmem:[%s3086_s8 + $0xf8] sm:$0xf0]  ;;  %v2553_v63 = vld [vmem:[#allocation2 + $0x4] sm:$0xf0]  ;;  %v2283_v0 = vld [vmem:[%s3086_s8 + $0x1e8] sm:$0xf]  ;;  %v2168_v6 = vor.u32 %v2586_v57, %v2165_v58 }
 0x1a8   : > { %1057 = vmatpush.bf16.msra.mxu0 %v2068_v35  ;;  %v2617_v1 = vld [vmem:[%s3086_s8 + $0x1f4] sm:$0xf0]  ;;  %v2552_v4 = vld [vmem:[#allocation2 + $0x4] sm:$0xf]  ;;  %v2029_v5 = vld [vmem:[#allocation2 + $0x8] sm:$0xf0]  ;;  %v2160_v7 = vor.u32 %v2583_v60, %v2157_v61  ;;  %v3192_v11 = vor.u32 %v2553_v63, %v2027_v59 }
 0x1a9   : > { %1075 = vmatpush.bf16.msra.mxu1 %v2196_v36  ;;  %1093 = vmatpush.bf16.msra.mxu2 %v2072_v37  ;;  %v2155_v8 = vld [vmem:[%s3086_s8 + $0xe8] sm:$0xf]  ;;  %v2585_v9 = vld [vmem:[%s3086_s8 + $0xf4] sm:$0xf0]  ;;  %v2615_v10 = vld [vmem:[%s3086_s8 + $0x1ec] sm:$0xf]  ;;  %v2284_v12 = vor.u32 %v2617_v1, %v2283_v0  ;;  %v3197_v16 = vor.u32 %v2552_v4, %v2029_v5 }
 0x1aa   : > { %1111 = vmatpush.bf16.msra.mxu3 %v2200_v41  ;;  %v2285_v13 = vld [vmem:[%s3086_s8 + $0x1f8] sm:$0xf0]  ;;  %v2579_v14 = vld [vmem:[%s3086_s8 + $0xcc] sm:$0xf]  ;;  %v2267_v17 = vld [vmem:[%s3086_s8 + $0x1c8] sm:$0xf]  ;;  %v2156_v19 = vor.u32 %v2585_v9, %v2155_v8 }
 0x1ab   : > { %v2141_v15 = vld [vmem:[%s3086_s8 + $0xd8] sm:$0xf0]  ;;  %v2613_v18 = vld [vmem:[%s3086_s8 + $0x1d4] sm:$0xf0]  ;;  %v2288_v20 = vor.u32 %v2615_v10, %v2285_v13  ;;  %v2139_v22 = vld [vmem:[%s3086_s8 + $0xc8] sm:$0xf] }
 0x1ac   : > { %1058 = vmatpush.bf16.msra.mxu0 %v2052_v47  ;;  %v2144_v21 = vor.u32 %v2579_v14, %v2141_v15  ;;  %v2581_v23 = vld [vmem:[%s3086_s8 + $0xd4] sm:$0xf0]  ;;  %v2611_v24 = vld [vmem:[%s3086_s8 + $0x1cc] sm:$0xf]  ;;  %v2268_v25 = vor.u32 %v2613_v18, %v2267_v17  ;;  %v2269_v26 = vld [vmem:[%s3086_s8 + $0x1d8] sm:$0xf0] }
 0x1ad   : > { %1076 = vmatpush.bf16.msra.mxu1 %v2180_v50  ;;  %1094 = vmatpush.bf16.msra.mxu2 %v2056_v51  ;;  %v2575_v27 = vld [vmem:[%s3086_s8 + $0xac] sm:$0xf]  ;;  %v2125_v28 = vld [vmem:[%s3086_s8 + $0xb8] sm:$0xf0]  ;;  %v2251_v31 = vld [vmem:[%s3086_s8 + $0x1a8] sm:$0xf]  ;;  %v2140_v29 = vor.u32 %v2581_v23, %v2139_v22  ;;  %v2272_v30 = vor.u32 %v2611_v24, %v2269_v26 }
 0x1ae   : > { %1112 = vmatpush.bf16.msra.mxu3 %v2184_v55  ;;  %v2609_v32 = vld [vmem:[%s3086_s8 + $0x1b4] sm:$0xf0]  ;;  %v2128_v33 = vor.u32 %v2575_v27, %v2125_v28  ;;  %v2123_v34 = vld [vmem:[%s3086_s8 + $0xa8] sm:$0xf]  ;;  %v2607_v36 = vld [vmem:[%s3086_s8 + $0x1ac] sm:$0xf] }
 0x1af   : > { %v2577_v35 = vld [vmem:[%s3086_s8 + $0xb4] sm:$0xf0]  ;;  %v2252_v37 = vor.u32 %v2609_v32, %v2251_v31  ;;  %v2253_v38 = vld [vmem:[%s3086_s8 + $0x1b8] sm:$0xf0]  ;;  %v2571_v39 = vld [vmem:[%s3086_s8 + $0x8c] sm:$0xf] }
 0x1b0   : > { %1059 = vmatpush.bf16.msra.mxu0 %v2036_v62  ;;  %v2109_v40 = vld [vmem:[%s3086_s8 + $0x98] sm:$0xf0]  ;;  %v2235_v41 = vld [vmem:[%s3086_s8 + $0x188] sm:$0xf]  ;;  %v2605_v42 = vld [vmem:[%s3086_s8 + $0x194] sm:$0xf0]  ;;  %v2124_v44 = vor.u32 %v2577_v35, %v2123_v34  ;;  %v2256_v45 = vor.u32 %v2607_v36, %v2253_v38 }
 0x1b1   : > { %1077 = vmatpush.bf16.msra.mxu1 %v2164_v2  ;;  %1095 = vmatpush.bf16.msra.mxu2 %v2040_v3  ;;  %v640_v43 = vld [vmem:[#allocation2 + $0x10] sm:$0xff]  ;;  %v2112_v46 = vor.u32 %v2571_v39, %v2109_v40  ;;  %v2573_v48 = vld [vmem:[%s3086_s8 + $0x94] sm:$0xf0]  ;;  %v2236_v50 = vor.u32 %v2605_v42, %v2235_v41  ;;  %v2237_v51 = vld [vmem:[%s3086_s8 + $0x198] sm:$0xf0]  ;;  %p2545_p0 = scmp.ne.s32.totalorder %s2810_s26, 1 }
 0x1b2   : > { %1113 = vmatpush.bf16.msra.mxu3 %v2168_v6  ;;  %v2107_v47 = vld [vmem:[%s3086_s8 + $0x88] sm:$0xf]  ;;  %v2603_v49 = vld [vmem:[%s3086_s8 + $0x18c] sm:$0xf]  ;;  %v722_v52 = vunpack.c.l.b16 %v640_v43  ;;  %v2093_v54 = vld [vmem:[%s3086_s8 + $0x78] sm:$0xf0]  ;;  %v723_v55 = vunpack.c.h.b16 %v640_v43 }
 0x1b3   : > { %1060 = vmatmul.bf16.vlgmr.msra.gmra.mxu0 %v3192_v11  ;;  %v2567_v53 = vld [vmem:[%s3086_s8 + $0x6c] sm:$0xf]  ;;  %v2219_v56 = vld [vmem:[%s3086_s8 + $0x168] sm:$0xf]  ;;  %v2601_v57 = vld [vmem:[%s3086_s8 + $0x174] sm:$0xf0]  ;;  %v2108_v58 = vor.u32 %v2573_v48, %v2107_v47  ;;  %v2240_v59 = vor.u32 %v2603_v49, %v2237_v51 }
 0x1b4   : > { %1078 = vmatmul.bf16.vlgmr.msra.gmra.mxu1 %v3197_v16  ;;  %1096 = vmatmul.bf16.vlgmr.msra.gmra.mxu2 %v3192_v11  ;;  %v2096_v60 = vor.u32 %v2567_v53, %v2093_v54  ;;  %v2091_v61 = vld [vmem:[%s3086_s8 + $0x68] sm:$0xf]  ;;  %v2569_v62 = vld [vmem:[%s3086_s8 + $0x74] sm:$0xf0]  ;;  %v2599_v63 = vld [vmem:[%s3086_s8 + $0x16c] sm:$0xf]  ;;  %v3232_v0 = vpack.c.b16 %v722_v52, %v722_v52  ;;  %v2220_v1 = vor.u32 %v2601_v57, %v2219_v56 }
 0x1b5   : > { %1160 = vmatpush.bf16.msrb.mxu2 %v2160_v7  ;;  %1142 = vmatpush.bf16.msrb.mxu1 %v2284_v12  ;;  %v2221_v2 = vld [vmem:[%s3086_s8 + $0x178] sm:$0xf0]  ;;  %v2563_v3 = vld [vmem:[%s3086_s8 + $0x4c] sm:$0xf]  ;;  %v3237_v5 = vpack.c.b16 %v723_v55, %v723_v55  ;;  %v2203_v6 = vld [vmem:[%s3086_s8 + $0x148] sm:$0xf]  ;;  %v2092_v8 = vor.u32 %v2569_v62, %v2091_v61 }
 0x1b6   : > { %1114 = vmatmul.bf16.vlgmr.msra.gmra.mxu3 %v3197_v16  ;;  %1124 = vmatpush.bf16.msrb.mxu0 %v2156_v19  ;;  %v2077_v4 = vld [vmem:[%s3086_s8 + $0x58] sm:$0xf0]  ;;  %v2597_v7 = vld [vmem:[%s3086_s8 + $0x154] sm:$0xf0]  ;;  %v2224_v9 = vor.u32 %v2599_v63, %v2221_v2  ;;  %v2075_v12 = vld [vmem:[%s3086_s8 + $0x48] sm:$0xf] }
 0x1b7   : > { %1178 = vmatpush.bf16.msrb.mxu3 %v2288_v20  ;;  %v2080_v10 = vor.u32 %v2563_v3, %v2077_v4  ;;  %v2565_v13 = vld [vmem:[%s3086_s8 + $0x54] sm:$0xf0]  ;;  %v2595_v14 = vld [vmem:[%s3086_s8 + $0x14c] sm:$0xf]  ;;  %v2204_v15 = vor.u32 %v2597_v7, %v2203_v6  ;;  %v2205_v17 = vld [vmem:[%s3086_s8 + $0x158] sm:$0xf0] }
 0x1b8   : > { %v2559_v18 = vld [vmem:[%s3086_s8 + $0x2c] sm:$0xf]  ;;  %v2061_v19 = vld [vmem:[%s3086_s8 + $0x38] sm:$0xf0]  ;;  %v2187_v20 = vld [vmem:[%s3086_s8 + $0x128] sm:$0xf]  ;;  %v2076_v22 = vor.u32 %v2565_v13, %v2075_v12  ;;  %v2208_v23 = vor.u32 %v2595_v14, %v2205_v17 }
 0x1b9   : > { %1161 = vmatpush.bf16.msrb.mxu2 %v2144_v21  ;;  %1143 = vmatpush.bf16.msrb.mxu1 %v2268_v25  ;;  %v2593_v21 = vld [vmem:[%s3086_s8 + $0x134] sm:$0xf0]  ;;  %v2064_v24 = vor.u32 %v2559_v18, %v2061_v19  ;;  %v2059_v25 = vld [vmem:[%s3086_s8 + $0x28] sm:$0xf]  ;;  %v2591_v27 = vld [vmem:[%s3086_s8 + $0x12c] sm:$0xf] }
 0x1ba   : > { %1125 = vmatpush.bf16.msrb.mxu0 %v2140_v29  ;;  %v2561_v26 = vld [vmem:[%s3086_s8 + $0x34] sm:$0xf0]  ;;  %v2188_v28 = vor.u32 %v2593_v21, %v2187_v20  ;;  %v2189_v31 = vld [vmem:[%s3086_s8 + $0x138] sm:$0xf0]  ;;  %v2555_v32 = vld [vmem:[%s3086_s8 + $0xc] sm:$0xf] }
 0x1bb   : > { %1179 = vmatpush.bf16.msrb.mxu3 %v2272_v30  ;;  %v2045_v29 = vld [vmem:[%s3086_s8 + $0x18] sm:$0xf0]  ;;  %v2171_v30 = vld [vmem:[%s3086_s8 + $0x108] sm:$0xf]  ;;  %v2060_v34 = vor.u32 %v2561_v26, %v2059_v25  ;;  %v2192_v35 = vor.u32 %v2591_v27, %v2189_v31  ;;  %v2557_v38 = vld [vmem:[%s3086_s8 + $0x14] sm:$0xf0] }
 0x1bc   : > { %v2048_v36 = vor.u32 %v2555_v32, %v2045_v29  ;;  %v2587_v40 = vld [vmem:[%s3086_s8 + $0x10c] sm:$0xf]  ;;  %v2173_v41 = vld [vmem:[%s3086_s8 + $0x118] sm:$0xf0]  ;;  %v2411_v48 = vld [vmem:[%s3084_s21 + $0xf0] sm:$0xf] }
 0x1bd   : > { %1162 = vmatpush.bf16.msrb.mxu2 %v2128_v33  ;;  %1144 = vmatpush.bf16.msrb.mxu1 %v2252_v37  ;;  %v2589_v33 = vld [vmem:[%s3086_s8 + $0x114] sm:$0xf0]  ;;  %v2043_v37 = vld [vmem:[%s3086_s8 + $0x8] sm:$0xf]  ;;  %v2176_v43 = vor.u32 %v2587_v40, %v2173_v41  ;;  %v2649_v49 = vld [vmem:[%s3084_s21 + $0xf4] sm:$0xf0] }
 0x1be   : > { %1126 = vmatpush.bf16.msrb.mxu0 %v2124_v44  ;;  %v2172_v39 = vor.u32 %v2589_v33, %v2171_v30  ;;  %v2044_v42 = vor.u32 %v2557_v38, %v2043_v37  ;;  %v2347_v44 = vld [vmem:[%s3084_s21 + $0x70] sm:$0xf]  ;;  %v2629_v52 = vld [vmem:[%s3084_s21 + $0x54] sm:$0xf0]  ;;  %v2403_v54 = vld [vmem:[%s3084_s21 + $0xe0] sm:$0xf] }
 0x1bf   : > { %1180 = vmatpush.bf16.msrb.mxu3 %v2256_v45  ;;  %v2633_v45 = vld [vmem:[%s3084_s21 + $0x74] sm:$0xf0]  ;;  %v2331_v51 = vld [vmem:[%s3084_s21 + $0x50] sm:$0xf]  ;;  %v2647_v55 = vld [vmem:[%s3084_s21 + $0xe4] sm:$0xf0] }
 0x1c0   : > { %v2332_v53 = vor.u32 %v2629_v52, %v2331_v51  ;;  %v2404_v56 = vor.u32 %v2647_v55, %v2403_v54  ;;  %v2323_v57 = vld [vmem:[%s3084_s21 + $0x40] sm:$0xf]  ;;  %v2645_v61 = vld [vmem:[%s3084_s21 + $0xd4] sm:$0xf0]  ;;  %v2315_v63 = vld [vmem:[%s3084_s21 + $0x30] sm:$0xf] }
 0x1c1   : > { %1163 = vmatpush.bf16.msrb.mxu2 %v2112_v46  ;;  %1145 = vmatpush.bf16.msrb.mxu1 %v2236_v50  ;;  %v2348_v46 = vor.u32 %v2633_v45, %v2347_v44  ;;  %v2412_v50 = vor.u32 %v2649_v49, %v2411_v48  ;;  %v2387_v2 = vld [vmem:[%s3084_s21 + $0xc0] sm:$0xf]  ;;  %v2643_v3 = vld [vmem:[%s3084_s21 + $0xc4] sm:$0xf0]  ;;  %v2299_v14 = vld [vmem:[%s3084_s21 + $0x10] sm:$0xf] }
 0x1c2   : > { %1127 = vmatpush.bf16.msrb.mxu0 %v2108_v58  ;;  %v2627_v58 = vld [vmem:[%s3084_s21 + $0x44] sm:$0xf0]  ;;  %v2388_v4 = vor.u32 %v2643_v3, %v2387_v2  ;;  %v2307_v6 = vld [vmem:[%s3084_s21 + $0x20] sm:$0xf]  ;;  %v2363_v31 = vld [vmem:[%s3084_s21 + $0x90] sm:$0xf] }
 0x1c3   : > { %1181 = vmatpush.bf16.msrb.mxu3 %v2240_v59  ;;  %1065 = vmatmul.bf16.gmra.mxu0 %v3232_v0  ;;  %v2324_v59 = vor.u32 %v2627_v58, %v2323_v57  ;;  %v2623_v7 = vld [vmem:[%s3084_s21 + $0x24] sm:$0xf0]  ;;  %v2371_v19 = vld [vmem:[%s3084_s21 + $0xa0] sm:$0xf]  ;;  %v2637_v32 = vld [vmem:[%s3084_s21 + $0x94] sm:$0xf0] }
 0x1c4   : > { %1083 = vmatmul.bf16.gmra.mxu1 %v3237_v5  ;;  %1101 = vmatmul.bf16.gmra.mxu2 %v3232_v0  ;;  %v2639_v20 = vld [vmem:[%s3084_s21 + $0xa4] sm:$0xf0]  ;;  %v2364_v30 = vor.u32 %v2637_v32, %v2363_v31  ;;  %v2475_v33 = vld [vmem:[%s3084_s21 + $0x170] sm:$0xf]  ;;  %v2355_v44 = vld [vmem:[%s3084_s21 + $0x80] sm:$0xf] }
 0x1c5   : > { %1164 = vmatpush.bf16.msrb.mxu2 %v2096_v60  ;;  %1146 = vmatpush.bf16.msrb.mxu1 %v2220_v1  ;;  %v2395_v60 = vld [vmem:[%s3084_s21 + $0xd0] sm:$0xf]  ;;  %v2619_v25 = vld [vmem:[%s3084_s21 + $0x4] sm:$0xf0]  ;;  %v2467_v49 = vld [vmem:[%s3084_s21 + $0x160] sm:$0xf] }
 0x1c6   : > { %1119 = vmatmul.bf16.gmra.mxu3 %v3237_v5  ;;  %1128 = vmatpush.bf16.msrb.mxu0 %v2092_v8  ;;  %v2396_v62 = vor.u32 %v2645_v61, %v2395_v60  ;;  %v2308_v8 = vor.u32 %v2623_v7, %v2307_v6  ;;  %v2635_v45 = vld [vmem:[%s3084_s21 + $0x84] sm:$0xf0]  ;;  %v2630_v51 = vld [vmem:[%s3084_s21 + $0x64] sm:$0xf]  ;;  %v2341_v55 = vld [vmem:[%s3084_s21 + $0x68] sm:$0xf0] }
 0x1c7   : > { %1182 = vmatpush.bf16.msrb.mxu3 %v2224_v9  ;;  %v2379_v9 = vld [vmem:[%s3084_s21 + $0xb0] sm:$0xf]  ;;  %v2344_v57 = vor.u32 %v2630_v51, %v2341_v55  ;;  %v2648_v60 = vld [vmem:[%s3084_s21 + $0xf4] sm:$0xf]  ;;  %v2657_v51 = vld [vmem:[%s3084_s21 + $0x134] sm:$0xf0] }
 0x1c8   : > { %v2539_v58 = vld [vmem:[%s3084_s21 + $0x1f0] sm:$0xf]  ;;  %v2628_v6 = vld [vmem:[%s3084_s21 + $0x54] sm:$0xf] }
 0x1c9   : > { %1165 = vmatpush.bf16.msrb.mxu2 %v2080_v10  ;;  %1147 = vmatpush.bf16.msrb.mxu1 %v2204_v15  ;;  %v2641_v10 = vld [vmem:[%s3084_s21 + $0xb4] sm:$0xf0]  ;;  %v2459_v3 = vld [vmem:[%s3084_s21 + $0x150] sm:$0xf] }
 0x1ca   : > { %1129 = vmatpush.bf16.msrb.mxu0 %v2076_v22  ;;  %v2380_v13 = vor.u32 %v2641_v10, %v2379_v9  ;;  %v2621_v15 = vld [vmem:[%s3084_s21 + $0x14] sm:$0xf0]  ;;  %v2333_v10 = vld [vmem:[%s3084_s21 + $0x58] sm:$0xf0] }
 0x1cb   : > { %1183 = vmatpush.bf16.msrb.mxu3 %v2208_v23  ;;  %v2300_v17 = vor.u32 %v2621_v15, %v2299_v14  ;;  %v2372_v23 = vor.u32 %v2639_v20, %v2371_v19  ;;  %v2531_v19 = vld [vmem:[%s3084_s21 + $0x1e0] sm:$0xf]  ;;  %v2679_v20 = vld [vmem:[%s3084_s21 + $0x1e4] sm:$0xf0] }
 0x1cd   : > { %1166 = vmatpush.bf16.msrb.mxu2 %v2064_v24  ;;  %1148 = vmatpush.bf16.msrb.mxu1 %v2188_v28  ;;  %v2291_v24 = vld [vmem:[%s3084_s21] sm:$0xf] }
 0x1ce   : > { %1130 = vmatpush.bf16.msrb.mxu0 %v2060_v34  ;;  %v2292_v27 = vor.u32 %v2619_v25, %v2291_v24  ;;  %v2665_v34 = vld [vmem:[%s3084_s21 + $0x174] sm:$0xf0]  ;;  %v2532_v24 = vor.u32 %v2679_v20, %v2531_v19  ;;  %v2646_v25 = vld [vmem:[%s3084_s21 + $0xe4] sm:$0xf] }
 0x1cf   : > { %1184 = vmatpush.bf16.msrb.mxu3 %v2192_v35  ;;  %v2632_v35 = vld [vmem:[%s3084_s21 + $0x74] sm:$0xf]  ;;  %v2476_v38 = vor.u32 %v2665_v34, %v2475_v33  ;;  %v2659_v33 = vld [vmem:[%s3084_s21 + $0x144] sm:$0xf0]  ;;  %v2626_v34 = vld [vmem:[%s3084_s21 + $0x44] sm:$0xf] }
 0x1d1   : > { %1167 = vmatpush.bf16.msrb.mxu2 %v2048_v36  ;;  %1149 = vmatpush.bf16.msrb.mxu1 %v2172_v39  ;;  %v2349_v39 = vld [vmem:[%s3084_s21 + $0x78] sm:$0xf0] }
 0x1d2   : > { %1131 = vmatpush.bf16.msrb.mxu0 %v2044_v42 }
 0x1d3   : > { %1185 = vmatpush.bf16.msrb.mxu3 %v2176_v43  ;;  %v2352_v43 = vor.u32 %v2632_v35, %v2349_v39 }
 0x1d4   : > { %1150 = vmatmul.bf16.vlgmr.msrb.gmra.mxu1 %v3197_v16  ;;  %1168 = vmatmul.bf16.vlgmr.msrb.gmra.mxu2 %v3192_v11 }
 0x1d5   : > { %1132 = vmatmul.bf16.vlgmr.msrb.gmra.mxu0 %v3192_v11  ;;  %v2339_v11 = vld [vmem:[%s3084_s21 + $0x60] sm:$0xf]  ;;  %1720 = vmatpush.bf16.msra.mxu1 %v2412_v50  ;;  %v2663_v50 = vld [vmem:[%s3084_s21 + $0x164] sm:$0xf0] }
 0x1d6   : > { %1186 = vmatmul.bf16.vlgmr.msrb.gmra.mxu3 %v3197_v16  ;;  %1702 = vmatpush.bf16.msra.mxu0 %v2348_v46  ;;  %v2631_v16 = vld [vmem:[%s3084_s21 + $0x64] sm:$0xf0]  ;;  %v2468_v54 = vor.u32 %v2663_v50, %v2467_v49  ;;  %v2443_v50 = vld [vmem:[%s3084_s21 + $0x130] sm:$0xf] }
 0x1d7   : > { %v2340_v47 = vor.u32 %v2631_v16, %v2339_v11  ;;  %1738 = vmatpush.bf16.msra.mxu2 %v2476_v38  ;;  %v2444_v55 = vor.u32 %v2657_v51, %v2443_v50  ;;  %v2499_v51 = vld [vmem:[%s3084_s21 + $0x1a0] sm:$0xf] }
 0x1d9   : > { %1721 = vmatpush.bf16.msra.mxu1 %v2404_v56 }
 0x1da   : > { %1703 = vmatpush.bf16.msra.mxu0 %v2340_v47  ;;  %v2356_v47 = vor.u32 %v2635_v45, %v2355_v44 }
 0x1db   : > { %1739 = vmatpush.bf16.msra.mxu2 %v2468_v54 }
 0x1dd   : > { %1722 = vmatpush.bf16.msra.mxu1 %v2396_v62 }
 0x1de   : > { %1704 = vmatpush.bf16.msra.mxu0 %v2332_v53 }
 0x1e1   : > { %1723 = vmatpush.bf16.msra.mxu1 %v2388_v4  ;;  %v2661_v4 = vld [vmem:[%s3084_s21 + $0x154] sm:$0xf0] }
 0x1e2   : > { %1705 = vmatpush.bf16.msra.mxu0 %v2324_v59  ;;  %v2681_v59 = vld [vmem:[%s3084_s21 + $0x1f4] sm:$0xf0]  ;;  %v2460_v9 = vor.u32 %v2661_v4, %v2459_v3  ;;  %v2675_v3 = vld [vmem:[%s3084_s21 + $0x1c4] sm:$0xf0]  ;;  %v2642_v4 = vld [vmem:[%s3084_s21 + $0xc4] sm:$0xf] }
 0x1e4   : > { %1155 = vmatmul.bf16.gmra.mxu1 %v3237_v5  ;;  %1173 = vmatmul.bf16.gmra.mxu2 %v3232_v0 }
 0x1e5   : > { %1137 = vmatmul.bf16.gmra.mxu0 %v3232_v0  ;;  %v2625_v0 = vld [vmem:[%s3084_s21 + $0x34] sm:$0xf0]  ;;  %1724 = vmatpush.bf16.msra.mxu1 %v2380_v13 }
 0x1e6   : > { %1191 = vmatmul.bf16.gmra.mxu3 %v3237_v5  ;;  %v2316_v1 = vor.u32 %v2625_v0, %v2315_v63  ;;  %v3296_v5 = vld [vmem:[%s494_s24] sm:$0xf]  ;;  %v2540_v63 = vor.u32 %v2681_v59, %v2539_v58  ;;  %v2413_v0 = vld [vmem:[%s3084_s21 + $0xf8] sm:$0xf0]  ;;  %1740 = vmatpush.bf16.msra.mxu2 %v2460_v9 }
 0x1e7   : > { %v3303_v12 = vperm.slane %v3296_v5, 0  ;;  %v3315_v28 = vperm.slane %v3296_v5, 1  ;;  %v2416_v2 = vor.u32 %v2648_v60, %v2413_v0  ;;  %v2515_v0 = vld [vmem:[%s3084_s21 + $0x1c0] sm:$0xf] }
 0x1e8   : > { %1706 = vmatpush.bf16.msra.mxu0 %v2316_v1  ;;  %1756 = vmatpush.bf16.msra.mxu3 %v2540_v63  ;;  %v2435_v9 = vld [vmem:[%s3084_s21 + $0x120] sm:$0xf] }
 0x1e9   : > { %1725 = vmatpush.bf16.msra.mxu1 %v2372_v23 }
 0x1ec   : > { %1707 = vmatpush.bf16.msra.mxu0 %v2308_v8  ;;  %1757 = vmatpush.bf16.msra.mxu3 %v2532_v24  ;;  %v2673_v24 = vld [vmem:[%s3084_s21 + $0x1b4] sm:$0xf0] }
 0x1ed   : > { %1726 = vmatpush.bf16.msra.mxu1 %v2364_v30  ;;  %v2451_v30 = vld [vmem:[%s3084_s21 + $0x140] sm:$0xf] }
 0x1f0   : > { %1708 = vmatpush.bf16.msra.mxu0 %v2300_v17 }
 0x1f1   : > { %1727 = vmatpush.bf16.msra.mxu1 %v2356_v47 }
 0x1f4   : > { %1709 = vmatpush.bf16.msra.mxu0 %v2292_v27  ;;  %v2405_v27 = vld [vmem:[%s3084_s21 + $0xe8] sm:$0xf0] }
 0x1f5   : > { %1792 = vmatpush.bf16.msrb.mxu1 %v2416_v2 }
 0x1f8   : > { %1774 = vmatpush.bf16.msrb.mxu0 %v2352_v43 }
 0x1fc   : > { %1775 = vmatpush.bf16.msrb.mxu0 %v2344_v57  ;;  %v2317_v57 = vld [vmem:[%s3084_s21 + $0x38] sm:$0xf0] }
 0x230   : > { %v1061_v18 = vpop.f32.mrf.mxu0 }
 0x231   : > { %v1062_v21 = vadd.f32 %v1061_v18, %v3303_v12  ;;  %v1079_v22 = vpop.f32.mrf.mxu1  ;;  %v2336_v18 = vor.u32 %v2628_v6, %v2333_v10  ;;  %v2655_v10 = vld [vmem:[%s3084_s21 + $0x124] sm:$0xf0] }
 0x233   : > { %v3312_v26 = vadd.f32 %v1079_v22, %v1062_v21  ;;  %1776 = vmatpush.bf16.msrb.mxu0 %v2336_v18  ;;  %v2309_v18 = vld [vmem:[%s3084_s21 + $0x28] sm:$0xf0] }
 0x235   : > { %v1196_v29 = vmul.f32 %v3312_v26, %v3312_v26 }
 0x237   : > { %v1208_v36 = vmul.f32 %v1196_v29, %v3312_v26  ;;  %v1097_v37 = vpop.f32.mrf.mxu2  ;;  %v2408_v29 = vor.u32 %v2646_v25, %v2405_v27 }
 0x238   : > { %v1098_v40 = vadd.f32 %v1097_v37, %v3315_v28  ;;  %v1063_v42 = vpop.f32.mrf.mxu0  ;;  %v2325_v37 = vld [vmem:[%s3084_s21 + $0x48] sm:$0xf0] }
 0x239   : > { %v1115_v41 = vpop.f32.mrf.mxu3  ;;  %v1220_v46 = vmul.f32 0.044715, %v1208_v36  ;;  %v1064_v11 = vadd.f32 %v1063_v42, %v3303_v12  ;;  %v1081_v16 = vpop.f32.mrf.mxu1  ;;  %v2452_v36 = vor.u32 %v2659_v33, %v2451_v30  ;;  %1793 = vmatpush.bf16.msrb.mxu1 %v2408_v29  ;;  %v2677_v42 = vld [vmem:[%s3084_s21 + $0x1d4] sm:$0xf0]  ;;  %v2640_v30 = vld [vmem:[%s3084_s21 + $0xb4] sm:$0xf] }
 0x23a   : > { %v3330_v48 = vadd.f32 %v1115_v41, %v1098_v40  ;;  %v2328_v40 = vor.u32 %v2626_v34, %v2325_v37  ;;  %v2523_v41 = vld [vmem:[%s3084_s21 + $0x1d0] sm:$0xf] }
 0x23b   : > { %v1232_v52 = vadd.f32 %v1220_v46, %v3312_v26  ;;  %v3336_v53 = vadd.f32 %v1081_v16, %v1064_v11  ;;  %1741 = vmatpush.bf16.msra.mxu2 %v2452_v36  ;;  %v2524_v46 = vor.u32 %v2677_v42, %v2523_v41  ;;  %v2644_v11 = vld [vmem:[%s3084_s21 + $0xd4] sm:$0xf]  ;;  %v2397_v16 = vld [vmem:[%s3084_s21 + $0xd8] sm:$0xf0]  ;;  %v2427_v37 = vld [vmem:[%s3084_s21 + $0x110] sm:$0xf] }
 0x23c   : > { %v1197_v56 = vmul.f32 %v3330_v48, %v3330_v48  ;;  %1777 = vmatpush.bf16.msrb.mxu0 %v2328_v40  ;;  %v2400_v49 = vor.u32 %v2644_v11, %v2397_v16  ;;  %v2381_v36 = vld [vmem:[%s3084_s21 + $0xb8] sm:$0xf0]  ;;  %v2653_v41 = vld [vmem:[%s3084_s21 + $0x114] sm:$0xf0]  ;;  %v2620_v42 = vld [vmem:[%s3084_s21 + $0x14] sm:$0xf] }
 0x23d   : > { %v1244_v61 = vmul.f32 0.7978846, %v1232_v52  ;;  %v1200_v62 = vmul.f32 %v3336_v53, %v3336_v53  ;;  %1758 = vmatpush.bf16.msra.mxu3 %v2524_v46  ;;  %v2384_v40 = vor.u32 %v2640_v30, %v2381_v36  ;;  %v2428_v46 = vor.u32 %v2653_v41, %v2427_v37  ;;  %v2301_v11 = vld [vmem:[%s3084_s21 + $0x18] sm:$0xf0]  ;;  %v2667_v30 = vld [vmem:[%s3084_s21 + $0x184] sm:$0xf0] }
 0x23e   : > { %v1209_v1 = vmul.f32 %v1197_v56, %v3330_v48  ;;  %v2624_v56 = vld [vmem:[%s3084_s21 + $0x34] sm:$0xf]  ;;  %1794 = vmatpush.bf16.msrb.mxu1 %v2400_v49  ;;  %v2304_v50 = vor.u32 %v2620_v42, %v2301_v11 }
 0x23f   : > { %2748 = vtanh.f32 %v1244_v61  ;;  %v1212_v7 = vmul.f32 %v1200_v62, %v3336_v53  ;;  %v1099_v8 = vpop.f32.mrf.mxu2  ;;  %v2320_v63 = vor.u32 %v2624_v56, %v2317_v57  ;;  %1742 = vmatpush.bf16.msra.mxu2 %v2444_v55 }
 0x240   : > { %v1221_v13 = vmul.f32 0.044715, %v1209_v1  ;;  %v1100_v14 = vadd.f32 %v1099_v8, %v3315_v28  ;;  %v1066_v17 = vpop.f32.mrf.mxu0  ;;  %v2389_v8 = vld [vmem:[%s3084_s21 + $0xc8] sm:$0xf0] }
 0x241   : > { %v1117_v15 = vpop.f32.mrf.mxu3  ;;  %v1224_v21 = vmul.f32 0.044715, %v1212_v7  ;;  %v1067_v22 = vadd.f32 %v1066_v17, %v3303_v12  ;;  %v1084_v23 = vpop.f32.mrf.mxu1  ;;  %1778 = vmatpush.bf16.msrb.mxu0 %v2320_v63  ;;  %v2622_v17 = vld [vmem:[%s3084_s21 + $0x24] sm:$0xf] }
 0x242   : > { %v1233_v31 = vadd.f32 %v1221_v13, %v3330_v48  ;;  %v3360_v32 = vadd.f32 %v1117_v15, %v1100_v14  ;;  %v2392_v14 = vor.u32 %v2642_v4, %v2389_v8  ;;  %v2436_v15 = vor.u32 %v2655_v10, %v2435_v9  ;;  %v2669_v8 = vld [vmem:[%s3084_s21 + $0x194] sm:$0xf0] }
 0x243   : > { %v1236_v35 = vadd.f32 %v1224_v21, %v3336_v53  ;;  %v3366_v12 = vadd.f32 %v1084_v23, %v1067_v22  ;;  %v2312_v22 = vor.u32 %v2622_v17, %v2309_v18  ;;  %v2507_v23 = vld [vmem:[%s3084_s21 + $0x1b0] sm:$0xf]  ;;  %v2365_v17 = vld [vmem:[%s3084_s21 + $0x98] sm:$0xf0] }
 0x244   : > { %v1245_v38 = vmul.f32 0.7978846, %v1233_v31  ;;  %v1201_v39 = vmul.f32 %v3360_v32, %v3360_v32  ;;  %1795 = vmatpush.bf16.msrb.mxu1 %v2392_v14  ;;  %1743 = vmatpush.bf16.msra.mxu2 %v2436_v15  ;;  %v2508_v29 = vor.u32 %v2673_v24, %v2507_v23  ;;  %v2636_v15 = vld [vmem:[%s3084_s21 + $0x94] sm:$0xf] }
 0x245   : > { %v2749_v43 = vpop.eup %2748  ;;  %v1248_v44 = vmul.f32 0.7978846, %v1236_v35  ;;  %v1204_v45 = vmul.f32 %v3366_v12, %v3366_v12  ;;  %v3403_v35 = vperm.slane %v3296_v5, 2  ;;  %1779 = vmatpush.bf16.msrb.mxu0 %v2312_v22 }
 0x246   : > { %2750 = vtanh.f32 %v1245_v38  ;;  %v1213_v47 = vmul.f32 %v1201_v39, %v3360_v32  ;;  %v1268_v58 = vadd.f32 1.0, %v2749_v43 }
 0x247   : > { %2752 = vtanh.f32 %v1248_v44  ;;  %v1216_v52 = vmul.f32 %v1204_v45, %v3366_v12  ;;  %v1102_v54 = vpop.f32.mrf.mxu2 }
 0x248   : > { %v1225_v59 = vmul.f32 0.044715, %v1213_v47  ;;  %v1103_v60 = vadd.f32 %v1102_v54, %v3315_v28  ;;  %v1068_v62 = vpop.f32.mrf.mxu0  ;;  %v2516_v28 = vor.u32 %v2675_v3, %v2515_v0  ;;  %v1280_v27 = vmul.f32 0.5, %v1268_v58  ;;  %1796 = vmatpush.bf16.msrb.mxu1 %v2384_v40  ;;  %v2638_v54 = vld [vmem:[%s3084_s21 + $0xa4] sm:$0xf]  ;;  %1744 = vmatpush.bf16.msra.mxu2 %v2428_v46 }
 0x249   : > { %v1120_v61 = vpop.f32.mrf.mxu3  ;;  %v1228_v1 = vmul.f32 0.044715, %v1216_v52  ;;  %v1086_v2 = vpop.f32.mrf.mxu1  ;;  %v2671_v52 = vld [vmem:[%s3084_s21 + $0x1a4] sm:$0xf0]  ;;  %1780 = vmatpush.bf16.msrb.mxu0 %v2304_v50  ;;  %v2618_v0 = vld [vmem:[%s3084_s21 + $0x4] sm:$0xf] }
 0x24a   : > { %v1237_v6 = vadd.f32 %v1225_v59, %v3360_v32  ;;  %v3388_v7 = vadd.f32 %v1120_v61, %v1103_v60  ;;  %1759 = vmatpush.bf16.msra.mxu3 %v2516_v28  ;;  %v1292_v16 = vmul.f32 %v1280_v27, %v3312_v26  ;;  %v2500_v58 = vor.u32 %v2671_v52, %v2499_v51  ;;  %v2373_v59 = vld [vmem:[%s3084_s21 + $0xa8] sm:$0xf0]  ;;  %v2419_v26 = vld [vmem:[%s3084_s21 + $0x100] sm:$0xf]  ;;  %v2651_v60 = vld [vmem:[%s3084_s21 + $0x104] sm:$0xf0] }
 0x24b   : > { %v1240_v13 = vadd.f32 %v1228_v1, %v3366_v12  ;;  %v2376_v62 = vor.u32 %v2638_v54, %v2373_v59  ;;  %v2420_v63 = vor.u32 %v2651_v60, %v2419_v26  ;;  %v2293_v1 = vld [vmem:[%s3084_s21 + $0x8] sm:$0xf0]  ;;  %v2491_v28 = vld [vmem:[%s3084_s21 + $0x190] sm:$0xf]  ;;  %v2680_v50 = vld [vmem:[%s3084_s21 + $0x1f4] sm:$0xf] }
 0x24c   : > { %v2751_v19 = vpop.eup %2750  ;;  %v1249_v20 = vmul.f32 0.7978846, %v1237_v6  ;;  %v1205_v21 = vmul.f32 %v3388_v7, %v3388_v7  ;;  %v2296_v6 = vor.u32 %v2618_v0, %v2293_v1  ;;  %v2492_v14 = vor.u32 %v2669_v8, %v2491_v28  ;;  %v2541_v51 = vld [vmem:[%s3084_s21 + $0x1f8] sm:$0xf0]  ;;  %v2453_v28 = vld [vmem:[%s3084_s21 + $0x148] sm:$0xf0] }
 0x24d   : > { %v2753_v25 = vpop.eup %2752  ;;  %v1252_v31 = vmul.f32 0.7978846, %v1240_v13  ;;  %v1269_v38 = vadd.f32 1.0, %v2751_v19  ;;  %v3429_v13 = vperm.slane %v3296_v5, 3  ;;  %1797 = vmatpush.bf16.msrb.mxu1 %v2376_v62  ;;  %1745 = vmatpush.bf16.msra.mxu2 %v2420_v63  ;;  %v2368_v19 = vor.u32 %v2636_v15, %v2365_v17  ;;  %v2533_v62 = vld [vmem:[%s3084_s21 + $0x1e8] sm:$0xf0] }
 0x24e   : > { %v1272_v33 = vadd.f32 1.0, %v2753_v25  ;;  %2754 = vtanh.f32 %v1249_v20  ;;  %v1217_v34 = vmul.f32 %v1205_v21, %v3388_v7  ;;  %1760 = vmatpush.bf16.msra.mxu3 %v2508_v29  ;;  %v2664_v20 = vld [vmem:[%s3084_s21 + $0x174] sm:$0xf]  ;;  %v2477_v21 = vld [vmem:[%s3084_s21 + $0x178] sm:$0xf0]  ;;  %1781 = vmatpush.bf16.msrb.mxu0 %v2296_v6  ;;  %v2544_v54 = vor.u32 %v2680_v50, %v2541_v51 }
 0x24f   : > { %v1104_v39 = vpop.f32.mrf.mxu2  ;;  %2756 = vtanh.f32 %v1252_v31  ;;  %v1281_v61 = vmul.f32 0.5, %v1269_v38  ;;  %v2480_v5 = vor.u32 %v2664_v20, %v2477_v21  ;;  %v2483_v29 = vld [vmem:[%s3084_s21 + $0x180] sm:$0xf]  ;;  %v2634_v38 = vld [vmem:[%s3084_s21 + $0x84] sm:$0xf] }
 0x250   : > { %v1284_v43 = vmul.f32 0.5, %v1272_v33  ;;  %v1229_v44 = vmul.f32 0.044715, %v1217_v34  ;;  %v2357_v39 = vld [vmem:[%s3084_s21 + $0x88] sm:$0xf0] }
 0x251   : > { %v1122_v45 = vpop.f32.mrf.mxu3  ;;  %v1151_v49 = vpop.f32.mrf.mxu1  ;;  %v1293_v23 = vmul.f32 %v1281_v61, %v3330_v48  ;;  %1798 = vmatpush.bf16.msrb.mxu1 %v2368_v19  ;;  %1810 = vmatpush.bf16.msrb.mxu2 %v2480_v5  ;;  %v2484_v48 = vor.u32 %v2667_v30, %v2483_v29  ;;  %v2360_v42 = vor.u32 %v2634_v38, %v2357_v39  ;;  %v2678_v61 = vld [vmem:[%s3084_s21 + $0x1e4] sm:$0xf]  ;;  %v2676_v8 = vld [vmem:[%s3084_s21 + $0x1d4] sm:$0xf]  ;;  %v2517_v38 = vld [vmem:[%s3084_s21 + $0x1c8] sm:$0xf0] }
 0x252   : > { %v1133_v47 = vpop.f32.mrf.mxu0  ;;  %v1296_v55 = vmul.f32 %v1284_v43, %v3336_v53  ;;  %v1241_v57 = vadd.f32 %v1229_v44, %v3388_v7  ;;  %1761 = vmatpush.bf16.msra.mxu3 %v2500_v58  ;;  %v2662_v43 = vld [vmem:[%s3084_s21 + $0x164] sm:$0xf]  ;;  %v2469_v44 = vld [vmem:[%s3084_s21 + $0x168] sm:$0xf0]  ;;  %v2461_v58 = vld [vmem:[%s3084_s21 + $0x158] sm:$0xf0] }
 0x253   : > { %v1134_v56 = vadd.f32 %v1133_v47, %v3403_v35  ;;  %v2472_v46 = vor.u32 %v2662_v43, %v2469_v44  ;;  %v2658_v6 = vld [vmem:[%s3084_s21 + $0x144] sm:$0xf]  ;;  %v2656_v30 = vld [vmem:[%s3084_s21 + $0x134] sm:$0xf] }
 0x254   : > { %v2755_v53 = vpop.eup %2754  ;;  %v3424_v3 = vpack.c.bf16 %v1296_v55, %v1292_v16  ;;  %v1253_v4 = vmul.f32 0.7978846, %v1241_v57  ;;  %v2660_v57 = vld [vmem:[%s3084_s21 + $0x154] sm:$0xf]  ;;  %v2456_v17 = vor.u32 %v2658_v6, %v2453_v28  ;;  %v2654_v44 = vld [vmem:[%s3084_s21 + $0x124] sm:$0xf] }
 0x255   : > { %v3422_v2 = vadd.f32 %v1151_v49, %v1134_v56  ;;  %v2757_v9 = vpop.eup %2756  ;;  %v1273_v10 = vadd.f32 1.0, %v2755_v53  ;;  %1811 = vmatpush.bf16.msrb.mxu2 %v2472_v46  ;;  %1799 = vmatpush.bf16.msrb.mxu1 %v2360_v42  ;;  %v2464_v60 = vor.u32 %v2660_v57, %v2461_v58  ;;  %v2437_v46 = vld [vmem:[%s3084_s21 + $0x128] sm:$0xf0]  ;;  %v2672_v58 = vld [vmem:[%s3084_s21 + $0x1b4] sm:$0xf] }
 0x256   : > { %1710 = vmatmul.bf16.vlgmr.msra.gmra.mxu0 %v3424_v3  ;;  %2758 = vtanh.f32 %v1253_v4  ;;  %v1276_v31 = vadd.f32 1.0, %v2757_v9  ;;  %1762 = vmatpush.bf16.msra.mxu3 %v2492_v14  ;;  %v2536_v4 = vor.u32 %v2678_v61, %v2533_v62  ;;  %v2440_v50 = vor.u32 %v2654_v44, %v2437_v46  ;;  %v2429_v6 = vld [vmem:[%s3084_s21 + $0x118] sm:$0xf0]  ;;  %v2670_v28 = vld [vmem:[%s3084_s21 + $0x1a4] sm:$0xf] }
 0x257   : > { %v1198_v18 = vmul.f32 %v3422_v2, %v3422_v2  ;;  %v1285_v22 = vmul.f32 0.5, %v1273_v10  ;;  %v1169_v25 = vpop.f32.mrf.mxu2 }
 0x258   : > { %v1170_v34 = vadd.f32 %v1169_v25, %v3429_v13  ;;  %v1288_v49 = vmul.f32 0.5, %v1276_v31 }
 0x259   : > { %v1210_v24 = vmul.f32 %v1198_v18, %v3422_v2  ;;  %v1187_v27 = vpop.f32.mrf.mxu3  ;;  %v1297_v33 = vmul.f32 %v1285_v22, %v3360_v32  ;;  %v1153_v37 = vpop.f32.mrf.mxu1  ;;  %1812 = vmatpush.bf16.msrb.mxu2 %v2464_v60  ;;  %v2525_v18 = vld [vmem:[%s3084_s21 + $0x1d8] sm:$0xf0] }
 0x25a   : > { %v1135_v36 = vpop.f32.mrf.mxu0  ;;  %v3449_v45 = vadd.f32 %v1187_v27, %v1170_v34  ;;  %1763 = vmatpush.bf16.msra.mxu3 %v2484_v48  ;;  %v1300_v53 = vmul.f32 %v1288_v49, %v3366_v12  ;;  %v2528_v5 = vor.u32 %v2676_v8, %v2525_v18  ;;  %v2674_v48 = vld [vmem:[%s3084_s21 + $0x1c4] sm:$0xf] }
 0x25b   : > { %v1222_v40 = vmul.f32 0.044715, %v1210_v24  ;;  %v1136_v41 = vadd.f32 %v1135_v36, %v3403_v35  ;;  %v3451_v32 = vpack.c.bf16 %v1297_v33, %v1293_v23  ;;  %v2445_v33 = vld [vmem:[%s3084_s21 + $0x138] sm:$0xf0]  ;;  %v2520_v43 = vor.u32 %v2674_v48, %v2517_v38  ;;  %v2485_v38 = vld [vmem:[%s3084_s21 + $0x188] sm:$0xf0] }
 0x25c   : > { %v2759_v11 = vpop.eup %2758  ;;  %v1199_v52 = vmul.f32 %v3449_v45, %v3449_v45  ;;  %v3482_v25 = vpack.c.bf16 %v1300_v53, %v1300_v53 }
 0x25d   : > { %v1234_v16 = vadd.f32 %v1222_v40, %v3422_v2  ;;  %v3454_v47 = vadd.f32 %v1153_v37, %v1136_v41  ;;  %1728 = vmatmul.bf16.vlgmr.msra.gmra.mxu1 %v3451_v32  ;;  %v1277_v26 = vadd.f32 1.0, %v2759_v11  ;;  %1813 = vmatpush.bf16.msrb.mxu2 %v2456_v17  ;;  %v2448_v37 = vor.u32 %v2656_v30, %v2445_v33 }
 0x25e   : > { %v1211_v59 = vmul.f32 %v1199_v52, %v3449_v45  ;;  %1828 = vmatpush.bf16.msrb.mxu3 %v2544_v54 }
 0x25f   : > { %v1246_v55 = vmul.f32 0.7978846, %v1234_v16  ;;  %v1202_v56 = vmul.f32 %v3454_v47, %v3454_v47  ;;  %v1171_v0 = vpop.f32.mrf.mxu2  ;;  %v1289_v22 = vmul.f32 0.5, %v1277_v26 }
 0x260   : > { %v1223_v9 = vmul.f32 0.044715, %v1211_v59  ;;  %v1172_v10 = vadd.f32 %v1171_v0, %v3429_v13  ;;  %v2509_v59 = vld [vmem:[%s3084_s21 + $0x1b8] sm:$0xf0] }
 0x261   : > { %v1214_v63 = vmul.f32 %v1202_v56, %v3454_v47  ;;  %v1189_v1 = vpop.f32.mrf.mxu3  ;;  %v1156_v15 = vpop.f32.mrf.mxu1  ;;  %2760 = vtanh.f32 %v1246_v55  ;;  %v1301_v36 = vmul.f32 %v1289_v22, %v3388_v7  ;;  %1814 = vmatpush.bf16.msrb.mxu2 %v2448_v37  ;;  %v2512_v60 = vor.u32 %v2672_v58, %v2509_v59 }
 0x262   : > { %v1138_v14 = vpop.f32.mrf.mxu0  ;;  %v1235_v12 = vadd.f32 %v1223_v9, %v3449_v45  ;;  %v3477_v21 = vadd.f32 %v1189_v1, %v1172_v10  ;;  %1829 = vmatpush.bf16.msrb.mxu3 %v2536_v4 }
 0x263   : > { %v1226_v19 = vmul.f32 0.044715, %v1214_v63  ;;  %v1139_v20 = vadd.f32 %v1138_v14, %v3403_v35  ;;  %v3502_v56 = vpack.c.bf16 %v1301_v36, %v1301_v36  ;;  %v2652_v63 = vld [vmem:[%s3084_s21 + $0x114] sm:$0xf]  ;;  %v2501_v14 = vld [vmem:[%s3084_s21 + $0x1a8] sm:$0xf0] }
 0x264   : > { %v1247_v27 = vmul.f32 0.7978846, %v1235_v12  ;;  %v1203_v35 = vmul.f32 %v3477_v21, %v3477_v21  ;;  %v2432_v10 = vor.u32 %v2652_v63, %v2429_v6  ;;  %v1306_v6 = vld [vmem:[#allocation3 + $0x8] sm:$0xff] }
 0x265   : > { %v1238_v23 = vadd.f32 %v1226_v19, %v3454_v47  ;;  %v3480_v24 = vadd.f32 %v1156_v15, %v1139_v20  ;;  %1815 = vmatpush.bf16.msrb.mxu2 %v2440_v50  ;;  %v2650_v15 = vld [vmem:[%s3084_s21 + $0x104] sm:$0xf]  ;;  %v2504_v19 = vor.u32 %v2670_v28, %v2501_v14  ;;  %v2421_v20 = vld [vmem:[%s3084_s21 + $0x108] sm:$0xf0] }
 0x266   : > { %1715 = vmatmul.bf16.gmra.mxu0 %v3482_v25  ;;  %v1215_v34 = vmul.f32 %v1203_v35, %v3477_v21  ;;  %1830 = vmatpush.bf16.msrb.mxu3 %v2528_v5  ;;  %v2424_v22 = vor.u32 %v2650_v15, %v2421_v20  ;;  %v2668_v5 = vld [vmem:[%s3084_s21 + $0x194] sm:$0xf] }
 0x267   : > { %v1250_v31 = vmul.f32 0.7978846, %v1238_v23  ;;  %v1206_v29 = vmul.f32 %v3480_v24, %v3480_v24  ;;  %v2761_v39 = vpop.eup %2760  ;;  %v1174_v41 = vpop.f32.mrf.mxu2  ;;  %v2493_v23 = vld [vmem:[%s3084_s21 + $0x198] sm:$0xf0] }
 0x268   : > { %v1227_v11 = vmul.f32 0.044715, %v1215_v34  ;;  %v1175_v16 = vadd.f32 %v1174_v41, %v3429_v13  ;;  %v1270_v52 = vadd.f32 1.0, %v2761_v39 }
 0x269   : > { %2762 = vtanh.f32 %v1250_v31  ;;  %v1218_v40 = vmul.f32 %v1206_v29, %v3480_v24  ;;  %v1192_v42 = vpop.f32.mrf.mxu3  ;;  %v1158_v49 = vpop.f32.mrf.mxu1  ;;  %1816 = vmatpush.bf16.msrb.mxu2 %v2432_v10  ;;  %v2496_v29 = vor.u32 %v2668_v5, %v2493_v23 }
 0x26a   : > { %2764 = vtanh.f32 %v1247_v27  ;;  %v1140_v7 = vpop.f32.mrf.mxu0  ;;  %v1239_v54 = vadd.f32 %v1227_v11, %v3477_v21  ;;  %v3500_v55 = vadd.f32 %v1192_v42, %v1175_v16  ;;  %1831 = vmatpush.bf16.msrb.mxu3 %v2520_v43  ;;  %v1282_v1 = vmul.f32 0.5, %v1270_v52 }
 0x26b   : > { %v1230_v51 = vmul.f32 0.044715, %v1218_v40 }
 0x26c   : > { %v1251_v13 = vmul.f32 0.7978846, %v1239_v54  ;;  %v1207_v26 = vmul.f32 %v3500_v55, %v3500_v55  ;;  %v1294_v27 = vmul.f32 %v1282_v1, %v3422_v2  ;;  %v2666_v2 = vld [vmem:[%s3084_s21 + $0x184] sm:$0xf] }
 0x26d   : > { %v1242_v57 = vadd.f32 %v1230_v51, %v3480_v24  ;;  %1733 = vmatmul.bf16.gmra.mxu1 %v3502_v56  ;;  %1817 = vmatpush.bf16.msrb.mxu2 %v2424_v22  ;;  %v2488_v39 = vor.u32 %v2666_v2, %v2485_v38  ;;  %v1307_v38 = vld [vmem:[#allocation3] sm:$0xff] }
 0x26e   : > { %2766 = vtanh.f32 %v1251_v13  ;;  %v1219_v4 = vmul.f32 %v1207_v26, %v3500_v55  ;;  %1832 = vmatpush.bf16.msrb.mxu3 %v2512_v60 }
 0x26f   : > { %v2763_v61 = vpop.eup %2762  ;;  %v1254_v62 = vmul.f32 0.7978846, %v1242_v57  ;;  %v1176_v8 = vpop.f32.mrf.mxu2 }
 0x270   : > { %v2765_v0 = vpop.eup %2764  ;;  %v1274_v53 = vadd.f32 1.0, %v2763_v61  ;;  %v1231_v18 = vmul.f32 0.044715, %v1219_v4 }
 0x271   : > { %v1194_v9 = vpop.f32.mrf.mxu3  ;;  %2768 = vtanh.f32 %v1254_v62  ;;  %v1271_v12 = vadd.f32 1.0, %v2765_v0 }
 0x272   : > { %v1286_v17 = vmul.f32 0.5, %v1274_v53  ;;  %v1243_v31 = vadd.f32 %v1231_v18, %v3500_v55  ;;  %1833 = vmatpush.bf16.msrb.mxu3 %v2504_v19  ;;  %v1308_v19 = vld [vmem:[#allocation3 + $0x18] sm:$0xff] }
 0x273   : > { %v1283_v37 = vmul.f32 0.5, %v1271_v12 }
 0x274   : > { %v1298_v35 = vmul.f32 %v1286_v17, %v3454_v47  ;;  %v2767_v30 = vpop.eup %2766  ;;  %v1255_v34 = vmul.f32 0.7978846, %v1243_v31 }
 0x275   : > { %v1275_v48 = vadd.f32 1.0, %v2767_v30  ;;  %v1295_v41 = vmul.f32 %v1283_v37, %v3449_v45  ;;  %v1305_v30 = vld [vmem:[#allocation3 + $0x10] sm:$0xff] }
 0x276   : > { %v1312_v33 = vpack.c.bf16 %v1298_v35, %v1294_v27  ;;  %1782 = vmatmul.bf16.vlgmr.msrb.gmra.mxu0 %v3424_v3  ;;  %2770 = vtanh.f32 %v1255_v34  ;;  %1834 = vmatpush.bf16.msrb.mxu3 %v2496_v29 }
 0x277   : > { %v2769_v36 = vpop.eup %2768  ;;  %v1287_v47 = vmul.f32 0.5, %v1275_v48 }
 0x278   : > { %1746 = vmatmul.bf16.vlgmr.msra.gmra.mxu2 %v1312_v33  ;;  %v1278_v40 = vadd.f32 1.0, %v2769_v36 }
 0x279   : > { %v1299_v42 = vmul.f32 %v1287_v47, %v3477_v21 }
 0x27a   : > { %1835 = vmatpush.bf16.msrb.mxu3 %v2488_v39  ;;  %v1290_v46 = vmul.f32 0.5, %v1278_v40 }
 0x27b   : > { %v1313_v43 = vpack.c.bf16 %v1299_v42, %v1295_v41 }
 0x27c   : > { %v2771_v44 = vpop.eup %2770  ;;  %v1302_v11 = vmul.f32 %v1290_v46, %v3480_v24 }
 0x27d   : > { %1800 = vmatmul.bf16.vlgmr.msrb.gmra.mxu1 %v3451_v32  ;;  %1764 = vmatmul.bf16.vlgmr.msra.gmra.mxu3 %v1313_v43  ;;  %v1279_v3 = vadd.f32 1.0, %v2771_v44  ;;  %v1309_v44 = vld [vmem:[#allocation3 + $0x20] sm:$0xff] }
 0x27e   : > { %v1316_v7 = vpack.c.bf16 %v1302_v11, %v1302_v11 }
 0x27f   : > { %v1291_v16 = vmul.f32 0.5, %v1279_v3 }
 0x281   : > { %v1303_v49 = vmul.f32 %v1291_v16, %v3500_v55 }
 0x283   : > { %v1317_v45 = vpack.c.bf16 %v1303_v49, %v1303_v49 }
 0x286   : > { %1787 = vmatmul.bf16.gmra.mxu0 %v3482_v25 }
 0x288   : > { %1751 = vmatmul.bf16.gmra.mxu2 %v1316_v7 }
 0x28d   : > { %1805 = vmatmul.bf16.gmra.mxu1 %v3502_v56  ;;  %1769 = vmatmul.bf16.gmra.mxu3 %v1317_v45  ;;  %v1304_v56 = vld [vmem:[#allocation3 + $0x28] sm:$0xff] }
 0x298   : > { %1818 = vmatmul.bf16.vlgmr.msrb.gmra.mxu2 %v1312_v33 }
 0x29d   : > { %1836 = vmatmul.bf16.vlgmr.msrb.gmra.mxu3 %v1313_v43 }
 0x2a8   : > { %1823 = vmatmul.bf16.gmra.mxu2 %v1316_v7 }
 0x2ad   : > { %1841 = vmatmul.bf16.gmra.mxu3 %v1317_v45 }
 0x2d3   : > { %v1711_v32 = vpop.f32.mrf.mxu0 }
 0x2da   : > { %v1729_v21 = vpop.f32.mrf.mxu1 }
 0x2db   : > { %v1713_v50 = vpop.f32.mrf.mxu0  ;;  %v1730_v13 = vadd.f32 %v1729_v21, %v1711_v32 }
 0x2e2   : > { %v1731_v51 = vpop.f32.mrf.mxu1 }
 0x2e3   : > { %v1716_v24 = vpop.f32.mrf.mxu0  ;;  %v1732_v53 = vadd.f32 %v1731_v51, %v1713_v50 }
 0x2ea   : > { %v1734_v52 = vpop.f32.mrf.mxu1 }
 0x2eb   : > { %v1718_v54 = vpop.f32.mrf.mxu0  ;;  %v1735_v17 = vadd.f32 %v1734_v52, %v1716_v24 }
 0x2f2   : > { %v1736_v57 = vpop.f32.mrf.mxu1 }
 0x2f3   : > { %v1783_v25 = vpop.f32.mrf.mxu0 }
 0x2fa   : > { %v1801_v59 = vpop.f32.mrf.mxu1 }
 0x2fb   : > { %v1747_v58 = vpop.f32.mrf.mxu2  ;;  %v1785_v55 = vpop.f32.mrf.mxu0  ;;  %v1802_v31 = vadd.f32 %v1801_v59, %v1783_v25 }
 0x2fc   : > { %v1748_v26 = vadd.f32 %v1747_v58, %v1730_v13 }
 0x300   : > { %v1765_v60 = vpop.f32.mrf.mxu3 }
 0x301   : > { %v1766_v61 = vadd.f32 %v1765_v60, %v1748_v26 }
 0x302   : > { %v1803_v63 = vpop.f32.mrf.mxu1 }
 0x303   : > { %v1749_v62 = vpop.f32.mrf.mxu2  ;;  %v1788_v0 = vpop.f32.mrf.mxu0  ;;  %v1846_v1 = vadd.f32 %v1766_v61, %v1304_v56  ;;  %v1804_v48 = vadd.f32 %v1803_v63, %v1785_v55 }
 0x304   : > { %v1750_v4 = vadd.f32 %v1749_v62, %v1732_v53 }
 0x305   : > { %1852 = vst [vmem:[#allocation3 + $0x28] sm:$0xff] %v1846_v1 }
 0x308   : > { %v1767_v28 = vpop.f32.mrf.mxu3 }
 0x309   : > { %v1768_v8 = vadd.f32 %v1767_v28, %v1750_v4 }
 0x30a   : > { %v1806_v10 = vpop.f32.mrf.mxu1 }
 0x30b   : > { %v1752_v9 = vpop.f32.mrf.mxu2  ;;  %v1790_v14 = vpop.f32.mrf.mxu0  ;;  %v1848_v15 = vadd.f32 %v1768_v8, %v1306_v6  ;;  %v1807_v42 = vadd.f32 %v1806_v10, %v1788_v0 }
 0x30c   : > { %v1753_v18 = vadd.f32 %v1752_v9, %v1735_v17 }
 0x30d   : > { %1854 = vst [vmem:[#allocation3 + $0x8] sm:$0xff] %v1848_v15 }
 0x310   : > { %v1770_v20 = vpop.f32.mrf.mxu3 }
 0x311   : > { %v1771_v12 = vadd.f32 %v1770_v20, %v1753_v18 }
 0x312   : > { %v1808_v5 = vpop.f32.mrf.mxu1 }
 0x313   : > { %v1754_v22 = vpop.f32.mrf.mxu2  ;;  %v1850_v23 = vadd.f32 %v1771_v12, %v1308_v19 }
 0x315   : > { %1856 = vst [vmem:[#allocation3 + $0x18] sm:$0xff] %v1850_v23 }
 0x318   : > { %v1772_v27 = vpop.f32.mrf.mxu3 }
 0x31b   : > { %v1819_v35 = vpop.f32.mrf.mxu2 }
 0x31c   : > { %v1820_v29 = vadd.f32 %v1819_v35, %v1802_v31 }
 0x320   : > { %v1837_v33 = vpop.f32.mrf.mxu3 }
 0x321   : > { %v1838_v34 = vadd.f32 %v1837_v33, %v1820_v29 }
 0x323   : > { %v1821_v36 = vpop.f32.mrf.mxu2  ;;  %v1847_v37 = vadd.f32 %v1838_v34, %v1305_v30 }
 0x324   : > { %v1822_v2 = vadd.f32 %v1821_v36, %v1804_v48 }
 0x325   : > { %1853 = vst [vmem:[#allocation3 + $0x10] sm:$0xff] %v1847_v37 }
 0x328   : > { %v1839_v47 = vpop.f32.mrf.mxu3 }
 0x329   : > { %v1840_v39 = vadd.f32 %v1839_v47, %v1822_v2 }
 0x32b   : > { %v1824_v40 = vpop.f32.mrf.mxu2  ;;  %v1849_v41 = vadd.f32 %v1840_v39, %v1307_v38 }
 0x32c   : > { %v1825_v43 = vadd.f32 %v1824_v40, %v1807_v42 }
 0x32d   : > { %1855 = vst [vmem:[#allocation3] sm:$0xff] %v1849_v41 }
 0x330   : > { %v1842_v46 = vpop.f32.mrf.mxu3 }
 0x331   : > { %v1843_v3 = vadd.f32 %v1842_v46, %v1825_v43 }
 0x333   : > { %v1826_v11 = vpop.f32.mrf.mxu2  ;;  %v1851_v16 = vadd.f32 %v1843_v3, %v1309_v44 }
 0x334   : > { %1861 = sbr.rel (%p2545_p0) target bundleno = 840 (0x348), region = 79 }
 0x335   : > { %1857 = vst [vmem:[#allocation3 + $0x20] sm:$0xff] %v1851_v16 }
 0x338   : > { %v1844_v7 = vpop.f32.mrf.mxu3 }
 0x339   : > { %v1862_v49 = vld [vmem:[#allocation3 + $0x28] sm:$0xff]  ;;  %v1882_v51 = vld [vmem:[%s3070_s15 + $0x10] sm:$0xff]  ;;  %v1863_v52 = vld [vmem:[#allocation3 + $0x10] sm:$0xff] }
 0x33a   : > { %v1864_v45 = vld [vmem:[#allocation3 + $0x8] sm:$0xff]  ;;  %v1865_v54 = vld [vmem:[#allocation3] sm:$0xff]  ;;  %v1881_v57 = vld [vmem:[%s3070_s15 + $0x8] sm:$0xff] }
 0x33b   : > { %v1868_v32 = vld [vmem:[%s3575_s6] sm:$0x3]  ;;  %v1883_v13 = vld [vmem:[%s3070_s15 + $0x18] sm:$0xff]  ;;  %v1866_v26 = vld [vmem:[#allocation3 + $0x18] sm:$0xff] }
 0x33c   : > { %v1870_v21 = vperm.slane %v1868_v32, 0  ;;  %v1880_v50 = vld [vmem:[%s3070_s15] sm:$0xff]  ;;  %v1871_v24 = vperm.slane %v1868_v32, 1  ;;  %v1867_v61 = vld [vmem:[#allocation3 + $0x20] sm:$0xff]  ;;  %v1885_v0 = vld [vmem:[%s3070_s15 + $0x28] sm:$0xff] }
 0x33d   : > { %v1884_v56 = vld [vmem:[%s3070_s15 + $0x20] sm:$0xff] }
 0x33e   : > { %v1874_v25 = vadd.f32 %v1870_v21, %v1862_v49  ;;  %v1876_v58 = vadd.f32 %v1870_v21, %v1864_v45  ;;  %v1875_v59 = vadd.f32 %v1871_v24, %v1863_v52  ;;  %v1877_v55 = vadd.f32 %v1871_v24, %v1865_v54 }
 0x33f   : > { %v1878_v60 = vadd.f32 %v1870_v21, %v1866_v26  ;;  %v1879_v4 = vadd.f32 %v1871_v24, %v1867_v61 }
 0x340   : > { %v1886_v62 = vadd.f32 %v1880_v50, %v1874_v25  ;;  %v1888_v63 = vadd.f32 %v1882_v51, %v1876_v58  ;;  %v1887_v1 = vadd.f32 %v1881_v57, %v1875_v59  ;;  %v1889_v53 = vadd.f32 %v1883_v13, %v1877_v55 }
 0x341   : > { %v1890_v6 = vadd.f32 %v1884_v56, %v1878_v60  ;;  %v1891_v28 = vadd.f32 %v1885_v0, %v1879_v4 }
 0x342   : > { %1892 = vst [vmem:[%s3079_s19] sm:$0xff] %v1886_v62 }
 0x343   : > { %1894 = vst [vmem:[%s3079_s19 + $0x10] sm:$0xff] %v1888_v63 }
 0x344   : > { %1893 = vst [vmem:[%s3079_s19 + $0x8] sm:$0xff] %v1887_v1 }
 0x345   : > { %1895 = vst [vmem:[%s3079_s19 + $0x18] sm:$0xff] %v1889_v53 }
 0x346   : > { %1896 = vst [vmem:[%s3079_s19 + $0x20] sm:$0xff] %v1890_v6 }
 0x347   : > { %1897 = vst [vmem:[%s3079_s19 + $0x28] sm:$0xff] %v1891_v28 }
 0x348 PF: > { %s17_s30 = sadd.s32 1, %s2826_s30   ;;  %s3582_s14 = sld [smem:[#allocation5_spill]] }
 0x349   : > { %p14_p1 = scmp.ge.s32.totalorder %s17_s30, 6   ;;  %s3583_s15 = sld [smem:[#allocation6_spill]] }
 0x34a   : > { %s3584_s24 = smov %s2806_s25  ;;  %s3585_s25 = smov %s2919_s12 }
 0x34b   : > { %s3586_s26 = smov %s2818_s28  ;;  %s3587_s27 = smov %s2822_s29 }
 0x34c   :  { %16 = sbr.rel (!%p14_p1) target bundleno = 6 (0x6), region = 123 }
 0x34e   : > { %s3588_s28 = smov %s3582_s14 }
 0x34f   : > { %s3589_s29 = smov %s3583_s15 }

// kernel: spec_vit_forward.9
= control target key start
LH: loop header
LB: loop body
LE: loop exit
PB: predicated region body
PF: predicated region fallthrough
CT: control target
= control target key end

     0   :  { %s3730_s17 = smov 0   ;;  %s5257_s0 = inlined_call_operand.vmem [shape: f32[48,256], index: 0, kind: input, shape index: {}, may-alias: {0,11}]   ;;  %s5258_s1 = inlined_call_operand.vmem [shape: f32[1,256], index: 1, kind: input, shape index: {}]   ;;  %s5259_s2 = inlined_call_operand.vmem [shape: f32[1,256], index: 2, kind: input, shape index: {}]   ;;  %s5260_s3 = inlined_call_operand.vmem [shape: bf16[256,256], index: 3, kind: input, shape index: {}]   ;;  %s5261_s4 = inlined_call_operand.vmem [shape: bf16[256,256], index: 4, kind: input, shape index: {}]   ;;  %s5262_s5 = inlined_call_operand.vmem [shape: bf16[256,256], index: 5, kind: input, shape index: {}]   ;;  %s5263_s6 = inlined_call_operand.vmem [shape: f32[1,256], index: 6, kind: input, shape index: {}]   ;;  %s5264_s7 = inlined_call_operand.vmem [shape: f32[1,256], index: 7, kind: input, shape index: {}]   ;;  %s5265_s8 = inlined_call_operand.vmem [shape: f32[1,256], index: 8, kind: input, shape index: {}]   ;;  %s5266_s9 = inlined_call_operand.vmem [shape: bf16[256,256], index: 9, kind: input, shape index: {}]   ;;  %s5267_s10 = inlined_call_operand.vmem [shape: f32[1,256], index: 10, kind: input, shape index: {}]   ;;  %s5268_s11 = inlined_call_operand.vmem [shape: f32[48,256], index: 11, kind: output, shape index: {}, may-alias: {0,11}]  }
   0x1 LB: > { %s2958_s18 = sadd.s32 4294967295, %s3665_s17   ;;  %p2962_p0 = scmp.ge.s32.totalorder %s3665_s17, 1  ;;  %s3665_s17 = sphi %s3730_s17, %s21_s17  }
   0x2   : > { %p339_p1 = scmp.lt.s32.totalorder %s3665_s17, 3 }
   0x4   : > { %p340_p2 = pnand %p2962_p0, %p339_p1 }
   0x5   : > { %s381_s19 = smul.u32 (!%p340_p2), 3, %s2958_s18 }
   0x6   : > { %343 = sbr.rel (%p340_p2) target bundleno = 1268 (0x4f4), region = 64 }
   0x7   : > { %p382_p3 = scmp.lt.s32.totalorder (!%p340_p2), %s381_s19, 5 }
   0xb   : > { %s5273_s19 = smov (!%p382_p3, %s381_s19), 5  ;;  %v3667_v9 = vmov 256.0   ;;  %v3025_v37 = vld [vmem:[%s5260_s3 + $0x70] sm:$0xf]  ;;  %v3502_v38 = vld [vmem:[%s5260_s3 + $0x74] sm:$0xf0] }
   0xc   : > { %s3485_s20 = sshll.u32 %s5273_s19, 4  ;;  %3626 = vrcp.f32 %v3667_v9  ;;  %v3089_v39 = vld [vmem:[%s5260_s3 + $0xf0] sm:$0xf]  ;;  %v3026_v40 = vor.u32 %v3502_v38, %v3025_v37  ;;  %v3518_v41 = vld [vmem:[%s5260_s3 + $0xf4] sm:$0xf0]  ;;  %vm815_vm10 = vcmask 1047556  }
   0xd   : > { %s3746_s23 = scalar_lea.vmem %s5257_s0, %s3485_s20  ;;  %v3501_v42 = vld [vmem:[%s5260_s3 + $0x74] sm:$0xf]  ;;  %v3027_v43 = vld [vmem:[%s5260_s3 + $0x78] sm:$0xf0]  ;;  %v3090_v44 = vor.u32 %v3518_v41, %v3089_v39  ;;  %v3017_v49 = vld [vmem:[%s5260_s3 + $0x60] sm:$0xf]  ;;  %s5240_s25 = scalar_lea.vmem %s5268_s11, %s3485_s20 }
   0xe   : > { %v396_v0 = vld [vmem:[%s3746_s23] sm:$0xff]  ;;  %v3750_v1 = vld [vmem:[%s3746_s23 + $0x8] sm:$0xff]  ;;  %v3762_v6 = vld [vmem:[%s3746_s23 + $0x10] sm:$0xff]  ;;  %v3030_v45 = vor.u32 %v3501_v42, %v3027_v43  ;;  %710 = vmatpush.bf16.msra.mxu0 %v3026_v40  ;;  %vm2280_vm11 = vcmask 1043456   ;;  %vm2187_vm13 = vcmask 195584  }
   0xf   : > { %v404_v2 = vadd.f32 %v3750_v1, %v396_v0  ;;  %v3754_v3 = vld [vmem:[%s3746_s23 + $0x20] sm:$0xff]  ;;  %v3757_v4 = vld [vmem:[%s3746_s23 + $0x28] sm:$0xff]  ;;  %v3765_v7 = vld [vmem:[%s3746_s23 + $0x18] sm:$0xff]  ;;  %728 = vmatpush.bf16.msra.mxu1 %v3090_v44 }
  0x10   : > { %v410_v5 = vadd.f32 %v3757_v4, %v3754_v3  ;;  %v407_v8 = vadd.f32 %v3765_v7, %v3762_v6  ;;  %v3517_v46 = vld [vmem:[%s5260_s3 + $0xf4] sm:$0xf]  ;;  %v3091_v47 = vld [vmem:[%s5260_s3 + $0xf8] sm:$0xf0]  ;;  %746 = vmatpush.bf16.msra.mxu2 %v3030_v45  ;;  %v3500_v50 = vld [vmem:[%s5260_s3 + $0x64] sm:$0xf0] }
  0x11   : > { %405 = vadd.xlane.f32.xlu0 %v404_v2  ;;  %v3094_v48 = vor.u32 %v3517_v46, %v3091_v47  ;;  %v3081_v51 = vld [vmem:[%s5260_s3 + $0xe0] sm:$0xf]  ;;  %v3018_v52 = vor.u32 %v3500_v50, %v3017_v49  ;;  %v3516_v53 = vld [vmem:[%s5260_s3 + $0xe4] sm:$0xf0]  ;;  %v3499_v54 = vld [vmem:[%s5260_s3 + $0x64] sm:$0xf] }
  0x12   : > { %411 = vadd.xlane.f32.xlu1 %v410_v5  ;;  %v3627_v10 = vpop.eup %3626  ;;  %v3019_v55 = vld [vmem:[%s5260_s3 + $0x68] sm:$0xf0]  ;;  %v3082_v56 = vor.u32 %v3516_v53, %v3081_v51  ;;  %v3515_v58 = vld [vmem:[%s5260_s3 + $0xe4] sm:$0xf]  ;;  %v3009_v61 = vld [vmem:[%s5260_s3 + $0x50] sm:$0xf] }
  0x13   : > { %v414_v11 = vmul.f32 256.0, %v3627_v10  ;;  %vm418_vm0 = vweird.f32 %v3627_v10  ;;  %764 = vmatpush.bf16.msra.mxu3 %v3094_v48  ;;  %v3022_v57 = vor.u32 %v3499_v54, %v3019_v55  ;;  %v3083_v59 = vld [vmem:[%s5260_s3 + $0xe8] sm:$0xf0]  ;;  %711 = vmatpush.bf16.msra.mxu0 %v3018_v52  ;;  %v3498_v62 = vld [vmem:[%s5260_s3 + $0x54] sm:$0xf0] }
  0x14   : > { %v3086_v60 = vor.u32 %v3515_v58, %v3083_v59  ;;  %729 = vmatpush.bf16.msra.mxu1 %v3082_v56  ;;  %v3073_v63 = vld [vmem:[%s5260_s3 + $0xd0] sm:$0xf]  ;;  %v3514_v2 = vld [vmem:[%s5260_s3 + $0xd4] sm:$0xf0]  ;;  %v3497_v5 = vld [vmem:[%s5260_s3 + $0x54] sm:$0xf] }
  0x15   : > { %v415_v12 = vsub.f32 1.0, %v414_v11  ;;  %747 = vmatpush.bf16.msra.mxu2 %v3022_v57  ;;  %v3074_v9 = vor.u32 %v3514_v2, %v3073_v63  ;;  %v3513_v11 = vld [vmem:[%s5260_s3 + $0xd4] sm:$0xf]  ;;  %v3510_v37 = vld [vmem:[%s5260_s3 + $0xb4] sm:$0xf0] }
  0x16   : > { %v3493_v38 = vld [vmem:[%s5260_s3 + $0x34] sm:$0xf]  ;;  %v2995_v39 = vld [vmem:[%s5260_s3 + $0x38] sm:$0xf0]  ;;  %v2985_v45 = vld [vmem:[%s5260_s3 + $0x20] sm:$0xf] }
  0x17   : > { %v416_v13 = vmul.f32 %v3627_v10, %v415_v12  ;;  %765 = vmatpush.bf16.msra.mxu3 %v3086_v60  ;;  %v3075_v12 = vld [vmem:[%s5260_s3 + $0xd8] sm:$0xf0]  ;;  %v2998_v41 = vor.u32 %v3493_v38, %v2995_v39  ;;  %v3509_v42 = vld [vmem:[%s5260_s3 + $0xb4] sm:$0xf]  ;;  %v3492_v46 = vld [vmem:[%s5260_s3 + $0x24] sm:$0xf0] }
  0x18   : > { %730 = vmatpush.bf16.msra.mxu1 %v3074_v9  ;;  %v3059_v43 = vld [vmem:[%s5260_s3 + $0xb8] sm:$0xf0]  ;;  %v3049_v47 = vld [vmem:[%s5260_s3 + $0xa0] sm:$0xf]  ;;  %v2986_v48 = vor.u32 %v3492_v46, %v2985_v45  ;;  %v3508_v49 = vld [vmem:[%s5260_s3 + $0xa4] sm:$0xf0] }
  0x19   : > { %408 = vadd.xlane.f32.xlu0 %v407_v8  ;;  %v417_v14 = vadd.f32 %v3627_v10, %v416_v13  ;;  %v3011_v8 = vld [vmem:[%s5260_s3 + $0x58] sm:$0xf0]  ;;  %v3078_v13 = vor.u32 %v3513_v11, %v3075_v12  ;;  %v3062_v44 = vor.u32 %v3509_v42, %v3059_v43  ;;  %v3491_v50 = vld [vmem:[%s5260_s3 + $0x24] sm:$0xf]  ;;  %v2987_v51 = vld [vmem:[%s5260_s3 + $0x28] sm:$0xf0]  ;;  %v3050_v52 = vor.u32 %v3508_v49, %v3049_v47 }
  0x1a   : > { %v2990_v53 = vor.u32 %v3491_v50, %v2987_v51  ;;  %v3507_v54 = vld [vmem:[%s5260_s3 + $0xa4] sm:$0xf]  ;;  %v3051_v55 = vld [vmem:[%s5260_s3 + $0xa8] sm:$0xf0]  ;;  %v2977_v57 = vld [vmem:[%s5260_s3 + $0x10] sm:$0xf] }
  0x1b   : > { %v3769_v15 = vsel %vm418_vm0, %v3627_v10, %v417_v14  ;;  %v3014_v10 = vor.u32 %v3497_v5, %v3011_v8  ;;  %v3001_v14 = vld [vmem:[%s5260_s3 + $0x40] sm:$0xf]  ;;  %766 = vmatpush.bf16.msra.mxu3 %v3078_v13  ;;  %v3054_v56 = vor.u32 %v3507_v54, %v3051_v55  ;;  %v3490_v58 = vld [vmem:[%s5260_s3 + $0x14] sm:$0xf0]  ;;  %v3041_v59 = vld [vmem:[%s5260_s3 + $0x90] sm:$0xf] }
  0x1c   : > { %v2978_v60 = vor.u32 %v3490_v58, %v2977_v57  ;;  %v2979_v63 = vld [vmem:[%s5260_s3 + $0x18] sm:$0xf0]  ;;  %v3505_v5 = vld [vmem:[%s5260_s3 + $0x94] sm:$0xf]  ;;  %v2969_v12 = vld [vmem:[%s5260_s3] sm:$0xf] }
  0x1d   : > { %748 = vmatpush.bf16.msra.mxu2 %v3014_v10  ;;  %v3043_v8 = vld [vmem:[%s5260_s3 + $0x98] sm:$0xf0]  ;;  %v3488_v13 = vld [vmem:[%s5260_s3 + $0x4] sm:$0xf0]  ;;  %v3549_v42 = vld [vmem:[%s5261_s4 + $0xf4] sm:$0xf] }
  0x1e   : > { %v3046_v10 = vor.u32 %v3505_v5, %v3043_v8  ;;  %v3155_v38 = vld [vmem:[%s5261_s4 + $0x78] sm:$0xf0]  ;;  %v3145_v46 = vld [vmem:[%s5261_s4 + $0x60] sm:$0xf]  ;;  %v3532_v47 = vld [vmem:[%s5261_s4 + $0x64] sm:$0xf0] }
  0x1f   : > { %v3219_v43 = vld [vmem:[%s5261_s4 + $0xf8] sm:$0xf0]  ;;  %v3146_v51 = vor.u32 %v3532_v47, %v3145_v46  ;;  %v3547_v57 = vld [vmem:[%s5261_s4 + $0xe4] sm:$0xf]  ;;  %v3211_v58 = vld [vmem:[%s5261_s4 + $0xe8] sm:$0xf0] }
  0x20   : > { %v3222_v45 = vor.u32 %v3549_v42, %v3219_v43  ;;  %v3546_v5 = vld [vmem:[%s5261_s4 + $0xd4] sm:$0xf0]  ;;  %v3529_v8 = vld [vmem:[%s5261_s4 + $0x54] sm:$0xf]  ;;  %v403_v43 = vld [vmem:[%s5259_s2] sm:$0x3] }
  0x21   : > { %v3121_v47 = vld [vmem:[%s5261_s4 + $0x30] sm:$0xf] }
  0x84   : > { %v406_v16 = vpop.xlane.xlu0 %405 }
  0x85   : > { %v420_v17 = vmul.f32 %v3769_v15, %v406_v16  ;;  %v412_v22 = vpop.xlane.xlu1 %411  ;;  %v3496_v16 = vld [vmem:[%s5260_s3 + $0x44] sm:$0xf0] }
  0x86   : > { %v422_v26 = vmul.f32 %v3769_v15, %v412_v22  ;;  %v3495_v22 = vld [vmem:[%s5260_s3 + $0x44] sm:$0xf] }
  0x87   : > { %v3772_v18 = vsub.f32 %v396_v0, %v420_v17  ;;  %v3775_v19 = vsub.f32 %v3750_v1, %v420_v17  ;;  %v3010_v0 = vor.u32 %v3498_v62, %v3009_v61  ;;  %v3065_v17 = vld [vmem:[%s5260_s3 + $0xc0] sm:$0xf]  ;;  %v3506_v61 = vld [vmem:[%s5260_s3 + $0x94] sm:$0xf0]  ;;  %v3489_v62 = vld [vmem:[%s5260_s3 + $0x14] sm:$0xf] }
  0x88   : > { %v3790_v29 = vsub.f32 %v3754_v3, %v422_v26  ;;  %v3793_v30 = vsub.f32 %v3757_v4, %v422_v26  ;;  %v3511_v26 = vld [vmem:[%s5260_s3 + $0xc4] sm:$0xf]  ;;  %v2982_v2 = vor.u32 %v3489_v62, %v2979_v63  ;;  %v3530_v62 = vld [vmem:[%s5261_s4 + $0x54] sm:$0xf0] }
  0x89   : > { %v429_v20 = vmul.f32 %v3772_v18, %v3772_v18  ;;  %v430_v21 = vmul.f32 %v3775_v19, %v3775_v19  ;;  %712 = vmatpush.bf16.msra.mxu0 %v3010_v0  ;;  %v3042_v0 = vor.u32 %v3506_v61, %v3041_v59  ;;  %v3137_v61 = vld [vmem:[%s5261_s4 + $0x50] sm:$0xf] }
  0x8a   : > { %v433_v34 = vmul.f32 %v3790_v29, %v3790_v29  ;;  %v434_v35 = vmul.f32 %v3793_v30, %v3793_v30 }
  0x8b   : > { %v435_v23 = vadd.f32 %v430_v21, %v429_v20  ;;  %v3002_v20 = vor.u32 %v3496_v16, %v3001_v14  ;;  %v3512_v21 = vld [vmem:[%s5260_s3 + $0xc4] sm:$0xf0]  ;;  %v3033_v14 = vld [vmem:[%s5260_s3 + $0x80] sm:$0xf]  ;;  %v2970_v16 = vor.u32 %v3488_v13, %v2969_v12  ;;  %v3203_v12 = vld [vmem:[%s5261_s4 + $0xd8] sm:$0xf0] }
  0x8c   : > { %v409_v24 = vpop.xlane.xlu0 %408  ;;  %v441_v36 = vadd.f32 %v434_v35, %v433_v34  ;;  %v3494_v34 = vld [vmem:[%s5260_s3 + $0x34] sm:$0xf0]  ;;  %v3057_v35 = vld [vmem:[%s5260_s3 + $0xb0] sm:$0xf]  ;;  %v402_v13 = vld [vmem:[%s5258_s1] sm:$0x3] }
  0x8d   : > { %v421_v25 = vmul.f32 %v3769_v15, %v409_v24  ;;  %436 = vadd.xlane.f32.xlu1 %v435_v23  ;;  %v3003_v23 = vld [vmem:[%s5260_s3 + $0x48] sm:$0xf0]  ;;  %v3066_v24 = vor.u32 %v3512_v21, %v3065_v17  ;;  %713 = vmatpush.bf16.msra.mxu0 %v3002_v20  ;;  %v3058_v40 = vor.u32 %v3510_v37, %v3057_v35  ;;  %v3504_v17 = vld [vmem:[%s5260_s3 + $0x84] sm:$0xf0]  ;;  %v3487_v20 = vld [vmem:[%s5260_s3 + $0x4] sm:$0xf] }
  0x8e   : > { %v2971_v21 = vld [vmem:[%s5260_s3 + $0x8] sm:$0xf0]  ;;  %v3533_v37 = vld [vmem:[%s5261_s4 + $0x74] sm:$0xf] }
  0x8f   : > { %v3784_v27 = vsub.f32 %v3762_v6, %v421_v25  ;;  %v3787_v28 = vsub.f32 %v3765_v7, %v421_v25  ;;  %v3006_v25 = vor.u32 %v3495_v22, %v3003_v23  ;;  %731 = vmatpush.bf16.msra.mxu1 %v3066_v24  ;;  %v3034_v23 = vor.u32 %v3504_v17, %v3033_v14 }
  0x90   : > { %v2974_v24 = vor.u32 %v3487_v20, %v2971_v21  ;;  %v3129_v21 = vld [vmem:[%s5261_s4 + $0x40] sm:$0xf] }
  0x91   : > { %v431_v31 = vmul.f32 %v3784_v27, %v3784_v27  ;;  %v432_v32 = vmul.f32 %v3787_v28, %v3787_v28  ;;  %749 = vmatpush.bf16.msra.mxu2 %v3006_v25  ;;  %v3503_v25 = vld [vmem:[%s5260_s3 + $0x84] sm:$0xf] }
  0x93   : > { %v438_v33 = vadd.f32 %v432_v32, %v431_v31  ;;  %v3067_v31 = vld [vmem:[%s5260_s3 + $0xc8] sm:$0xf0]  ;;  %732 = vmatpush.bf16.msra.mxu1 %v3058_v40 }
  0x94   : > { %v3070_v32 = vor.u32 %v3511_v26, %v3067_v31  ;;  %v3035_v26 = vld [vmem:[%s5260_s3 + $0x88] sm:$0xf0] }
  0x95   : > { %439 = vadd.xlane.f32.xlu2 %v438_v33  ;;  %v2993_v33 = vld [vmem:[%s5260_s3 + $0x30] sm:$0xf]  ;;  %750 = vmatpush.bf16.msra.mxu2 %v2998_v41  ;;  %v3038_v31 = vor.u32 %v3503_v25, %v3035_v26  ;;  %v3158_v41 = vor.u32 %v3533_v37, %v3155_v38  ;;  %v3193_v26 = vld [vmem:[%s5261_s4 + $0xc0] sm:$0xf] }
  0x96   : > { %767 = vmatpush.bf16.msra.mxu3 %v3070_v32  ;;  %v3153_v32 = vld [vmem:[%s5261_s4 + $0x70] sm:$0xf] }
  0x97   : > { %733 = vmatpush.bf16.msra.mxu1 %v3050_v52  ;;  %v3548_v52 = vld [vmem:[%s5261_s4 + $0xe4] sm:$0xf0] }
  0x99   : > { %751 = vmatpush.bf16.msra.mxu2 %v2990_v53  ;;  %v3531_v53 = vld [vmem:[%s5261_s4 + $0x64] sm:$0xf] }
  0x9a   : > { %768 = vmatpush.bf16.msra.mxu3 %v3062_v44 }
  0x9b   : > { %734 = vmatpush.bf16.msra.mxu1 %v3042_v0  ;;  %v3138_v0 = vor.u32 %v3530_v62, %v3137_v61 }
  0x9d   : > { %442 = vadd.xlane.f32.xlu2 %v441_v36  ;;  %v2994_v36 = vor.u32 %v3494_v34, %v2993_v33  ;;  %752 = vmatpush.bf16.msra.mxu2 %v2982_v2  ;;  %v3534_v33 = vld [vmem:[%s5261_s4 + $0x74] sm:$0xf0]  ;;  %v3217_v34 = vld [vmem:[%s5261_s4 + $0xf0] sm:$0xf] }
  0x9e   : > { %769 = vmatpush.bf16.msra.mxu3 %v3054_v56  ;;  %v3154_v35 = vor.u32 %v3534_v33, %v3153_v32  ;;  %v3147_v56 = vld [vmem:[%s5261_s4 + $0x68] sm:$0xf0]  ;;  %v3201_v2 = vld [vmem:[%s5261_s4 + $0xd0] sm:$0xf]  ;;  %v3527_v32 = vld [vmem:[%s5261_s4 + $0x44] sm:$0xf] }
  0x9f   : > { %714 = vmatpush.bf16.msra.mxu0 %v2994_v36  ;;  %735 = vmatpush.bf16.msra.mxu1 %v3034_v23  ;;  %v3550_v36 = vld [vmem:[%s5261_s4 + $0xf4] sm:$0xf0]  ;;  %v3150_v59 = vor.u32 %v3531_v53, %v3147_v56  ;;  %v3528_v23 = vld [vmem:[%s5261_s4 + $0x44] sm:$0xf0]  ;;  %v3525_v53 = vld [vmem:[%s5261_s4 + $0x34] sm:$0xf] }
  0xa0   : > { %v3218_v40 = vor.u32 %v3550_v36, %v3217_v34  ;;  %v3130_v25 = vor.u32 %v3528_v23, %v3129_v21  ;;  %v3105_v21 = vld [vmem:[%s5261_s4 + $0x10] sm:$0xf]  ;;  %v3522_v23 = vld [vmem:[%s5261_s4 + $0x14] sm:$0xf0] }
  0xa1   : > { %753 = vmatpush.bf16.msra.mxu2 %v2974_v24 }
  0xa2   : > { %770 = vmatpush.bf16.msra.mxu3 %v3046_v10  ;;  %v3139_v10 = vld [vmem:[%s5261_s4 + $0x58] sm:$0xf0] }
  0xa3   : > { %715 = vmatpush.bf16.msra.mxu0 %v2986_v48  ;;  %1260 = vmatpush.bf16.msrb.mxu1 %v3218_v40  ;;  %v3209_v48 = vld [vmem:[%s5261_s4 + $0xe0] sm:$0xf]  ;;  %v3142_v17 = vor.u32 %v3529_v8, %v3139_v10  ;;  %v3523_v10 = vld [vmem:[%s5261_s4 + $0x24] sm:$0xf] }
  0xa4   : > { %v3210_v55 = vor.u32 %v3548_v52, %v3209_v48  ;;  %v3526_v48 = vld [vmem:[%s5261_s4 + $0x34] sm:$0xf0] }
  0xa5   : > { %1278 = vmatpush.bf16.msrb.mxu2 %v3158_v41  ;;  %v3122_v52 = vor.u32 %v3526_v48, %v3121_v47  ;;  %v3161_v47 = vld [vmem:[%s5261_s4 + $0x80] sm:$0xf] }
  0xa6   : > { %771 = vmatpush.bf16.msra.mxu3 %v3038_v31  ;;  %v3544_v31 = vld [vmem:[%s5261_s4 + $0xc4] sm:$0xf0] }
  0xa7   : > { %716 = vmatpush.bf16.msra.mxu0 %v2978_v60  ;;  %v3214_v60 = vor.u32 %v3547_v57, %v3211_v58  ;;  %1261 = vmatpush.bf16.msrb.mxu1 %v3210_v55  ;;  %v3194_v34 = vor.u32 %v3544_v31, %v3193_v26  ;;  %v4147_v55 = vperm.slane %v403_v43, 0  ;;  %v3106_v31 = vor.u32 %v3522_v23, %v3105_v21  ;;  %v3347_v21 = vld [vmem:[%s5262_s5 + $0xf8] sm:$0xf0]  ;;  %v3273_v23 = vld [vmem:[%s5262_s5 + $0x60] sm:$0xf] }
  0xa9   : > { %1279 = vmatpush.bf16.msrb.mxu2 %v3150_v59  ;;  %v3541_v59 = vld [vmem:[%s5261_s4 + $0xb4] sm:$0xf] }
  0xaa   : > { %1296 = vmatpush.bf16.msrb.mxu3 %v3222_v45  ;;  %v4122_v45 = vperm.slane %v402_v13, 1 }
  0xab   : > { %717 = vmatpush.bf16.msra.mxu0 %v2970_v16 }
  0xad   : > { %1280 = vmatpush.bf16.msrb.mxu2 %v3142_v17 }
  0xae   : > { %1297 = vmatpush.bf16.msrb.mxu3 %v3214_v60  ;;  %v3187_v60 = vld [vmem:[%s5261_s4 + $0xb8] sm:$0xf0] }
  0xaf   : > { %1242 = vmatpush.bf16.msrb.mxu0 %v3154_v35  ;;  %v3543_v35 = vld [vmem:[%s5261_s4 + $0xc4] sm:$0xf]  ;;  %v3190_v62 = vor.u32 %v3541_v59, %v3187_v60  ;;  %v3163_v60 = vld [vmem:[%s5261_s4 + $0x88] sm:$0xf0] }
  0xb0   : > { %v3535_v59 = vld [vmem:[%s5261_s4 + $0x84] sm:$0xf] }
  0xb3   : > { %1243 = vmatpush.bf16.msrb.mxu0 %v3146_v51  ;;  %v3185_v51 = vld [vmem:[%s5261_s4 + $0xb0] sm:$0xf] }
  0xb7   : > { %1244 = vmatpush.bf16.msrb.mxu0 %v3138_v0  ;;  %v3524_v0 = vld [vmem:[%s5261_s4 + $0x24] sm:$0xf0] }
  0xbb   : > { %1245 = vmatpush.bf16.msrb.mxu0 %v3130_v25  ;;  %v4197_v25 = vperm.slane %v403_v43, 1 }
  0xbf   : > { %1246 = vmatpush.bf16.msrb.mxu0 %v3122_v52 }
 0x100   : > { %v437_v9 = vpop.xlane.xlu1 %436 }
 0x101   : > { %v444_v11 = vmul.f32 %v437_v9, %v3769_v15  ;;  %v3202_v9 = vor.u32 %v3546_v5, %v3201_v2  ;;  %v3177_v2 = vld [vmem:[%s5261_s4 + $0xa0] sm:$0xf] }
 0x103   : > { %v3990_v22 = vadd.f32 1e-06, %v444_v11  ;;  %v3545_v11 = vld [vmem:[%s5261_s4 + $0xd4] sm:$0xf]  ;;  %1262 = vmatpush.bf16.msrb.mxu1 %v3202_v9  ;;  %v3540_v9 = vld [vmem:[%s5261_s4 + $0xa4] sm:$0xf0] }
 0x104   : > { %v3206_v20 = vor.u32 %v3545_v11, %v3203_v12  ;;  %v3178_v12 = vor.u32 %v3540_v9, %v3177_v2 }
 0x105   : > { %3628 = vrsqrt.f32 %v3990_v22  ;;  %vm456_vm2 = vweird.f32 %v3990_v22 }
 0x106   : > { %1298 = vmatpush.bf16.msrb.mxu3 %v3206_v20 }
 0x107   : > { %1263 = vmatpush.bf16.msrb.mxu1 %v3194_v34 }
 0x108   : > { %v440_v39 = vpop.xlane.xlu2 %439 }
 0x109   : > { %v445_v44 = vmul.f32 %v440_v39, %v3769_v15  ;;  %v3195_v39 = vld [vmem:[%s5261_s4 + $0xc8] sm:$0xf0] }
 0x10a   : > { %v3198_v42 = vor.u32 %v3543_v35, %v3195_v39  ;;  %v3107_v39 = vld [vmem:[%s5261_s4 + $0x18] sm:$0xf0] }
 0x10b   : > { %v4033_v49 = vpop.eup %3628  ;;  %v4035_v50 = vadd.f32 1e-06, %v445_v44  ;;  %v4120_v44 = vperm.slane %v402_v13, 0  ;;  %v3539_v13 = vld [vmem:[%s5261_s4 + $0xa4] sm:$0xf] }
 0x10c   : > { %v451_v54 = vmul.f32 %v4033_v49, %v3990_v22  ;;  %vm457_vm1 = vweird.f32 %v4033_v49  ;;  %1299 = vmatpush.bf16.msrb.mxu3 %v3198_v42 }
 0x10d   : > { %3630 = vrsqrt.f32 %v4035_v50  ;;  %vm458_vm3 = vmor %vm456_vm2, %vm457_vm1  ;;  %vm466_vm5 = vweird.f32 %v4035_v50 }
 0x10e   : > { %v452_v63 = vmul.f32 %v4033_v49, %v451_v54  ;;  %v3123_v54 = vld [vmem:[%s5261_s4 + $0x38] sm:$0xf0] }
 0x10f   : > { %v3126_v58 = vor.u32 %v3525_v53, %v3123_v54  ;;  %v3519_v53 = vld [vmem:[%s5261_s4 + $0x4] sm:$0xf]  ;;  %v3099_v54 = vld [vmem:[%s5261_s4 + $0x8] sm:$0xf0] }
 0x110   : > { %v453_v14 = vmul.f32 0.5, %v452_v63  ;;  %v443_v16 = vpop.xlane.xlu2 %442  ;;  %v3113_v63 = vld [vmem:[%s5261_s4 + $0x20] sm:$0xf]  ;;  %1300 = vmatpush.bf16.msrb.mxu3 %v3190_v62 }
 0x111   : > { %v446_v24 = vmul.f32 %v443_v16, %v3769_v15  ;;  %v3131_v15 = vld [vmem:[%s5261_s4 + $0x48] sm:$0xf0] }
 0x112   : > { %v454_v33 = vsub.f32 1.5, %v453_v14  ;;  %v3134_v38 = vor.u32 %v3527_v32, %v3131_v15  ;;  %v3179_v14 = vld [vmem:[%s5261_s4 + $0xa8] sm:$0xf0]  ;;  %v3538_v32 = vld [vmem:[%s5261_s4 + $0x94] sm:$0xf0] }
 0x113   : > { %v4106_v36 = vpop.eup %3630  ;;  %v4108_v37 = vadd.f32 1e-06, %v446_v24  ;;  %v3169_v24 = vld [vmem:[%s5261_s4 + $0x90] sm:$0xf]  ;;  %v3182_v26 = vor.u32 %v3539_v13, %v3179_v14  ;;  %v3565_v13 = vld [vmem:[%s5262_s5 + $0x74] sm:$0xf] }
 0x114   : > { %v455_v40 = vmul.f32 %v4033_v49, %v454_v33  ;;  %v461_v41 = vmul.f32 %v4106_v36, %v4035_v50  ;;  %1281 = vmatpush.bf16.msrb.mxu2 %v3134_v38  ;;  %vm467_vm4 = vweird.f32 %v4106_v36  ;;  %v3521_v33 = vld [vmem:[%s5261_s4 + $0x14] sm:$0xf]  ;;  %v3170_v38 = vor.u32 %v3538_v32, %v3169_v24  ;;  %v3283_v14 = vld [vmem:[%s5262_s5 + $0x78] sm:$0xf0]  ;;  %v3337_v32 = vld [vmem:[%s5262_s5 + $0xe0] sm:$0xf] }
 0x115   : > { %3632 = vrsqrt.f32 %v4108_v37  ;;  %vm468_vm6 = vmor %vm466_vm5, %vm467_vm4  ;;  %1301 = vmatpush.bf16.msrb.mxu3 %v3182_v26  ;;  %v3110_v43 = vor.u32 %v3521_v33, %v3107_v39  ;;  %vm476_vm7 = vweird.f32 %v4108_v37  ;;  %v3580_v33 = vld [vmem:[%s5262_s5 + $0xe4] sm:$0xf0]  ;;  %v3339_v39 = vld [vmem:[%s5262_s5 + $0xe8] sm:$0xf0] }
 0x116   : > { %v459_v22 = vsel %vm458_vm3, %v4033_v49, %v455_v40  ;;  %v462_v46 = vmul.f32 %v4106_v36, %v461_v41  ;;  %v3542_v49 = vld [vmem:[%s5261_s4 + $0xb4] sm:$0xf0]  ;;  %v3537_v40 = vld [vmem:[%s5261_s4 + $0x94] sm:$0xf]  ;;  %v3171_v41 = vld [vmem:[%s5261_s4 + $0x98] sm:$0xf0] }
 0x117   : > { %v3186_v57 = vor.u32 %v3542_v49, %v3185_v51  ;;  %v480_v61 = vmul.f32 %v459_v22, %v3772_v18  ;;  %v481_v5 = vmul.f32 %v459_v22, %v3775_v19  ;;  %v3114_v18 = vor.u32 %v3524_v0, %v3113_v63  ;;  %v3115_v19 = vld [vmem:[%s5261_s4 + $0x28] sm:$0xf0]  ;;  %v3097_v22 = vld [vmem:[%s5261_s4] sm:$0xf] }
 0x118   : > { %v463_v56 = vmul.f32 0.5, %v462_v46  ;;  %1282 = vmatpush.bf16.msrb.mxu2 %v3126_v58  ;;  %v3118_v20 = vor.u32 %v3523_v10, %v3115_v19  ;;  %v3520_v46 = vld [vmem:[%s5261_s4 + $0x4] sm:$0xf0]  ;;  %v3174_v51 = vor.u32 %v3537_v40, %v3171_v41  ;;  %v3281_v10 = vld [vmem:[%s5262_s5 + $0x70] sm:$0xf] }
 0x119   : > { %1264 = vmatpush.bf16.msrb.mxu1 %v3186_v57  ;;  %v491_v50 = vmul.f32 %v4120_v44, %v480_v61  ;;  %1247 = vmatpush.bf16.msrb.mxu0 %v3114_v18  ;;  %v492_v34 = vmul.f32 %v4122_v45, %v481_v5  ;;  %v3098_v49 = vor.u32 %v3520_v46, %v3097_v22  ;;  %v3345_v19 = vld [vmem:[%s5262_s5 + $0xf0] sm:$0xf]  ;;  %v3562_v41 = vld [vmem:[%s5262_s5 + $0x54] sm:$0xf0]  ;;  %v3561_v22 = vld [vmem:[%s5262_s5 + $0x54] sm:$0xf] }
 0x11a   : > { %v464_v8 = vsub.f32 1.5, %v463_v56  ;;  %1302 = vmatpush.bf16.msrb.mxu3 %v3174_v51  ;;  %v3166_v18 = vor.u32 %v3535_v59, %v3163_v60  ;;  %v3265_v40 = vld [vmem:[%s5262_s5 + $0x50] sm:$0xf]  ;;  %v3577_v51 = vld [vmem:[%s5262_s5 + $0xd4] sm:$0xf] }
 0x11b   : > { %v4173_v11 = vpop.eup %3632  ;;  %v502_v56 = vadd.f32 %v4147_v55, %v491_v50  ;;  %v503_v61 = vadd.f32 %v4197_v25, %v492_v34  ;;  %v3338_v34 = vor.u32 %v3580_v33, %v3337_v32  ;;  %v3559_v59 = vld [vmem:[%s5262_s5 + $0x44] sm:$0xf] }
 0x11c   : > { %v465_v16 = vmul.f32 %v4106_v36, %v464_v8  ;;  %v471_v17 = vmul.f32 %v4173_v11, %v4108_v37  ;;  %1283 = vmatpush.bf16.msrb.mxu2 %v3118_v20  ;;  %vm477_vm8 = vweird.f32 %v4173_v11  ;;  %v3102_v8 = vor.u32 %v3519_v53, %v3099_v54  ;;  %v3581_v20 = vld [vmem:[%s5262_s5 + $0xf4] sm:$0xf]  ;;  %v3560_v53 = vld [vmem:[%s5262_s5 + $0x44] sm:$0xf0]  ;;  %v3321_v54 = vld [vmem:[%s5262_s5 + $0xc0] sm:$0xf] }
 0x11d   : > { %1265 = vmatpush.bf16.msrb.mxu1 %v3178_v12  ;;  %1248 = vmatpush.bf16.msrb.mxu0 %v3106_v31  ;;  %vm478_vm9 = vmor %vm476_vm7, %vm477_vm8  ;;  %v3566_v12 = vld [vmem:[%s5262_s5 + $0x74] sm:$0xf0]  ;;  %v3350_v26 = vor.u32 %v3581_v20, %v3347_v21  ;;  %v3564_v31 = vld [vmem:[%s5262_s5 + $0x64] sm:$0xf0] }
 0x11e   : > { %v469_v15 = vsel %vm468_vm6, %v4106_v36, %v465_v16  ;;  %v472_v35 = vmul.f32 %v4173_v11, %v471_v17  ;;  %v3282_v37 = vor.u32 %v3566_v12, %v3281_v10  ;;  %v3286_v17 = vor.u32 %v3565_v13, %v3283_v14  ;;  %1303 = vmatpush.bf16.msrb.mxu3 %v3166_v18  ;;  %v3558_v10 = vld [vmem:[%s5262_s5 + $0x34] sm:$0xf0]  ;;  %v3313_v12 = vld [vmem:[%s5262_s5 + $0xb0] sm:$0xf]  ;;  %v3251_v13 = vld [vmem:[%s5262_s5 + $0x38] sm:$0xf0] }
 0x11f   : > { %v482_v42 = vmul.f32 %v469_v15, %v3784_v27  ;;  %v483_v36 = vmul.f32 %v469_v15, %v3787_v28  ;;  %v3536_v27 = vld [vmem:[%s5261_s4 + $0x84] sm:$0xf0]  ;;  %v3275_v15 = vld [vmem:[%s5262_s5 + $0x68] sm:$0xf0]  ;;  %v3241_v20 = vld [vmem:[%s5262_s5 + $0x20] sm:$0xf] }
 0x120   : > { %v473_v48 = vmul.f32 0.5, %v472_v35  ;;  %v3162_v58 = vor.u32 %v3536_v27, %v3161_v47  ;;  %1284 = vmatpush.bf16.msrb.mxu2 %v3110_v43  ;;  %v3579_v35 = vld [vmem:[%s5262_s5 + $0xe4] sm:$0xf]  ;;  %v3578_v43 = vld [vmem:[%s5262_s5 + $0xd4] sm:$0xf0] }
 0x121   : > { %v493_v28 = vmul.f32 %v4120_v44, %v482_v42  ;;  %v494_v52 = vmul.f32 %v4122_v45, %v483_v36  ;;  %1266 = vmatpush.bf16.msrb.mxu1 %v3170_v38  ;;  %1249 = vmatpush.bf16.msrb.mxu0 %v3098_v49  ;;  %v3342_v42 = vor.u32 %v3579_v35, %v3339_v39  ;;  %v3329_v36 = vld [vmem:[%s5262_s5 + $0xd0] sm:$0xf]  ;;  %v3331_v27 = vld [vmem:[%s5262_s5 + $0xd8] sm:$0xf0]  ;;  %v3555_v33 = vld [vmem:[%s5262_s5 + $0x24] sm:$0xf] }
 0x122   : > { %v474_v57 = vsub.f32 1.5, %v473_v48  ;;  %v3267_v48 = vld [vmem:[%s5262_s5 + $0x58] sm:$0xf0]  ;;  %v3334_v49 = vor.u32 %v3577_v51, %v3331_v27  ;;  %v3554_v35 = vld [vmem:[%s5262_s5 + $0x14] sm:$0xf0] }
 0x123   : > { %v504_v62 = vadd.f32 %v4147_v55, %v493_v28  ;;  %v505_v63 = vadd.f32 %v4197_v25, %v494_v52  ;;  %v3266_v28 = vor.u32 %v3562_v41, %v3265_v40  ;;  %v3330_v52 = vor.u32 %v3578_v43, %v3329_v36  ;;  %v3570_v39 = vld [vmem:[%s5262_s5 + $0x94] sm:$0xf0]  ;;  %v3235_v36 = vld [vmem:[%s5262_s5 + $0x18] sm:$0xf0]  ;;  %v3552_v51 = vld [vmem:[%s5262_s5 + $0x4] sm:$0xf0] }
 0x124   : > { %v475_v0 = vmul.f32 %v4173_v11, %v474_v57  ;;  %1285 = vmatpush.bf16.msrb.mxu2 %v3102_v8  ;;  %v3289_v27 = vld [vmem:[%s5262_s5 + $0x80] sm:$0xf] }
 0x125   : > { %v4255_v2 = vpack.c.bf16 %v504_v62, %v502_v56  ;;  %v4257_v5 = vpack.c.bf16 %v505_v63, %v503_v61  ;;  %1267 = vmatpush.bf16.msrb.mxu1 %v3162_v58  ;;  %v3576_v56 = vld [vmem:[%s5262_s5 + $0xc4] sm:$0xf0]  ;;  %v3259_v62 = vld [vmem:[%s5262_s5 + $0x48] sm:$0xf0]  ;;  %v3575_v63 = vld [vmem:[%s5262_s5 + $0xc4] sm:$0xf] }
 0x126   : > { %v479_v9 = vsel %vm478_vm9, %v4173_v11, %v475_v0  ;;  %v3582_v11 = vld [vmem:[%s5262_s5 + $0xf4] sm:$0xf0]  ;;  %v3322_v61 = vor.u32 %v3576_v56, %v3321_v54  ;;  %v3262_v8 = vor.u32 %v3559_v59, %v3259_v62  ;;  %v3227_v54 = vld [vmem:[%s5262_s5 + $0x8] sm:$0xf0]  ;;  %v3567_v56 = vld [vmem:[%s5262_s5 + $0x84] sm:$0xf] }
 0x127   : > { %718 = vmatmul.bf16.vlgmr.msra.gmra.mxu0 %v4255_v2  ;;  %736 = vmatmul.bf16.vlgmr.msra.gmra.mxu1 %v4257_v5  ;;  %v3346_v16 = vor.u32 %v3582_v11, %v3345_v19  ;;  %v484_v24 = vmul.f32 %v479_v9, %v3790_v29  ;;  %v485_v50 = vmul.f32 %v479_v9, %v3793_v30  ;;  %v3563_v30 = vld [vmem:[%s5262_s5 + $0x64] sm:$0xf]  ;;  %v3249_v9 = vld [vmem:[%s5262_s5 + $0x30] sm:$0xf]  ;;  %v3557_v11 = vld [vmem:[%s5262_s5 + $0x34] sm:$0xf] }
 0x128   : > { %754 = vmatmul.bf16.vlgmr.msra.gmra.mxu2 %v4255_v2  ;;  %772 = vmatmul.bf16.vlgmr.msra.gmra.mxu3 %v4257_v5  ;;  %v3274_v29 = vor.u32 %v3564_v31, %v3273_v23  ;;  %v3278_v38 = vor.u32 %v3563_v30, %v3275_v15  ;;  %v3250_v19 = vor.u32 %v3558_v10, %v3249_v9  ;;  %v3307_v30 = vld [vmem:[%s5262_s5 + $0xa8] sm:$0xf0]  ;;  %v3233_v15 = vld [vmem:[%s5262_s5 + $0x10] sm:$0xf] }
 0x129   : > { %1773 = vmatpush.bf16.msra.mxu0 %v3282_v37  ;;  %1791 = vmatpush.bf16.msra.mxu1 %v3346_v16  ;;  %v495_v46 = vmul.f32 %v4120_v44, %v484_v24  ;;  %v496_v47 = vmul.f32 %v4122_v45, %v485_v50  ;;  %v3257_v44 = vld [vmem:[%s5262_s5 + $0x40] sm:$0xf]  ;;  %v3270_v45 = vor.u32 %v3561_v22, %v3267_v48  ;;  %v3574_v37 = vld [vmem:[%s5262_s5 + $0xb4] sm:$0xf0]  ;;  %v3573_v16 = vld [vmem:[%s5262_s5 + $0xb4] sm:$0xf] }
 0x12a   : > { %1809 = vmatpush.bf16.msra.mxu2 %v3286_v17  ;;  %1827 = vmatpush.bf16.msra.mxu3 %v3350_v26  ;;  %v3258_v60 = vor.u32 %v3560_v53, %v3257_v44  ;;  %v3314_v14 = vor.u32 %v3574_v37, %v3313_v12  ;;  %v3315_v17 = vld [vmem:[%s5262_s5 + $0xb8] sm:$0xf0]  ;;  %v3254_v21 = vor.u32 %v3557_v11, %v3251_v13  ;;  %v3556_v24 = vld [vmem:[%s5262_s5 + $0x24] sm:$0xf0]  ;;  %v3305_v50 = vld [vmem:[%s5262_s5 + $0xa0] sm:$0xf] }
 0x12b   : > { %v506_v57 = vadd.f32 %v4147_v55, %v495_v46  ;;  %v507_v58 = vadd.f32 %v4197_v25, %v496_v47  ;;  %v3323_v55 = vld [vmem:[%s5262_s5 + $0xc8] sm:$0xf0]  ;;  %v3318_v23 = vor.u32 %v3573_v16, %v3315_v17  ;;  %v3572_v26 = vld [vmem:[%s5262_s5 + $0xa4] sm:$0xf0]  ;;  %v3242_v31 = vor.u32 %v3556_v24, %v3241_v20  ;;  %v3569_v46 = vld [vmem:[%s5262_s5 + $0x94] sm:$0xf] }
 0x12c   : > { %v3326_v18 = vor.u32 %v3575_v63, %v3323_v55  ;;  %v3306_v32 = vor.u32 %v3572_v26, %v3305_v50  ;;  %v3234_v43 = vor.u32 %v3554_v35, %v3233_v15  ;;  %v3299_v47 = vld [vmem:[%s5262_s5 + $0x98] sm:$0xf0]  ;;  %v3225_v48 = vld [vmem:[%s5262_s5] sm:$0xf]  ;;  %v3669_v17 = vmov 1934713408  }
 0x12d   : > { %1774 = vmatpush.bf16.msra.mxu0 %v3274_v29  ;;  %1792 = vmatpush.bf16.msra.mxu1 %v3338_v34  ;;  %v4368_v25 = vpack.c.bf16 %v506_v57, %v506_v57  ;;  %v4370_v0 = vpack.c.bf16 %v507_v58, %v507_v58  ;;  %v3243_v29 = vld [vmem:[%s5262_s5 + $0x28] sm:$0xf0]  ;;  %v3571_v34 = vld [vmem:[%s5262_s5 + $0xa4] sm:$0xf]  ;;  %v3302_v44 = vor.u32 %v3569_v46, %v3299_v47  ;;  %v818_v20 = vunpack.c.l.s4 %v3669_v17 }
 0x12e   : > { %1810 = vmatpush.bf16.msra.mxu2 %v3278_v38  ;;  %1828 = vmatpush.bf16.msra.mxu3 %v3342_v42  ;;  %v3297_v38 = vld [vmem:[%s5262_s5 + $0x90] sm:$0xf]  ;;  %v3246_v40 = vor.u32 %v3555_v33, %v3243_v29  ;;  %v3310_v41 = vor.u32 %v3571_v34, %v3307_v30  ;;  %v3553_v42 = vld [vmem:[%s5262_s5 + $0x14] sm:$0xf]  ;;  %v3291_v57 = vld [vmem:[%s5262_s5 + $0x88] sm:$0xf0] }
 0x12f   : > { %v3298_v22 = vor.u32 %v3570_v39, %v3297_v38  ;;  %v3294_v59 = vor.u32 %v3567_v56, %v3291_v57  ;;  %v4494_v15 = vunpack.c.0.s8 %v818_v20 }
 0x131   : > { %1775 = vmatpush.bf16.msra.mxu0 %v3266_v28  ;;  %1793 = vmatpush.bf16.msra.mxu1 %v3330_v52  ;;  %v3568_v28 = vld [vmem:[%s5262_s5 + $0x84] sm:$0xf0]  ;;  %v3238_v52 = vor.u32 %v3553_v42, %v3235_v36 }
 0x132   : > { %1811 = vmatpush.bf16.msra.mxu2 %v3270_v45  ;;  %1829 = vmatpush.bf16.msra.mxu3 %v3334_v49  ;;  %v3551_v45 = vld [vmem:[%s5262_s5 + $0x4] sm:$0xf]  ;;  %v3226_v49 = vor.u32 %v3552_v51, %v3225_v48  ;;  %v3290_v53 = vor.u32 %v3568_v28, %v3289_v27 }
 0x133   : > { %v3230_v58 = vor.u32 %v3551_v45, %v3227_v54 }
 0x135   : > { %1776 = vmatpush.bf16.msra.mxu0 %v3258_v60  ;;  %1794 = vmatpush.bf16.msra.mxu1 %v3322_v61  ;;  %v544_v60 = vld [vmem:[%s5263_s6] sm:$0x3] }
 0x136   : > { %1812 = vmatpush.bf16.msra.mxu2 %v3262_v8  ;;  %1830 = vmatpush.bf16.msra.mxu3 %v3326_v18  ;;  %v546_v61 = vperm.slane %v544_v60, 0 }
 0x137   : > { %723 = vmatmul.bf16.gmra.mxu0 %v4368_v25  ;;  %741 = vmatmul.bf16.gmra.mxu1 %v4370_v0 }
 0x138   : > { %759 = vmatmul.bf16.gmra.mxu2 %v4368_v25  ;;  %777 = vmatmul.bf16.gmra.mxu3 %v4370_v0 }
 0x139   : > { %1777 = vmatpush.bf16.msra.mxu0 %v3250_v19  ;;  %1795 = vmatpush.bf16.msra.mxu1 %v3314_v14 }
 0x13a   : > { %1813 = vmatpush.bf16.msra.mxu2 %v3254_v21  ;;  %1831 = vmatpush.bf16.msra.mxu3 %v3318_v23 }
 0x13d   : > { %1778 = vmatpush.bf16.msra.mxu0 %v3242_v31  ;;  %1796 = vmatpush.bf16.msra.mxu1 %v3306_v32 }
 0x13e   : > { %1814 = vmatpush.bf16.msra.mxu2 %v3246_v40  ;;  %1832 = vmatpush.bf16.msra.mxu3 %v3310_v41 }
 0x141   : > { %1779 = vmatpush.bf16.msra.mxu0 %v3234_v43  ;;  %1797 = vmatpush.bf16.msra.mxu1 %v3298_v22 }
 0x142   : > { %1815 = vmatpush.bf16.msra.mxu2 %v3238_v52  ;;  %1833 = vmatpush.bf16.msra.mxu3 %v3302_v44 }
 0x145   : > { %1780 = vmatpush.bf16.msra.mxu0 %v3226_v49  ;;  %1798 = vmatpush.bf16.msra.mxu1 %v3290_v53 }
 0x146   : > { %1816 = vmatpush.bf16.msra.mxu2 %v3230_v58  ;;  %1834 = vmatpush.bf16.msra.mxu3 %v3294_v59  ;;  %v1076_v58 = vld [vmem:[%s5264_s7] sm:$0x3] }
 0x147   : > { %1250 = vmatmul.bf16.vlgmr.msrb.gmra.mxu0 %v4255_v2  ;;  %1268 = vmatmul.bf16.vlgmr.msrb.gmra.mxu1 %v4257_v5 }
 0x148   : > { %1286 = vmatmul.bf16.vlgmr.msrb.gmra.mxu2 %v4255_v2  ;;  %1304 = vmatmul.bf16.vlgmr.msrb.gmra.mxu3 %v4257_v5 }
 0x157   : > { %1255 = vmatmul.bf16.gmra.mxu0 %v4368_v25  ;;  %1273 = vmatmul.bf16.gmra.mxu1 %v4370_v0 }
 0x158   : > { %1291 = vmatmul.bf16.gmra.mxu2 %v4368_v25  ;;  %1309 = vmatmul.bf16.gmra.mxu3 %v4370_v0 }
 0x167   : > { %1781 = vmatmul.bf16.vlgmr.msra.gmra.mxu0 %v4255_v2  ;;  %1799 = vmatmul.bf16.vlgmr.msra.gmra.mxu1 %v4257_v5 }
 0x168   : > { %1817 = vmatmul.bf16.vlgmr.msra.gmra.mxu2 %v4255_v2  ;;  %1835 = vmatmul.bf16.vlgmr.msra.gmra.mxu3 %v4257_v5  ;;  %v547_v2 = vperm.slane %v544_v60, 1 }
 0x177   : > { %1786 = vmatmul.bf16.gmra.mxu0 %v4368_v25  ;;  %1804 = vmatmul.bf16.gmra.mxu1 %v4370_v0 }
 0x178   : > { %1822 = vmatmul.bf16.gmra.mxu2 %v4368_v25  ;;  %1840 = vmatmul.bf16.gmra.mxu3 %v4370_v0  ;;  %v3668_v25 = vmov 1983009808  }
 0x179   : > { %v811_v11 = vunpack.c.l.s4 %v3668_v25 }
 0x17b   : > { %v4491_v16 = vunpack.c.0.s8 %v811_v11 }
 0x1a4   : > { %v719_v62 = vpop.f32.mrf.mxu0  ;;  %v737_v63 = vpop.f32.mrf.mxu1 }
 0x1a5   : > { %v720_v55 = vadd.f32 %v719_v62, %v546_v61 }
 0x1a7   : > { %v738_v8 = vadd.f32 %v737_v63, %v720_v55 }
 0x1ab   : > { %v755_v18 = vpop.f32.mrf.mxu2  ;;  %v773_v5 = vpop.f32.mrf.mxu3 }
 0x1ac   : > { %v756_v9 = vadd.f32 %v755_v18, %v547_v2  ;;  %v721_v10 = vpop.f32.mrf.mxu0  ;;  %v739_v12 = vpop.f32.mrf.mxu1  ;;  %v4509_v18 = vperm.slane %v1076_v58, 0 }
 0x1ad   : > { %v722_v19 = vadd.f32 %v721_v10, %v546_v61 }
 0x1ae   : > { %v774_v37 = vadd.f32 %v773_v5, %v756_v9 }
 0x1af   : > { %v740_v0 = vadd.f32 %v739_v12, %v722_v19  ;;  %v4513_v12 = vperm.slane %v1076_v58, 1 }
 0x1b0   : > { %v782_v13 = vpack.c.bf16 %v774_v37, %v738_v8 }
 0x1b2   : > { %v788_v14 = vrot.slane %v782_v13, 4  ;;  %v794_v50 = vshrl.u32 %v782_v13, 16 }
 0x1b3   : > { %v757_v21 = vpop.f32.mrf.mxu2  ;;  %v775_v23 = vpop.f32.mrf.mxu3 }
 0x1b4   : > { %v793_v24 = vpack.i.b16 %v788_v14, %v782_v13  ;;  %v795_v26 = vshrl.u32 %v788_v14, 16  ;;  %v758_v31 = vadd.f32 %v757_v21, %v547_v2  ;;  %v724_v32 = vpop.f32.mrf.mxu0  ;;  %v742_v33 = vpop.f32.mrf.mxu1 }
 0x1b5   : > { %v725_v29 = vadd.f32 %v724_v32, %v546_v61 }
 0x1b6   : > { %v796_v34 = vpack.i.b16 %v795_v26, %v794_v50  ;;  %v813_v30 = vperm.slane %v793_v24, %v4491_v16  ;;  %v776_v35 = vadd.f32 %v775_v23, %v758_v31 }
 0x1b7   : > { %v743_v38 = vadd.f32 %v742_v33, %v725_v29 }
 0x1b8   : > { %v814_v39 = vrot.slane %v813_v30, 4  ;;  %v833_v40 = vperm.slane %v796_v34, %v4491_v16  ;;  %v783_v41 = vpack.c.bf16 %v776_v35, %v740_v0  ;;  %v820_v36 = vperm.slane %v813_v30, %v4494_v15 }
 0x1ba   : > { %v816_v42 = vsel %vm815_vm10, 0, %v814_v39  ;;  %v834_v43 = vrot.slane %v833_v40, 4  ;;  %v789_v46 = vrot.slane %v783_v41, 4  ;;  %v800_v27 = vshrl.u32 %v783_v41, 16 }
 0x1bb   : > { %v824_v22 = vperm.slane %v816_v42, %v4494_v15  ;;  %v760_v47 = vpop.f32.mrf.mxu2  ;;  %v778_v48 = vpop.f32.mrf.mxu3  ;;  %v825_v56 = vrot.slane %v820_v36, 4  ;;  %v839_v60 = vperm.slane %v833_v40, %v4494_v15 }
 0x1bc   : > { %v835_v51 = vsel %vm815_vm10, 0, %v834_v43  ;;  %v761_v28 = vadd.f32 %v760_v47, %v547_v2  ;;  %v726_v52 = vpop.f32.mrf.mxu0  ;;  %v744_v44 = vpop.f32.mrf.mxu1  ;;  %v799_v53 = vpack.i.b16 %v789_v46, %v783_v41  ;;  %v801_v54 = vshrl.u32 %v789_v46, 16 }
 0x1bd   : > { %v827_v45 = vrot.slane %v824_v22, 4  ;;  %v843_v49 = vperm.slane %v835_v51, %v4494_v15  ;;  %v826_v5 = vsel %vm815_vm10, 0, %v825_v56  ;;  %v844_v19 = vrot.slane %v839_v60, 4 }
 0x1be   : > { %v779_v57 = vadd.f32 %v778_v48, %v761_v28  ;;  %v802_v61 = vpack.i.b16 %v801_v54, %v800_v27  ;;  %v852_v63 = vperm.slane %v799_v53, %v4491_v16  ;;  %v1607_v48 = vld [vmem:[%s5265_s8] sm:$0x3] }
 0x1bf   : > { %v828_v59 = vsel %vm815_vm10, 0, %v827_v45  ;;  %v846_v62 = vrot.slane %v843_v49, 4  ;;  %v924_v17 = vsel %vm815_vm10, %v827_v45, %v820_v36  ;;  %v845_v35 = vsel %vm815_vm10, 0, %v844_v19 }
 0x1c0   : > { %v784_v55 = vpack.c.bf16 %v779_v57, %v743_v38  ;;  %v929_v8 = vrot.slane %v828_v59, 4  ;;  %v871_v2 = vperm.slane %v802_v61, %v4491_v16  ;;  %v853_v9 = vrot.slane %v852_v63, 4 }
 0x1c1   : > { %v858_v10 = vperm.slane %v852_v63, %v4494_v15  ;;  %v847_v14 = vsel %vm815_vm10, 0, %v846_v62  ;;  %v4519_v20 = vsel %vm815_vm10, %v846_v62, %v839_v60  ;;  %v928_v41 = vperm.slane %v924_v17, %v4491_v16 }
 0x1c2   : > { %v872_v37 = vrot.slane %v871_v2, 4  ;;  %v877_v25 = vperm.slane %v871_v2, %v4494_v15  ;;  %v790_v11 = vrot.slane %v784_v55, 4  ;;  %v854_v21 = vsel %vm815_vm10, 0, %v853_v9 }
 0x1c3   : > { %v762_v0 = vpop.f32.mrf.mxu2  ;;  %v780_v13 = vpop.f32.mrf.mxu3  ;;  %v930_v50 = vsel %vm815_vm10, %v929_v8, %v826_v5  ;;  %v862_v26 = vperm.slane %v854_v21, %v4494_v15  ;;  %v863_v33 = vrot.slane %v858_v10, 4  ;;  %v806_v34 = vshrl.u32 %v784_v55, 16 }
 0x1c4   : > { %v1251_v23 = vpop.f32.mrf.mxu0  ;;  %v1269_v24 = vpop.f32.mrf.mxu1  ;;  %v873_v31 = vsel %vm815_vm10, 0, %v872_v37  ;;  %v805_v32 = vpack.i.b16 %v790_v11, %v784_v55  ;;  %v807_v30 = vshrl.u32 %v790_v11, 16  ;;  %v882_v39 = vrot.slane %v877_v25, 4 }
 0x1c5   : > { %v881_v29 = vperm.slane %v873_v31, %v4494_v15  ;;  %v865_v38 = vrot.slane %v862_v26, 4  ;;  %v934_v43 = vperm.slane %v930_v50, %v4491_v16  ;;  %v946_v22 = vrot.slane %v847_v14, 4 }
 0x1c6   : > { %v890_v40 = vperm.slane %v805_v32, %v4491_v16  ;;  %v808_v36 = vpack.i.b16 %v807_v30, %v806_v34  ;;  %v945_v51 = vperm.slane %v4519_v20, %v4491_v16  ;;  %v864_v27 = vsel %vm815_vm10, 0, %v863_v33 }
 0x1c7   : > { %v884_v42 = vrot.slane %v881_v29, 4  ;;  %v866_v46 = vsel %vm815_vm10, 0, %v865_v38  ;;  %v1252_v44 = vadd.f32 %v1251_v23, %v4509_v18  ;;  %v883_v45 = vsel %vm815_vm10, 0, %v882_v39 }
 0x1c8   : > { %v891_v47 = vrot.slane %v890_v40, 4  ;;  %v963_v52 = vrot.slane %v866_v46, 4  ;;  %v4542_v53 = vperm.slane %v890_v40, %v4494_v15  ;;  %v909_v54 = vperm.slane %v808_v36, %v4491_v16 }
 0x1c9   : > { %v885_v28 = vsel %vm815_vm10, 0, %v884_v42  ;;  %v958_v58 = vsel %vm815_vm10, %v865_v38, %v858_v10  ;;  %v4547_v62 = vperm.slane %v1607_v48, 0  ;;  %v935_v63 = vrot.slane %v934_v43, 4 }
 0x1ca   : > { %v892_v49 = vsel %vm815_vm10, 0, %v891_v47  ;;  %v964_v55 = vsel %vm815_vm10, %v963_v52, %v864_v27  ;;  %v980_v8 = vrot.slane %v885_v28, 4  ;;  %v910_v5 = vrot.slane %v909_v54, 4 }
 0x1cb   : > { %v1287_v56 = vpop.f32.mrf.mxu2  ;;  %v1305_v57 = vpop.f32.mrf.mxu3  ;;  %v900_v2 = vperm.slane %v892_v49, %v4494_v15  ;;  %v4552_v9 = vperm.slane %v909_v54, %v4494_v15  ;;  %v1270_v19 = vadd.f32 %v1269_v24, %v1252_v44  ;;  %v947_v10 = vsel %vm815_vm10, %v946_v22, %v845_v35 }
 0x1cc   : > { %v1288_v59 = vadd.f32 %v1287_v56, %v4513_v12  ;;  %v1253_v60 = vpop.f32.mrf.mxu0  ;;  %v1271_v61 = vpop.f32.mrf.mxu1  ;;  %v962_v11 = vperm.slane %v958_v58, %v4491_v16  ;;  %v975_v0 = vsel %vm815_vm10, %v884_v42, %v877_v25  ;;  %v901_v13 = vrot.slane %v4542_v53, 4 }
 0x1cd   : > { %v1254_v14 = vadd.f32 %v1253_v60, %v4509_v18  ;;  %v936_v20 = vsel %vm815_vm10, %v935_v63, %v928_v41  ;;  %v951_v21 = vperm.slane %v947_v10, %v4491_v16  ;;  %v968_v23 = vperm.slane %v964_v55, %v4491_v16 }
 0x1ce   : > { %v1306_v37 = vadd.f32 %v1305_v57, %v1288_v59  ;;  %v4562_v50 = vrot.slane %v900_v2, 4  ;;  %v4565_v24 = vsel %vm815_vm10, 0, %v910_v5  ;;  %v4567_v26 = vperm.slane %v1607_v48, 1 }
 0x1cf   : > { %v981_v25 = vsel %vm815_vm10, %v980_v8, %v883_v45  ;;  %v920_v31 = vrot.slane %v4552_v9, 4  ;;  %v952_v33 = vrot.slane %v951_v21, 4  ;;  %v969_v29 = vrot.slane %v968_v23, 4 }
 0x1d0   : > { %v1314_v17 = vpack.c.bf16 %v1306_v37, %v1270_v19  ;;  %v1272_v30 = vadd.f32 %v1271_v61, %v1254_v14  ;;  %v940_v39 = vperm.slane %v936_v20, %v4494_v15  ;;  %v985_v40 = vperm.slane %v981_v25, %v4491_v16 }
 0x1d1   : > { %v953_v46 = vsel %vm815_vm10, %v952_v33, %v945_v51  ;;  %v979_v27 = vperm.slane %v975_v0, %v4491_v16  ;;  %v970_v49 = vsel %vm815_vm10, %v969_v29, %v962_v11 }
 0x1d2   : > { %v1320_v32 = vrot.slane %v1314_v17, 4  ;;  %v1326_v34 = vshrl.u32 %v1314_v17, 16  ;;  %v957_v48 = vperm.slane %v953_v46, %v4494_v15  ;;  %v986_v28 = vrot.slane %v985_v40, 4 }
 0x1d3   : > { %v1289_v35 = vpop.f32.mrf.mxu2  ;;  %v1307_v38 = vpop.f32.mrf.mxu3  ;;  %v1029_v57 = vshrl.u32 %v940_v39, 16  ;;  %v4584_v63 = vperm.slane %v970_v49, %v4494_v15 }
 0x1d4   : > { %v1325_v41 = vpack.i.b16 %v1320_v32, %v1314_v17  ;;  %v1327_v42 = vshrl.u32 %v1320_v32, 16  ;;  %v1290_v36 = vadd.f32 %v1289_v35, %v4513_v12  ;;  %v1256_v43 = vpop.f32.mrf.mxu0  ;;  %v1274_v22 = vpop.f32.mrf.mxu1  ;;  %v987_v54 = vsel %vm815_vm10, %v986_v28, %v979_v27 }
 0x1d5   : > { %v1257_v47 = vadd.f32 %v1256_v43, %v4509_v18  ;;  %v1028_v56 = vpack.i.b16 %v957_v48, %v940_v39  ;;  %v1030_v58 = vshrl.u32 %v957_v48, 16  ;;  %v4587_v55 = vperm.slane %v987_v54, %v4494_v15 }
 0x1d6   : > { %v1328_v52 = vpack.i.b16 %v1327_v42, %v1326_v34  ;;  %v1345_v44 = vperm.slane %v1325_v41, %v4491_v16  ;;  %v1308_v45 = vadd.f32 %v1307_v38, %v1290_v36  ;;  %v1035_v42 = vshrl.u32 %v4584_v63, 16 }
 0x1d7   : > { %v1275_v61 = vadd.f32 %v1274_v22, %v1257_v47  ;;  %v4589_v8 = vunpack.c.l.b16 %v1028_v56  ;;  %v1034_v17 = vpack.i.b16 %v4587_v55, %v4584_v63  ;;  %v4598_v20 = vpack.i.b16 %v1030_v58, %v1029_v57 }
 0x1d8   : > { %v1346_v59 = vrot.slane %v1345_v44, 4  ;;  %v1351_v51 = vperm.slane %v1345_v44, %v4494_v15  ;;  %v1364_v18 = vperm.slane %v1328_v52, %v4491_v16  ;;  %v1315_v60 = vpack.c.bf16 %v1308_v45, %v1272_v30 }
 0x1d9   : > { %v4605_v41 = vunpack.c.l.b16 %v1034_v17  ;;  %v1036_v45 = vshrl.u32 %v4587_v55, 16  ;;  %v919_v63 = vperm.slane %v4565_v24, %v4494_v15  ;;  %v921_v24 = vsel %vm815_vm10, 0, %v920_v31 }
 0x1da   : > { %v1347_v2 = vsel %vm815_vm10, 0, %v1346_v59  ;;  %v1356_v5 = vrot.slane %v1351_v51, 4  ;;  %v1365_v19 = vrot.slane %v1364_v18, 4  ;;  %v4593_v37 = vperm.slane %v1364_v18, %v4494_v15 }
 0x1db   : > { %v1355_v10 = vperm.slane %v1347_v2, %v4494_v15  ;;  %v1321_v11 = vrot.slane %v1315_v60, 4  ;;  %v1292_v0 = vpop.f32.mrf.mxu2  ;;  %v1310_v14 = vpop.f32.mrf.mxu3  ;;  %v1332_v25 = vshrl.u32 %v1315_v60, 16  ;;  %v2109_v27 = vpack.c.b16 %v4605_v41, %v4589_v8 }
 0x1dc   : > { %v1366_v21 = vsel %vm815_vm10, 0, %v1365_v19  ;;  %v1375_v23 = vrot.slane %v4593_v37, 4  ;;  %v1293_v32 = vadd.f32 %v1292_v0, %v4513_v12  ;;  %v1258_v33 = vpop.f32.mrf.mxu0  ;;  %v1276_v29 = vpop.f32.mrf.mxu1  ;;  %v1357_v39 = vsel %vm815_vm10, 0, %v1356_v5 }
 0x1dd   : > { %v1358_v34 = vrot.slane %v1355_v10, 4  ;;  %v1374_v30 = vperm.slane %v1366_v21, %v4494_v15  ;;  %v1331_v35 = vpack.i.b16 %v1321_v11, %v1315_v60  ;;  %v1333_v38 = vshrl.u32 %v1321_v11, 16 }
 0x1de   : > { %v1311_v40 = vadd.f32 %v1310_v14, %v1293_v32  ;;  %v1376_v46 = vsel %vm815_vm10, 0, %v1375_v23 }
 0x1df   : > { %v1359_v36 = vsel %vm815_vm10, 0, %v1358_v34  ;;  %v1377_v43 = vrot.slane %v1374_v30, 4  ;;  %v1334_v22 = vpack.i.b16 %v1333_v38, %v1332_v25  ;;  %v1383_v12 = vperm.slane %v1331_v35, %v4491_v16 }
 0x1e0   : > { %v1460_v47 = vrot.slane %v1359_v36, 4  ;;  %v1316_v48 = vpack.c.bf16 %v1311_v40, %v1275_v61  ;;  %v1455_v57 = vsel %vm815_vm10, %v1358_v34, %v1351_v51 }
 0x1e1   : > { %v1384_v28 = vrot.slane %v1383_v12, 4  ;;  %v4614_v52 = vperm.slane %v1383_v12, %v4494_v15  ;;  %v1402_v44 = vperm.slane %v1334_v22, %v4491_v16  ;;  %v1378_v49 = vsel %vm815_vm10, 0, %v1377_v43 }
 0x1e2   : > { %v1322_v54 = vrot.slane %v1316_v48, 4  ;;  %v1338_v56 = vshrl.u32 %v1316_v48, 16  ;;  %v1461_v14 = vsel %vm815_vm10, %v1460_v47, %v1357_v39  ;;  %v1477_v17 = vrot.slane %v1378_v49, 4 }
 0x1e3   : > { %v1385_v58 = vsel %vm815_vm10, 0, %v1384_v28  ;;  %v1394_v59 = vrot.slane %v4614_v52, 4  ;;  %v1403_v18 = vrot.slane %v1402_v44, 4  ;;  %v4623_v60 = vperm.slane %v1402_v44, %v4494_v15  ;;  %v1294_v61 = vpop.f32.mrf.mxu2  ;;  %v1312_v2 = vpop.f32.mrf.mxu3 }
 0x1e4   : > { %v1393_v5 = vperm.slane %v1385_v58, %v4494_v15  ;;  %v1337_v19 = vpack.i.b16 %v1322_v54, %v1316_v48  ;;  %v1339_v10 = vshrl.u32 %v1322_v54, 16  ;;  %v1782_v11 = vpop.f32.mrf.mxu0  ;;  %v1800_v0 = vpop.f32.mrf.mxu1  ;;  %v1459_v35 = vperm.slane %v1455_v57, %v4491_v16 }
 0x1e5   : > { %v1404_v51 = vsel %vm815_vm10, 0, %v1403_v18  ;;  %v1413_v21 = vrot.slane %v4623_v60, 4  ;;  %v1783_v23 = vadd.f32 %v1782_v11, %v4547_v62  ;;  %v1395_v34 = vsel %vm815_vm10, 0, %v1394_v59 }
 0x1e6   : > { %v1396_v25 = vrot.slane %v1393_v5, 4  ;;  %v1412_v32 = vperm.slane %v1404_v51, %v4494_v15  ;;  %v1340_v33 = vpack.i.b16 %v1339_v10, %v1338_v56  ;;  %v1421_v29 = vperm.slane %v1337_v19, %v4491_v16 }
 0x1e7   : > { %v4634_v30 = vsel %vm815_vm10, 0, %v1413_v21  ;;  %v1465_v38 = vperm.slane %v1461_v14, %v4491_v16  ;;  %v1801_v47 = vadd.f32 %v1800_v0, %v1783_v23  ;;  %v1472_v28 = vsel %vm815_vm10, %v1377_v43, %v4593_v37 }
 0x1e8   : > { %v1397_v39 = vsel %vm815_vm10, 0, %v1396_v25  ;;  %v1415_v40 = vrot.slane %v1412_v32, 4  ;;  %v1422_v36 = vrot.slane %v1421_v29, 4  ;;  %v1427_v22 = vperm.slane %v1421_v29, %v4494_v15 }
 0x1e9   : > { %v1440_v12 = vperm.slane %v1340_v33, %v4491_v16  ;;  %v1466_v48 = vrot.slane %v1465_v38, 4  ;;  %v1494_v49 = vrot.slane %v1397_v39, 4  ;;  %v1478_v56 = vsel %vm815_vm10, %v1477_v17, %v1376_v46 }
 0x1ea   : > { %v4644_v44 = vsel %vm815_vm10, 0, %v1415_v40  ;;  %v1423_v54 = vsel %vm815_vm10, 0, %v1422_v36  ;;  %v1432_v58 = vrot.slane %v1427_v22, 4  ;;  %v1476_v10 = vperm.slane %v1472_v28, %v4491_v16 }
 0x1eb   : > { %v1431_v57 = vperm.slane %v1423_v54, %v4494_v15  ;;  %v1441_v59 = vrot.slane %v1440_v12, 4  ;;  %v1446_v18 = vperm.slane %v1440_v12, %v4494_v15  ;;  %v1818_v61 = vpop.f32.mrf.mxu2  ;;  %v1836_v2 = vpop.f32.mrf.mxu3  ;;  %v1467_v43 = vsel %vm815_vm10, %v1466_v48, %v1459_v35 }
 0x1ec   : > { %v1819_v5 = vadd.f32 %v1818_v61, %v4567_v26  ;;  %v1784_v19 = vpop.f32.mrf.mxu0  ;;  %v1802_v37 = vpop.f32.mrf.mxu1  ;;  %v1482_v11 = vperm.slane %v1478_v56, %v4491_v16  ;;  %v1511_v51 = vrot.slane %v4644_v44, 4  ;;  %v1433_v33 = vsel %vm815_vm10, 0, %v1432_v58 }
 0x1ed   : > { %v1434_v0 = vrot.slane %v1431_v57, 4  ;;  %v1442_v46 = vsel %vm815_vm10, 0, %v1441_v59  ;;  %v1451_v14 = vrot.slane %v1446_v18, 4  ;;  %v1785_v17 = vadd.f32 %v1784_v19, %v4547_v62 }
 0x1ee   : > { %v1450_v21 = vperm.slane %v1442_v46, %v4494_v15  ;;  %v1837_v23 = vadd.f32 %v1836_v2, %v1819_v5  ;;  %v1483_v32 = vrot.slane %v1482_v11, 4  ;;  %v4662_v38 = vperm.slane %v1467_v43, %v4494_v15 }
 0x1ef   : > { %v1435_v29 = vsel %vm815_vm10, 0, %v1434_v0  ;;  %v1523_v35 = vsel %vm815_vm10, %v1434_v0, %v1427_v22  ;;  %v1452_v39 = vsel %vm815_vm10, 0, %v1451_v14  ;;  %v1803_v28 = vadd.f32 %v1802_v37, %v1785_v17 }
 0x1f0   : > { %v1453_v36 = vrot.slane %v1450_v21, 4  ;;  %v1528_v12 = vrot.slane %v1435_v29, 4  ;;  %v1845_v48 = vpack.c.bf16 %v1837_v23, %v1801_v47  ;;  %v1527_v54 = vperm.slane %v1523_v35, %v4491_v16 }
 0x1f1   : > { %v1484_v56 = vsel %vm815_vm10, %v1483_v32, %v1476_v10  ;;  %v4669_v57 = vsel %vm815_vm10, %v1396_v25, %v4614_v52  ;;  %v1495_v61 = vsel %vm815_vm10, %v1494_v49, %v1395_v34  ;;  %v4677_v43 = vsel %vm815_vm10, %v1415_v40, %v4623_v60 }
 0x1f2   : > { %v1454_v58 = vsel %vm815_vm10, 0, %v1453_v36  ;;  %v1529_v22 = vsel %vm815_vm10, %v1528_v12, %v1433_v33  ;;  %v1851_v59 = vrot.slane %v1845_v48, 4  ;;  %v1857_v5 = vshrl.u32 %v1845_v48, 16 }
 0x1f3   : > { %v1545_v2 = vrot.slane %v1454_v58, 4  ;;  %v1820_v19 = vpop.f32.mrf.mxu2  ;;  %v1838_v47 = vpop.f32.mrf.mxu3  ;;  %v1533_v37 = vperm.slane %v1529_v22, %v4491_v16  ;;  %v1540_v46 = vsel %vm815_vm10, %v1453_v36, %v1446_v18  ;;  %v4684_v17 = vperm.slane %v1484_v56, %v4494_v15 }
 0x1f4   : > { %v1856_v10 = vpack.i.b16 %v1851_v59, %v1845_v48  ;;  %v1858_v52 = vshrl.u32 %v1851_v59, 16  ;;  %v1821_v25 = vadd.f32 %v1820_v19, %v4567_v26  ;;  %v1787_v11 = vpop.f32.mrf.mxu0  ;;  %v1805_v0 = vpop.f32.mrf.mxu1  ;;  %v1544_v33 = vperm.slane %v1540_v46, %v4491_v16 }
 0x1f5   : > { %v1788_v34 = vadd.f32 %v1787_v11, %v4547_v62  ;;  %v1534_v49 = vrot.slane %v1533_v37, 4  ;;  %v1546_v14 = vsel %vm815_vm10, %v1545_v2, %v1452_v39  ;;  %v1493_v18 = vperm.slane %v4669_v57, %v4491_v16 }
 0x1f6   : > { %v1859_v21 = vpack.i.b16 %v1858_v52, %v1857_v5  ;;  %v1876_v60 = vperm.slane %v1856_v10, %v4491_v16  ;;  %v1839_v40 = vadd.f32 %v1838_v47, %v1821_v25  ;;  %v1550_v23 = vperm.slane %v1546_v14, %v4491_v16 }
 0x1f7   : > { %v1535_v32 = vsel %vm815_vm10, %v1534_v49, %v1527_v54  ;;  %v1499_v62 = vperm.slane %v1495_v61, %v4491_v16  ;;  %v1806_v12 = vadd.f32 %v1805_v0, %v1788_v34  ;;  %v1510_v54 = vperm.slane %v4677_v43, %v4491_v16 }
 0x1f8   : > { %v1877_v29 = vrot.slane %v1876_v60, 4  ;;  %v4694_v35 = vperm.slane %v1876_v60, %v4494_v15  ;;  %v1895_v39 = vperm.slane %v1859_v21, %v4491_v16  ;;  %v1846_v36 = vpack.c.bf16 %v1839_v40, %v1803_v28 }
 0x1f9   : > { %v1539_v48 = vperm.slane %v1535_v32, %v4494_v15  ;;  %v1551_v56 = vrot.slane %v1550_v23, 4  ;;  %v1500_v37 = vrot.slane %v1499_v62, 4  ;;  %v1512_v32 = vsel %vm815_vm10, %v1511_v51, %v4634_v30 }
 0x1fa   : > { %v1878_v58 = vsel %vm815_vm10, 0, %v1877_v29  ;;  %v1887_v22 = vrot.slane %v4694_v35, 4  ;;  %v1896_v59 = vrot.slane %v1895_v39, 4  ;;  %v4703_v61 = vperm.slane %v1895_v39, %v4494_v15 }
 0x1fb   : > { %v1886_v2 = vperm.slane %v1878_v58, %v4494_v15  ;;  %v1852_v5 = vrot.slane %v1846_v36, 4  ;;  %v1823_v19 = vpop.f32.mrf.mxu2  ;;  %v1841_v28 = vpop.f32.mrf.mxu3  ;;  %v1552_v47 = vsel %vm815_vm10, %v1551_v56, %v1544_v33  ;;  %v1863_v25 = vshrl.u32 %v1846_v36, 16 }
 0x1fc   : > { %v1897_v10 = vsel %vm815_vm10, 0, %v1896_v59  ;;  %v1906_v52 = vrot.slane %v4703_v61, 4  ;;  %v1824_v11 = vadd.f32 %v1823_v19, %v4567_v26  ;;  %v1789_v0 = vpop.f32.mrf.mxu0  ;;  %v1807_v46 = vpop.f32.mrf.mxu1  ;;  %v4714_v60 = vsel %vm815_vm10, 0, %v1887_v22 }
 0x1fd   : > { %v4710_v34 = vrot.slane %v1886_v2, 4  ;;  %v1905_v49 = vperm.slane %v1897_v10, %v4494_v15  ;;  %v1862_v14 = vpack.i.b16 %v1852_v5, %v1846_v36  ;;  %v1864_v21 = vshrl.u32 %v1852_v5, 16 }
 0x1fe   : > { %v1842_v40 = vadd.f32 %v1841_v28, %v1824_v11  ;;  %v1556_v23 = vperm.slane %v1552_v47, %v4494_v15  ;;  %v4722_v26 = vsel %vm815_vm10, 0, %v1906_v52  ;;  %v1572_v58 = vshrl.u32 %v1539_v48, 16 }
 0x1ff   : > { %v4724_v33 = vrot.slane %v1905_v49, 4  ;;  %v1865_v62 = vpack.i.b16 %v1864_v21, %v1863_v25  ;;  %v1914_v29 = vperm.slane %v1862_v14, %v4491_v16  ;;  %v4729_v39 = vsel %vm815_vm10, 0, %v4710_v34 }
 0x200   : > { %v1847_v36 = vpack.c.bf16 %v1842_v40, %v1806_v12  ;;  %v1571_v56 = vpack.i.b16 %v1556_v23, %v1539_v48  ;;  %v1573_v51 = vshrl.u32 %v1556_v23, 16  ;;  %v1991_v49 = vrot.slane %v4729_v39, 4 }
 0x201   : > { %v1915_v22 = vrot.slane %v1914_v29, 4  ;;  %v4732_v44 = vperm.slane %v1914_v29, %v4494_v15  ;;  %v1933_v30 = vperm.slane %v1865_v62, %v4491_v16  ;;  %v4737_v59 = vsel %vm815_vm10, 0, %v4724_v33 }
 0x202   : > { %v1853_v2 = vrot.slane %v1847_v36, 4  ;;  %v1869_v5 = vshrl.u32 %v1847_v36, 16  ;;  %v2115_v19 = vunpack.c.l.b16 %v1571_v56  ;;  %v1574_v40 = vpack.i.b16 %v1573_v51, %v1572_v58 }
 0x203   : > { %v1916_v28 = vsel %vm815_vm10, 0, %v1915_v22  ;;  %v1925_v12 = vrot.slane %v4732_v44, 4  ;;  %v1934_v47 = vrot.slane %v1933_v30, 4  ;;  %v4742_v48 = vperm.slane %v1933_v30, %v4494_v15  ;;  %v1825_v10 = vpop.f32.mrf.mxu2  ;;  %v1843_v52 = vpop.f32.mrf.mxu3 }
 0x204   : > { %v1924_v25 = vperm.slane %v1916_v28, %v4494_v15  ;;  %v1868_v11 = vpack.i.b16 %v1853_v2, %v1847_v36  ;;  %v1870_v0 = vshrl.u32 %v1853_v2, 16  ;;  %v2117_v46 = vpack.c.b16 %v2115_v19, %v2115_v19 }
 0x205   : > { %v1935_v14 = vsel %vm815_vm10, 0, %v1934_v47  ;;  %v1944_v21 = vrot.slane %v4742_v48, 4  ;;  %v4754_v36 = vsel %vm815_vm10, 0, %v1925_v12  ;;  %v2147_v30 = vunpack.c.l.b16 %v1574_v40 }
 0x206   : > { %v4748_v23 = vrot.slane %v1924_v25, 4  ;;  %v1943_v62 = vperm.slane %v1935_v14, %v4494_v15  ;;  %v1871_v29 = vpack.i.b16 %v1870_v0, %v1869_v5  ;;  %v1952_v56 = vperm.slane %v1868_v11, %v4491_v16  ;;  %2126 = vmatpush.bf16.xpose.msrb.mxu0 %v2117_v46 }
 0x207   : > { %v1516_v2 = vperm.slane %v1512_v32, %v4491_v16  ;;  %v1501_v51 = vsel %vm815_vm10, %v1500_v37, %v1493_v18  ;;  %v4769_v12 = vsel %vm815_vm10, 0, %v1944_v21  ;;  %v2149_v32 = vpack.c.b16 %v2147_v30, %v2147_v30 }
 0x208   : > { %v4757_v19 = vrot.slane %v1943_v62, 4  ;;  %v1953_v28 = vrot.slane %v1952_v56, 4  ;;  %v1958_v58 = vperm.slane %v1952_v56, %v4494_v15  ;;  %v4766_v5 = vsel %vm815_vm10, 0, %v4748_v23 }
 0x209   : > { %v1971_v47 = vperm.slane %v1871_v29, %v4491_v16  ;;  %v1517_v57 = vrot.slane %v1516_v2, 4  ;;  %2158 = vmatpush.bf16.xpose.msrb.mxu1 %v2149_v32  ;;  %v1505_v0 = vperm.slane %v1501_v51, %v4494_v15  ;;  %v1559_v40 = vpack.i.b16 %v4684_v17, %v4662_v38 }
 0x20a   : > { %v4774_v10 = vsel %vm815_vm10, 0, %v4757_v19  ;;  %v1954_v52 = vsel %vm815_vm10, 0, %v1953_v28  ;;  %v1963_v25 = vrot.slane %v1958_v58, 4  ;;  %v1560_v51 = vshrl.u32 %v4662_v38, 16 }
 0x20b   : > { %v1962_v18 = vperm.slane %v1954_v52, %v4494_v15  ;;  %v1972_v37 = vrot.slane %v1971_v47, 4  ;;  %v1977_v11 = vperm.slane %v1971_v47, %v4494_v15  ;;  %v1518_v21 = vsel %vm815_vm10, %v1517_v57, %v1510_v54 }
 0x20c   : > { %v1522_v30 = vperm.slane %v1518_v21, %v4494_v15  ;;  %v1964_v2 = vsel %vm815_vm10, 0, %v1963_v25  ;;  %v1561_v47 = vshrl.u32 %v4684_v17, 16  ;;  %v1566_v32 = vshrl.u32 %v1505_v0, 16 }
 0x20d   : > { %v1965_v62 = vrot.slane %v1962_v18, 4  ;;  %v1973_v29 = vsel %vm815_vm10, 0, %v1972_v37  ;;  %v1982_v56 = vrot.slane %v1977_v11, 4  ;;  %v2113_v18 = vunpack.c.l.b16 %v1559_v40 }
 0x20e   : > { %v1981_v28 = vperm.slane %v1973_v29, %v4494_v15  ;;  %v1565_v54 = vpack.i.b16 %v1522_v30, %v1505_v0  ;;  %v1567_v52 = vshrl.u32 %v1522_v30, 16  ;;  %v1562_v14 = vpack.i.b16 %v1561_v47, %v1560_v51 }
 0x20f   : > { %v1966_v43 = vsel %vm815_vm10, 0, %v1965_v62  ;;  %v1037_v37 = vpack.i.b16 %v1036_v45, %v1035_v42  ;;  %v1983_v25 = vsel %vm815_vm10, 0, %v1982_v56  ;;  %v2138_v46 = vunpack.c.l.b16 %v4598_v20 }
 0x210   : > { %v1984_v57 = vrot.slane %v1981_v28, 4  ;;  %v2059_v21 = vrot.slane %v1966_v43, 4  ;;  %v2114_v29 = vunpack.c.l.b16 %v1565_v54  ;;  %v1568_v38 = vpack.i.b16 %v1567_v52, %v1566_v32 }
 0x211   : > { %v2139_v22 = vunpack.c.l.b16 %v1037_v37  ;;  %v904_v0 = vsel %vm815_vm10, 0, %v4562_v50  ;;  %v2145_v30 = vunpack.c.l.b16 %v1562_v14  ;;  %v992_v45 = vsel %vm815_vm10, %v4562_v50, %v4542_v53 }
 0x212   : > { %v1985_v17 = vsel %vm815_vm10, 0, %v1984_v57  ;;  %v2116_v40 = vpack.c.b16 %v2114_v29, %v2113_v18  ;;  %v2146_v28 = vunpack.c.l.b16 %v1568_v38  ;;  %v997_v56 = vrot.slane %v904_v0, 4 }
 0x213   : > { %v2076_v55 = vrot.slane %v1985_v17, 4  ;;  %v2141_v42 = vpack.c.b16 %v2139_v22, %v2138_v46  ;;  %v902_v20 = vsel %vm815_vm10, 0, %v901_v13  ;;  %v922_v47 = vrot.slane %v919_v63, 4 }
 0x214   : > { %2127 = vmatpush.bf16.xpose.msrb.mxu0 %v2116_v40  ;;  %v2148_v51 = vpack.c.b16 %v2146_v28, %v2145_v30  ;;  %v2054_v14 = vsel %vm815_vm10, %v1965_v62, %v1958_v58  ;;  %v998_v22 = vsel %vm815_vm10, %v997_v56, %v902_v20  ;;  %v2060_v46 = vsel %vm815_vm10, %v2059_v21, %v1964_v2 }
 0x215   : > { %v2071_v50 = vsel %vm815_vm10, %v1984_v57, %v1977_v11  ;;  %v923_v43 = vsel %vm815_vm10, 0, %v922_v47  ;;  %v996_v53 = vperm.slane %v992_v45, %v4491_v16  ;;  %v1002_v13 = vperm.slane %v998_v22, %v4491_v16 }
 0x216   : > { %2159 = vmatpush.bf16.xpose.msrb.mxu1 %v2148_v51  ;;  %v2064_v54 = vperm.slane %v2060_v46, %v4491_v16  ;;  %v1009_v58 = vsel %vm815_vm10, %v922_v47, %v4552_v9  ;;  %v1014_v62 = vrot.slane %v923_v43, 4  ;;  %v2058_v31 = vperm.slane %v2054_v14, %v4491_v16 }
 0x217   : > { %v2077_v32 = vsel %vm815_vm10, %v2076_v55, %v1983_v25  ;;  %v1003_v2 = vrot.slane %v1002_v13, 4  ;;  %v2075_v11 = vperm.slane %v2071_v50, %v4491_v16  ;;  %v1986_v37 = vsel %vm815_vm10, %v4710_v34, %v4694_v35 }
 0x218   : > { %v2065_v52 = vrot.slane %v2064_v54, 4  ;;  %v2081_v57 = vperm.slane %v2077_v32, %v4491_v16  ;;  %v1015_v18 = vsel %vm815_vm10, %v1014_v62, %v921_v24  ;;  %v1992_v9 = vsel %vm815_vm10, %v1991_v49, %v4714_v60 }
 0x219   : > { %v2003_v25 = vsel %vm815_vm10, %v4724_v33, %v4703_v61  ;;  %v1004_v21 = vsel %vm815_vm10, %v1003_v2, %v996_v53  ;;  %v1019_v29 = vperm.slane %v1015_v18, %v4491_v16  ;;  %v1013_v35 = vperm.slane %v1009_v58, %v4491_v16 }
 0x21a   : > { %v2066_v38 = vsel %vm815_vm10, %v2065_v52, %v2058_v31  ;;  %v2082_v17 = vrot.slane %v2081_v57, 4  ;;  %v1996_v60 = vperm.slane %v1992_v9, %v4491_v16  ;;  %v1008_v61 = vperm.slane %v1004_v21, %v4494_v15 }
 0x21b   : > { %2128 = vmatmul.bf16.vlgmr.msrb.gmra.mxu0 %v2109_v27  ;;  %v2070_v34 = vperm.slane %v2066_v38, %v4494_v15  ;;  %v1020_v33 = vrot.slane %v1019_v29, 4  ;;  %v5269_v49 = vrot.slane %v4737_v59, 4  ;;  %v1990_v41 = vperm.slane %v1986_v37, %v4491_v16 }
 0x21c   : > { %v2083_v39 = vsel %vm815_vm10, %v2082_v17, %v2075_v11  ;;  %v1997_v27 = vrot.slane %v1996_v60, 4  ;;  %v2007_v40 = vperm.slane %v2003_v25, %v4491_v16  ;;  %v5270_v55 = vrot.slane %v4766_v5, 4 }
 0x21d   : > { %v2009_v0 = vsel %vm815_vm10, %v5269_v49, %v4722_v26  ;;  %2160 = vmatmul.bf16.vlgmr.msrb.gmra.mxu1 %v2141_v42  ;;  %v2087_v8 = vperm.slane %v2083_v39, %v4494_v15  ;;  %v1021_v30 = vsel %vm815_vm10, %v1020_v33, %v1013_v35  ;;  %v2103_v28 = vshrl.u32 %v2070_v34, 16 }
 0x21e   : > { %v2013_v63 = vperm.slane %v2009_v0, %v4491_v16  ;;  %v2026_v59 = vsel %vm815_vm10, %v5270_v55, %v4754_v36  ;;  %v1025_v26 = vperm.slane %v1021_v30, %v4494_v15  ;;  %v2020_v56 = vsel %vm815_vm10, %v4748_v23, %v4732_v44 }
 0x21f   : > { %v2102_v42 = vpack.i.b16 %v2087_v8, %v2070_v34  ;;  %v2104_v45 = vshrl.u32 %v2087_v8, 16  ;;  %v1041_v51 = vshrl.u32 %v1008_v61, 16  ;;  %v1998_v20 = vsel %vm815_vm10, %v1997_v27, %v1990_v41 }
 0x220   : > { %v2014_v47 = vrot.slane %v2013_v63, 4  ;;  %v2030_v14 = vperm.slane %v2026_v59, %v4491_v16  ;;  %v1040_v24 = vpack.i.b16 %v1025_v26, %v1008_v61  ;;  %v1042_v22 = vshrl.u32 %v1025_v26, 16 }
 0x221   : > { %v2270_v46 = vunpack.c.l.b16 %v2102_v42  ;;  %v2105_v5 = vpack.i.b16 %v2104_v45, %v2103_v28  ;;  %v2024_v50 = vperm.slane %v2020_v56, %v4491_v16  ;;  %v5271_v53 = vrot.slane %v4774_v10, 4 }
 0x222   : > { %v2015_v36 = vsel %vm815_vm10, %v2014_v47, %v2007_v40  ;;  %v2031_v43 = vrot.slane %v2030_v14, 4  ;;  %v1043_v23 = vpack.i.b16 %v1042_v22, %v1041_v51  ;;  %v2037_v58 = vsel %vm815_vm10, %v4757_v19, %v4742_v48 }
 0x223   : > { %v2043_v44 = vsel %vm815_vm10, %v5271_v53, %v4769_v12  ;;  %v2272_v13 = vpack.c.b16 %v2270_v46, %v2270_v46  ;;  %v2312_v54 = vunpack.c.l.b16 %v2105_v5  ;;  %v2019_v62 = vperm.slane %v2015_v36, %v4494_v15 }
 0x224   : > { %v2032_v31 = vsel %vm815_vm10, %v2031_v43, %v2024_v50  ;;  %v2047_v32 = vperm.slane %v2043_v44, %v4491_v16  ;;  %v2108_v2 = vunpack.c.l.b16 %v1040_v24  ;;  %v2002_v10 = vperm.slane %v1998_v20, %v4494_v15 }
 0x225   : > { %v2282_v52 = vsel %vm2280_vm11, %v2272_v13, 0  ;;  %v2314_v11 = vpack.c.b16 %v2312_v54, %v2312_v54  ;;  %v2140_v12 = vunpack.c.l.b16 %v1043_v23  ;;  %v2041_v57 = vperm.slane %v2037_v58, %v4491_v16 }
 0x226   : > { %2290 = vmatpush.bf16.msrb.mxu2 %v2282_v52  ;;  %v2048_v18 = vrot.slane %v2047_v32, 4  ;;  %v2036_v48 = vperm.slane %v2032_v31, %v4494_v15  ;;  %v2092_v19 = vshrl.u32 %v2019_v62, 16  ;;  %v2110_v25 = vpack.c.b16 %v2108_v2, %v2108_v2 }
 0x227   : > { %v2323_v37 = vsel %vm2280_vm11, %v2314_v11, 0  ;;  %v2090_v29 = vpack.i.b16 %v2019_v62, %v2002_v10  ;;  %v2091_v38 = vshrl.u32 %v2002_v10, 16  ;;  %v2142_v17 = vpack.c.b16 %v2140_v12, %v2140_v12 }
 0x228   : > { %2331 = vmatpush.bf16.msrb.mxu3 %v2323_v37  ;;  %v2049_v9 = vsel %vm815_vm10, %v2048_v18, %v2041_v57  ;;  %v2097_v60 = vshrl.u32 %v2036_v48, 16  ;;  %v2176_v40 = vlaneseq }
 0x229   : > { %v2053_v21 = vperm.slane %v2049_v9, %v4494_v15  ;;  %v2093_v34 = vpack.i.b16 %v2092_v19, %v2091_v38  ;;  %v2268_v33 = vunpack.c.l.b16 %v2090_v29 }
 0x22a   : > { %v2177_v30 = vand.u32 127, %v2176_v40 }
 0x22b   : > { %2133 = vmatmul.bf16.gmra.mxu0 %v2110_v25  ;;  %v2096_v35 = vpack.i.b16 %v2053_v21, %v2036_v48  ;;  %v2098_v61 = vshrl.u32 %v2053_v21, 16  ;;  %v2310_v8 = vunpack.c.l.b16 %v2093_v34 }
 0x22c   : > { %vm2178_vm12 = vcmp.lt.s32.totalorder %v2177_v30, 17 }
 0x22d   : > { %2165 = vmatmul.bf16.gmra.mxu1 %v2142_v17  ;;  %v2269_v39 = vunpack.c.l.b16 %v2096_v35  ;;  %v2099_v49 = vpack.i.b16 %v2098_v61, %v2097_v60 }
 0x22f   : > { %v2271_v0 = vpack.c.b16 %v2269_v39, %v2268_v33  ;;  %v2311_v41 = vunpack.c.l.b16 %v2099_v49 }
 0x231   : > { %2291 = vmatpush.bf16.msrb.mxu2 %v2271_v0  ;;  %v2313_v27 = vpack.c.b16 %v2311_v41, %v2310_v8 }
 0x233   : > { %2332 = vmatpush.bf16.msrb.mxu3 %v2313_v27 }
 0x298   : > { %v2129_v28 = vpop.f32.mrf.mxu0 }
 0x299   : > { %v2170_v63 = vmul.f32 0.088388346, %v2129_v28 }
 0x29a   : > { %v2161_v55 = vpop.f32.mrf.mxu1 }
 0x29b   : > { %v2173_v59 = vmul.f32 0.088388346, %v2161_v55  ;;  %v2181_v26 = vsel %vm2178_vm12, %v2170_v63, -1e+30 }
 0x29c   : > { %v2188_v42 = vsel %vm2187_vm13, %v2181_v26, -inf }
 0x29d   : > { %2189 = vmax.xlane.f32.xlu0 %v2188_v42  ;;  %v2184_v45 = vsel %vm2178_vm12, %v2173_v59, -1e+30 }
 0x29e   : > { %v2197_v56 = vsel %vm2187_vm13, %v2184_v45, -inf }
 0x29f   : > { %2198 = vmax.xlane.f32.xlu2 %v2197_v56 }
 0x2a0   : > { %v2131_v51 = vpop.f32.mrf.mxu0 }
 0x2a1   : > { %v2171_v20 = vmul.f32 0.088388346, %v2131_v51 }
 0x2a2   : > { %v2163_v47 = vpop.f32.mrf.mxu1 }
 0x2a3   : > { %v2174_v14 = vmul.f32 0.088388346, %v2163_v47  ;;  %v2182_v24 = vsel %vm2178_vm12, %v2171_v20, -1e+30 }
 0x2a4   : > { %v2191_v22 = vsel %vm2187_vm13, %v2182_v24, -inf }
 0x2a5   : > { %2192 = vmax.xlane.f32.xlu1 %v2191_v22  ;;  %v2185_v46 = vsel %vm2178_vm12, %v2174_v14, -1e+30 }
 0x2a6   : > { %v2200_v5 = vsel %vm2187_vm13, %v2185_v46, -inf }
 0x2a7   : > { %2201 = vmax.xlane.f32.xlu0 %v2200_v5 }
 0x2a8   : > { %v2134_v36 = vpop.f32.mrf.mxu0 }
 0x2a9   : > { %v2172_v50 = vmul.f32 0.088388346, %v2134_v36 }
 0x2aa   : > { %v2166_v43 = vpop.f32.mrf.mxu1 }
 0x2ab   : > { %v2175_v53 = vmul.f32 0.088388346, %v2166_v43  ;;  %v2183_v44 = vsel %vm2178_vm12, %v2172_v50, -1e+30 }
 0x2ac   : > { %v2194_v23 = vsel %vm2187_vm13, %v2183_v44, -inf }
 0x2ad   : > { %2195 = vmax.xlane.f32.xlu1 %v2194_v23  ;;  %v2186_v13 = vsel %vm2178_vm12, %v2175_v53, -1e+30 }
 0x2ae   : > { %v2203_v54 = vsel %vm2187_vm13, %v2186_v13, -inf }
 0x2af   : > { %2204 = vmax.xlane.f32.xlu2 %v2203_v54 }
 0x2b0   : > { %v2136_v58 = vpop.f32.mrf.mxu0 }
 0x2b2   : > { %v2168_v62 = vpop.f32.mrf.mxu1 }
 0x310   : > { %v2190_v31 = vpop.xlane.xlu0 %2189 }
 0x311   : > { %v2206_v32 = vsub.f32 %v2181_v26, %v2190_v31 }
 0x312   : > { %v2199_v2 = vpop.xlane.xlu2 %2198 }
 0x313   : > { %v2212_v52 = vmul.f32 1.442695, %v2206_v32  ;;  %v2209_v11 = vsub.f32 %v2184_v45, %v2199_v2 }
 0x315   : > { %3634 = vpow2.f32 %v2212_v52  ;;  %v2218_v10 = vmul.f32 1.442695, %v2209_v11 }
 0x317   : > { %3636 = vpow2.f32 %v2218_v10 }
 0x318   : > { %v2193_v12 = vpop.xlane.xlu1 %2192 }
 0x319   : > { %v2207_v57 = vsub.f32 %v2182_v24, %v2193_v12 }
 0x31a   : > { %v2202_v18 = vpop.xlane.xlu0 %2201 }
 0x31b   : > { %v3635_v37 = vpop.eup %3634  ;;  %v2214_v48 = vmul.f32 1.442695, %v2207_v57  ;;  %v2210_v19 = vsub.f32 %v2185_v46, %v2202_v18  ;;  %v3477_v57 = vld [vmem:[%s5266_s9 + $0xf0] sm:$0xf]  ;;  %v3614_v18 = vld [vmem:[%s5266_s9 + $0xf4] sm:$0xf0] }
 0x31c   : > { %v2224_v9 = vsel %vm2187_vm13, %v3635_v37, 0.0 }
 0x31d   : > { %v3637_v25 = vpop.eup %3636  ;;  %3638 = vpow2.f32 %v2214_v48  ;;  %v2220_v21 = vmul.f32 1.442695, %v2210_v19  ;;  %2225 = vadd.xlane.f32.xlu0 %v2224_v9  ;;  %v3478_v48 = vor.u32 %v3614_v18, %v3477_v57  ;;  %v3479_v19 = vld [vmem:[%s5266_s9 + $0xf8] sm:$0xf0]  ;;  %v3413_v9 = vld [vmem:[%s5266_s9 + $0x70] sm:$0xf] }
 0x31e   : > { %v2233_v29 = vsel %vm2187_vm13, %v3637_v25, 0.0  ;;  %v3445_v57 = vld [vmem:[%s5266_s9 + $0xb0] sm:$0xf]  ;;  %v3606_v18 = vld [vmem:[%s5266_s9 + $0xb4] sm:$0xf0] }
 0x31f   : > { %3640 = vpow2.f32 %v2220_v21  ;;  %2234 = vadd.xlane.f32.xlu2 %v2233_v29  ;;  %2834 = vmatpush.bf16.msra.mxu1 %v3478_v48 }
 0x320   : > { %v2196_v38 = vpop.xlane.xlu1 %2195 }
 0x321   : > { %v2208_v17 = vsub.f32 %v2183_v44, %v2196_v38  ;;  %v3597_v38 = vld [vmem:[%s5266_s9 + $0x74] sm:$0xf] }
 0x322   : > { %v2205_v35 = vpop.xlane.xlu2 %2204 }
 0x323   : > { %v3639_v34 = vpop.eup %3638  ;;  %v2216_v60 = vmul.f32 1.442695, %v2208_v17  ;;  %v2211_v61 = vsub.f32 %v2186_v13, %v2205_v35  ;;  %v3415_v17 = vld [vmem:[%s5266_s9 + $0x78] sm:$0xf0]  ;;  %v3469_v35 = vld [vmem:[%s5266_s9 + $0xe0] sm:$0xf] }
 0x324   : > { %v2227_v33 = vsel %vm2187_vm13, %v3639_v34, 0.0 }
 0x325   : > { %v3641_v39 = vpop.eup %3640  ;;  %3642 = vpow2.f32 %v2216_v60  ;;  %v2222_v49 = vmul.f32 1.442695, %v2211_v61  ;;  %2228 = vadd.xlane.f32.xlu1 %v2227_v33  ;;  %v3612_v60 = vld [vmem:[%s5266_s9 + $0xe4] sm:$0xf0]  ;;  %v3611_v61 = vld [vmem:[%s5266_s9 + $0xe4] sm:$0xf] }
 0x326   : > { %v2236_v0 = vsel %vm2187_vm13, %v3641_v39, 0.0  ;;  %v3471_v33 = vld [vmem:[%s5266_s9 + $0xe8] sm:$0xf0] }
 0x327   : > { %3644 = vpow2.f32 %v2222_v49  ;;  %2237 = vadd.xlane.f32.xlu0 %v2236_v0  ;;  %v3474_v49 = vor.u32 %v3611_v61, %v3471_v33  ;;  %v3405_v0 = vld [vmem:[%s5266_s9 + $0x60] sm:$0xf]  ;;  %v3589_v61 = vld [vmem:[%s5266_s9 + $0x34] sm:$0xf] }
 0x32b   : > { %v3643_v8 = vpop.eup %3642 }
 0x32c   : > { %v2230_v41 = vsel %vm2187_vm13, %v3643_v8, 0.0 }
 0x32d   : > { %v3645_v27 = vpop.eup %3644  ;;  %2231 = vadd.xlane.f32.xlu1 %v2230_v41  ;;  %v3595_v41 = vld [vmem:[%s5266_s9 + $0x64] sm:$0xf] }
 0x32e   : > { %v2239_v40 = vsel %vm2187_vm13, %v3645_v27, 0.0 }
 0x32f   : > { %2240 = vadd.xlane.f32.xlu2 %v2239_v40  ;;  %v3407_v40 = vld [vmem:[%s5266_s9 + $0x68] sm:$0xf0] }
 0x390   : > { %v2226_v30 = vpop.xlane.xlu0 %2225 }
 0x391   : > { %3646 = vrcp.f32 %v2226_v30  ;;  %v3461_v30 = vld [vmem:[%s5266_s9 + $0xd0] sm:$0xf] }
 0x392   : > { %v2235_v28 = vpop.xlane.xlu2 %2234 }
 0x393   : > { %3648 = vrcp.f32 %v2235_v28  ;;  %v3610_v28 = vld [vmem:[%s5266_s9 + $0xd4] sm:$0xf0] }
 0x397   : > { %v3647_v55 = vpop.eup %3646 }
 0x398   : > { %v2229_v63 = vpop.xlane.xlu1 %2228  ;;  %v2248_v42 = vmul.f32 %v3647_v55, %v3635_v37  ;;  %v3613_v37 = vld [vmem:[%s5266_s9 + $0xf4] sm:$0xf]  ;;  %v3462_v55 = vor.u32 %v3610_v28, %v3461_v30 }
 0x399   : > { %3650 = vrcp.f32 %v2229_v63  ;;  %v3649_v26 = vpop.eup %3648  ;;  %v3482_v21 = vor.u32 %v3613_v37, %v3479_v19  ;;  %v3410_v63 = vor.u32 %v3595_v41, %v3407_v40  ;;  %v3605_v37 = vld [vmem:[%s5266_s9 + $0xb4] sm:$0xf] }
 0x39a   : > { %v2238_v59 = vpop.xlane.xlu0 %2237  ;;  %v2251_v45 = vmul.f32 %v3649_v26, %v3637_v25  ;;  %v2254_v51 = vpack.c.bf16 %v2248_v42, %v2248_v42  ;;  %v3598_v25 = vld [vmem:[%s5266_s9 + $0x74] sm:$0xf0]  ;;  %v3463_v26 = vld [vmem:[%s5266_s9 + $0xd8] sm:$0xf0]  ;;  %v3397_v42 = vld [vmem:[%s5266_s9 + $0x50] sm:$0xf] }
 0x39b   : > { %3652 = vrcp.f32 %v2238_v59  ;;  %v3414_v29 = vor.u32 %v3598_v25, %v3413_v9  ;;  %2870 = vmatpush.bf16.msra.mxu3 %v3482_v21  ;;  %v3609_v59 = vld [vmem:[%s5266_s9 + $0xd4] sm:$0xf]  ;;  %v3446_v25 = vor.u32 %v3606_v18, %v3445_v57  ;;  %v3447_v21 = vld [vmem:[%s5266_s9 + $0xb8] sm:$0xf0] }
 0x39c   : > { %v2257_v24 = vpack.c.bf16 %v2251_v45, %v2251_v45  ;;  %v2263_v36 = vunpack.c.l.b16 %v2254_v51  ;;  %v3466_v45 = vor.u32 %v3609_v59, %v3463_v26  ;;  %v3593_v51 = vld [vmem:[%s5266_s9 + $0x54] sm:$0xf] }
 0x39d   : > { %2816 = vmatpush.bf16.msra.mxu0 %v3414_v29  ;;  %v3381_v29 = vld [vmem:[%s5266_s9 + $0x30] sm:$0xf] }
 0x39e   : > { %v2305_v53 = vunpack.c.l.b16 %v2257_v24 }
 0x39f   : > { %v3651_v56 = vpop.eup %3650  ;;  %2871 = vmatpush.bf16.msra.mxu3 %v3474_v49  ;;  %v3383_v49 = vld [vmem:[%s5266_s9 + $0x38] sm:$0xf0] }
 0x3a0   : > { %v2249_v20 = vmul.f32 %v3651_v56, %v3639_v34  ;;  %v2232_v47 = vpop.xlane.xlu1 %2231  ;;  %v3418_v34 = vor.u32 %v3597_v38, %v3415_v17  ;;  %v3594_v56 = vld [vmem:[%s5266_s9 + $0x54] sm:$0xf0] }
 0x3a1   : > { %v3653_v14 = vpop.eup %3652  ;;  %3654 = vrcp.f32 %v2232_v47 }
 0x3a2   : > { %v2255_v22 = vpack.c.bf16 %v2249_v20, %v2249_v20  ;;  %v2252_v46 = vmul.f32 %v3653_v14, %v3641_v39  ;;  %v2241_v5 = vpop.xlane.xlu2 %2240  ;;  %v3470_v39 = vor.u32 %v3612_v60, %v3469_v35  ;;  %2852 = vmatpush.bf16.msra.mxu2 %v3418_v34  ;;  %v3399_v20 = vld [vmem:[%s5266_s9 + $0x58] sm:$0xf0]  ;;  %v3398_v14 = vor.u32 %v3594_v56, %v3397_v42  ;;  %v3590_v60 = vld [vmem:[%s5266_s9 + $0x34] sm:$0xf0] }
 0x3a3   : > { %3656 = vrcp.f32 %v2241_v5  ;;  %v3402_v24 = vor.u32 %v3593_v51, %v3399_v20  ;;  %v3607_v5 = vld [vmem:[%s5266_s9 + $0xc4] sm:$0xf]  ;;  %2872 = vmatpush.bf16.msra.mxu3 %v3466_v45  ;;  %v3450_v34 = vor.u32 %v3605_v37, %v3447_v21 }
 0x3a4   : > { %v2264_v50 = vunpack.c.l.b16 %v2255_v22  ;;  %v2258_v43 = vpack.c.bf16 %v2252_v46, %v2252_v46  ;;  %2835 = vmatpush.bf16.msra.mxu1 %v3470_v39  ;;  %v3453_v22 = vld [vmem:[%s5266_s9 + $0xc0] sm:$0xf]  ;;  %v3608_v46 = vld [vmem:[%s5266_s9 + $0xc4] sm:$0xf0]  ;;  %v3382_v39 = vor.u32 %v3590_v60, %v3381_v29 }
 0x3a6   : > { %v2266_v44 = vpack.c.b16 %v2264_v50, %v2263_v36  ;;  %v2306_v23 = vunpack.c.l.b16 %v2258_v43  ;;  %2853 = vmatpush.bf16.msra.mxu2 %v3410_v63  ;;  %v3454_v43 = vor.u32 %v3608_v46, %v3453_v22 }
 0x3a7   : > { %v3655_v13 = vpop.eup %3654 }
 0x3a8   : > { %v2308_v54 = vpack.c.b16 %v2306_v23, %v2305_v53  ;;  %3351 = vmatmul.msk.bf16.vlgmr.msrb.gmra.mxu2 %vm2187_vm13, %v2266_v44  ;;  %v2250_v62 = vmul.f32 %v3655_v13, %v3643_v8  ;;  %v3596_v8 = vld [vmem:[%s5266_s9 + $0x64] sm:$0xf0]  ;;  %2836 = vmatpush.bf16.msra.mxu1 %v3462_v55  ;;  %v3455_v53 = vld [vmem:[%s5266_s9 + $0xc8] sm:$0xf0]  ;;  %v3389_v13 = vld [vmem:[%s5266_s9 + $0x40] sm:$0xf]  ;;  %v3386_v55 = vor.u32 %v3589_v61, %v3383_v49 }
 0x3a9   : > { %v3657_v58 = vpop.eup %3656  ;;  %v3458_v23 = vor.u32 %v3607_v5, %v3455_v53 }
 0x3aa   : > { %3353 = vmatmul.msk.bf16.vlgmr.msrb.gmra.mxu3 %vm2187_vm13, %v2308_v54  ;;  %v2253_v31 = vmul.f32 %v3657_v58, %v3645_v27  ;;  %v2256_v32 = vpack.c.bf16 %v2250_v62, %v2250_v62  ;;  %v3406_v27 = vor.u32 %v3596_v8, %v3405_v0  ;;  %v3592_v54 = vld [vmem:[%s5266_s9 + $0x44] sm:$0xf0]  ;;  %v3591_v58 = vld [vmem:[%s5266_s9 + $0x44] sm:$0xf]  ;;  %2854 = vmatpush.bf16.msra.mxu2 %v3402_v24 }
 0x3ab   : > { %2873 = vmatpush.bf16.msra.mxu3 %v3458_v23 }
 0x3ac   : > { %v2259_v2 = vpack.c.bf16 %v2253_v31, %v2253_v31  ;;  %v2265_v52 = vunpack.c.l.b16 %v2256_v32  ;;  %2817 = vmatpush.bf16.msra.mxu0 %v3406_v27  ;;  %2837 = vmatpush.bf16.msra.mxu1 %v3454_v43 }
 0x3ae   : > { %v2307_v11 = vunpack.c.l.b16 %v2259_v2  ;;  %v2267_v10 = vpack.c.b16 %v2265_v52, %v2265_v52  ;;  %v3391_v52 = vld [vmem:[%s5266_s9 + $0x48] sm:$0xf0] }
 0x3af   : > { %2874 = vmatpush.bf16.msra.mxu3 %v3450_v34 }
 0x3b0   : > { %v2309_v12 = vpack.c.b16 %v2307_v11, %v2307_v11  ;;  %2818 = vmatpush.bf16.msra.mxu0 %v3398_v14  ;;  %2838 = vmatpush.bf16.msra.mxu1 %v3446_v25  ;;  %v3437_v14 = vld [vmem:[%s5266_s9 + $0xa0] sm:$0xf] }
 0x3b8   : > { %3352 = vmatmul.msk.bf16.gmra.mxu2 %vm2187_vm13, %v2267_v10  ;;  %v3390_v10 = vor.u32 %v3592_v54, %v3389_v13 }
 0x3ba   : > { %3354 = vmatmul.msk.bf16.gmra.mxu3 %vm2187_vm13, %v2309_v12  ;;  %v3394_v12 = vor.u32 %v3591_v58, %v3391_v52  ;;  %2819 = vmatpush.bf16.msra.mxu0 %v3390_v10 }
 0x3bc   : > { %2855 = vmatpush.bf16.msra.mxu2 %v3394_v12 }
 0x3be   : > { %2820 = vmatpush.bf16.msra.mxu0 %v3382_v39 }
 0x3c0   : > { %2856 = vmatpush.bf16.msra.mxu2 %v3386_v55 }
 0x42b   : > { %v2293_v47 = vpop.f32.mrf.mxu2 }
 0x42c   : > { %v2343_v36 = vrot.slane %v2293_v47, 4  ;;  %v2349_v50 = vperm.slane %v2293_v47, %v4491_v16 }
 0x42d   : > { %v2334_v44 = vpop.f32.mrf.mxu3 }
 0x42e   : > { %v2345_v62 = vsel %vm815_vm10, 0.0, %v2343_v36  ;;  %v2366_v31 = vrot.slane %v2349_v50, 4  ;;  %v2354_v32 = vrot.slane %v2334_v44, 4  ;;  %v2359_v2 = vperm.slane %v2334_v44, %v4491_v16  ;;  %v3604_v36 = vld [vmem:[%s5266_s9 + $0xa4] sm:$0xf0] }
 0x42f   : > { %v2353_v11 = vperm.slane %v2345_v62, %v4491_v16 }
 0x430   : > { %v2355_v48 = vsel %vm815_vm10, 0.0, %v2354_v32  ;;  %v2364_v19 = vrot.slane %v2359_v2, 4  ;;  %v2367_v9 = vsel %vm815_vm10, %v2359_v2, %v2366_v31  ;;  %v3438_v32 = vor.u32 %v3604_v36, %v3437_v14 }
 0x431   : > { %v2378_v38 = vrot.slane %v2353_v11, 4  ;;  %v2363_v17 = vperm.slane %v2355_v48, %v4491_v16  ;;  %v2375_v35 = vperm.slane %v2367_v9, %v4494_v15 }
 0x432   : > { %v2365_v33 = vsel %vm815_vm10, %v2364_v19, %v2349_v50  ;;  %2839 = vmatpush.bf16.msra.mxu1 %v3438_v32 }
 0x433   : > { %v2371_v0 = vperm.slane %v2365_v33, %v4494_v15  ;;  %v2376_v8 = vrot.slane %v2363_v17, 4  ;;  %v2379_v41 = vsel %vm815_vm10, %v2363_v17, %v2378_v38  ;;  %v2390_v27 = vrot.slane %v2375_v35, 4  ;;  %v2295_v40 = vpop.f32.mrf.mxu2 }
 0x434   : > { %v2387_v30 = vperm.slane %v2379_v41, %v4494_v15  ;;  %v2396_v28 = vrot.slane %v2295_v40, 4  ;;  %v2401_v63 = vperm.slane %v2295_v40, %v4491_v16 }
 0x435   : > { %v2377_v59 = vsel %vm815_vm10, %v2376_v8, %v2353_v11  ;;  %v2388_v26 = vrot.slane %v2371_v0, 4  ;;  %v2391_v42 = vsel %vm815_vm10, 0.0, %v2390_v27  ;;  %v2336_v45 = vpop.f32.mrf.mxu3  ;;  %v5048_v20 = vsel %vm815_vm10, %v2390_v27, %v2371_v0 }
 0x436   : > { %v2383_v56 = vperm.slane %v2377_v59, %v4494_v15  ;;  %v2394_v51 = vrot.slane %v2387_v30, 4  ;;  %v2505_v47 = vrot.slane %v2391_v42, 4  ;;  %v2397_v22 = vsel %vm815_vm10, 0.0, %v2396_v28  ;;  %v3603_v42 = vld [vmem:[%s5266_s9 + $0xa4] sm:$0xf] }
 0x437   : > { %v2389_v24 = vsel %vm815_vm10, 0.0, %v2388_v26  ;;  %v2418_v46 = vrot.slane %v2401_v63, 4  ;;  %v2406_v5 = vrot.slane %v2336_v45, 4  ;;  %v2504_v23 = vperm.slane %v5048_v20, %v4491_v16 }
 0x438   : > { %v2392_v50 = vrot.slane %v2383_v56, 4  ;;  %v2395_v43 = vsel %vm815_vm10, 0.0, %v2394_v51  ;;  %v2506_v53 = vsel %vm815_vm10, %v2505_v47, %v2389_v24  ;;  %v5061_v44 = vsel %vm815_vm10, %v2394_v51, %v2383_v56 }
 0x439   : > { %v2516_v13 = vrot.slane %v2395_v43, 4  ;;  %v2405_v54 = vperm.slane %v2397_v22, %v4491_v16  ;;  %v2407_v62 = vsel %vm815_vm10, 0.0, %v2406_v5  ;;  %v2411_v31 = vperm.slane %v2336_v45, %v4491_v16  ;;  %v3439_v45 = vld [vmem:[%s5266_s9 + $0xa8] sm:$0xf0]  ;;  %v3373_v22 = vld [vmem:[%s5266_s9 + $0x20] sm:$0xf] }
 0x43a   : > { %v2393_v58 = vsel %vm815_vm10, 0.0, %v2392_v50  ;;  %v2510_v2 = vperm.slane %v2506_v53, %v4491_v16  ;;  %v2515_v52 = vperm.slane %v5061_v44, %v4491_v16  ;;  %v2415_v10 = vperm.slane %v2407_v62, %v4491_v16  ;;  %v3587_v53 = vld [vmem:[%s5266_s9 + $0x24] sm:$0xf] }
 0x43b   : > { %v2430_v11 = vrot.slane %v2405_v54, 4  ;;  %v2298_v12 = vpop.f32.mrf.mxu2  ;;  %v5074_v57 = vsel %vm815_vm10, %v2516_v13, %v2393_v58  ;;  %v2416_v18 = vrot.slane %v2411_v31, 4  ;;  %v2419_v37 = vsel %vm815_vm10, %v2411_v31, %v2418_v46  ;;  %v3588_v46 = vld [vmem:[%s5266_s9 + $0x24] sm:$0xf0]  ;;  %v3375_v13 = vld [vmem:[%s5266_s9 + $0x28] sm:$0xf0] }
 0x43c   : > { %v2448_v48 = vrot.slane %v2298_v12, 4  ;;  %v2427_v19 = vperm.slane %v2419_v37, %v4494_v15  ;;  %v2428_v9 = vrot.slane %v2415_v10, 4  ;;  %v2453_v21 = vperm.slane %v2298_v12, %v4491_v16 }
 0x43d   : > { %v2431_v25 = vsel %vm815_vm10, %v2415_v10, %v2430_v11  ;;  %v2339_v29 = vpop.f32.mrf.mxu3  ;;  %v2417_v38 = vsel %vm815_vm10, %v2416_v18, %v2401_v63  ;;  %v5086_v49 = vrot.slane %v2510_v2, 4  ;;  %v2521_v5 = vperm.slane %v5074_v57, %v4491_v16  ;;  %v3429_v2 = vld [vmem:[%s5266_s9 + $0x90] sm:$0xf]  ;;  %v3602_v11 = vld [vmem:[%s5266_s9 + $0x94] sm:$0xf0] }
 0x43e   : > { %v2439_v17 = vperm.slane %v2431_v25, %v4494_v15  ;;  %v2449_v35 = vsel %vm815_vm10, 0.0, %v2448_v48  ;;  %v2458_v34 = vrot.slane %v2339_v29, 4  ;;  %v2423_v60 = vperm.slane %v2417_v38, %v4494_v15  ;;  %v3601_v48 = vld [vmem:[%s5266_s9 + $0x94] sm:$0xf] }
 0x43f   : > { %v2429_v61 = vsel %vm815_vm10, %v2428_v9, %v2405_v54  ;;  %v2442_v33 = vrot.slane %v2427_v19, 4  ;;  %v2457_v39 = vperm.slane %v2449_v35, %v4491_v16  ;;  %v2470_v41 = vrot.slane %v2453_v21, 4  ;;  %v3431_v19 = vld [vmem:[%s5266_s9 + $0x98] sm:$0xf0]  ;;  %v3586_v35 = vld [vmem:[%s5266_s9 + $0x14] sm:$0xf0] }
 0x440   : > { %v2435_v0 = vperm.slane %v2429_v61, %v4494_v15  ;;  %v2446_v8 = vrot.slane %v2439_v17, 4  ;;  %v2440_v27 = vrot.slane %v2423_v60, 4  ;;  %v2459_v28 = vsel %vm815_vm10, 0.0, %v2458_v34  ;;  %v3365_v17 = vld [vmem:[%s5266_s9 + $0x10] sm:$0xf] }
 0x441   : > { %v2443_v40 = vsel %vm815_vm10, 0.0, %v2442_v33  ;;  %v5091_v30 = vsel %vm815_vm10, %v2442_v33, %v2423_v60  ;;  %v2482_v26 = vrot.slane %v2457_v39, 4  ;;  %v2463_v14 = vperm.slane %v2339_v29, %v4491_v16  ;;  %v3585_v34 = vld [vmem:[%s5266_s9 + $0x14] sm:$0xf]  ;;  %v3367_v60 = vld [vmem:[%s5266_s9 + $0x18] sm:$0xf0] }
 0x442   : > { %v2444_v63 = vrot.slane %v2435_v0, 4  ;;  %v2447_v55 = vsel %vm815_vm10, 0.0, %v2446_v8  ;;  %v2543_v59 = vrot.slane %v2443_v40, 4  ;;  %v2441_v56 = vsel %vm815_vm10, 0.0, %v2440_v27  ;;  %v3599_v27 = vld [vmem:[%s5266_s9 + $0x84] sm:$0xf] }
 0x443   : > { %v5103_v51 = vsel %vm815_vm10, %v2446_v8, %v2435_v0  ;;  %v2554_v47 = vrot.slane %v2447_v55, 4  ;;  %v2300_v24 = vpop.f32.mrf.mxu2  ;;  %v2467_v43 = vperm.slane %v2459_v28, %v4491_v16  ;;  %v2542_v54 = vperm.slane %v5091_v30, %v4491_v16  ;;  %v3421_v8 = vld [vmem:[%s5266_s9 + $0x80] sm:$0xf]  ;;  %v3423_v40 = vld [vmem:[%s5266_s9 + $0x88] sm:$0xf0] }
 0x444   : > { %v2445_v36 = vsel %vm815_vm10, 0.0, %v2444_v63  ;;  %v2544_v50 = vsel %vm815_vm10, %v2543_v59, %v2441_v56  ;;  %v2553_v58 = vperm.slane %v5103_v51, %v4491_v16  ;;  %v2468_v62 = vrot.slane %v2463_v14, 4  ;;  %v3357_v59 = vld [vmem:[%s5266_s9] sm:$0xf] }
 0x445   : > { %v2471_v31 = vsel %vm815_vm10, %v2463_v14, %v2470_v41  ;;  %v2341_v32 = vpop.f32.mrf.mxu3  ;;  %v2548_v10 = vperm.slane %v2544_v50, %v4491_v16  ;;  %v2480_v18 = vrot.slane %v2467_v43, 4  ;;  %v2483_v37 = vsel %vm815_vm10, %v2467_v43, %v2482_v26  ;;  %v3600_v41 = vld [vmem:[%s5266_s9 + $0x84] sm:$0xf0]  ;;  %v3583_v14 = vld [vmem:[%s5266_s9 + $0x4] sm:$0xf] }
 0x446   : > { %v2479_v12 = vperm.slane %v2471_v31, %v4494_v15  ;;  %v2555_v9 = vsel %vm815_vm10, %v2554_v47, %v2445_v36  ;;  %v2469_v25 = vsel %vm815_vm10, %v2468_v62, %v2453_v21  ;;  %v2491_v29 = vperm.slane %v2483_v37, %v4494_v15  ;;  %v3584_v26 = vld [vmem:[%s5266_s9 + $0x4] sm:$0xf0]  ;;  %v3359_v50 = vld [vmem:[%s5266_s9 + $0x8] sm:$0xf0] }
 0x447   : > { %v3442_v38 = vor.u32 %v3603_v42, %v3439_v45  ;;  %v2475_v21 = vperm.slane %v2469_v25, %v4494_v15  ;;  %v2481_v61 = vsel %vm815_vm10, %v2480_v18, %v2457_v39  ;;  %v3374_v0 = vor.u32 %v3588_v46, %v3373_v22 }
 0x448   : > { %v2494_v33 = vrot.slane %v2479_v12, 4  ;;  %v2487_v39 = vperm.slane %v2481_v61, %v4494_v15  ;;  %v2498_v28 = vrot.slane %v2491_v29, 4  ;;  %v3378_v63 = vor.u32 %v3587_v53, %v3375_v13 }
 0x449   : > { %2875 = vmatpush.bf16.msra.mxu3 %v3442_v38  ;;  %v3430_v55 = vor.u32 %v3602_v11, %v3429_v2  ;;  %v2560_v42 = vrot.slane %v2548_v10, 4  ;;  %v2492_v45 = vrot.slane %v2475_v21, 4  ;;  %2821 = vmatpush.bf16.msra.mxu0 %v3374_v0  ;;  %v3434_v47 = vor.u32 %v3601_v48, %v3431_v19 }
 0x44a   : > { %v2495_v56 = vsel %vm815_vm10, 0.0, %v2494_v33  ;;  %v2559_v24 = vperm.slane %v2555_v9, %v4491_v16  ;;  %v2496_v22 = vrot.slane %v2487_v39, 4  ;;  %v2499_v46 = vsel %vm815_vm10, 0.0, %v2498_v28  ;;  %2857 = vmatpush.bf16.msra.mxu2 %v3378_v63 }
 0x44b   : > { %v2581_v36 = vrot.slane %v2495_v56, 4  ;;  %2840 = vmatpush.bf16.msra.mxu1 %v3430_v55  ;;  %v2493_v43 = vsel %vm815_vm10, 0.0, %v2492_v45  ;;  %v2592_v53 = vrot.slane %v2499_v46, 4  ;;  %v3366_v13 = vor.u32 %v3586_v35, %v3365_v17  ;;  %v2650_v45 = vld [vmem:[%s5267_s10] sm:$0x3] }
 0x44c   : > { %v3370_v62 = vor.u32 %v3585_v34, %v3367_v60  ;;  %v3422_v32 = vor.u32 %v3600_v41, %v3421_v8  ;;  %v3426_v2 = vor.u32 %v3599_v27, %v3423_v40  ;;  %v3358_v11 = vor.u32 %v3584_v26, %v3357_v59 }
 0x44d   : > { %v2582_v31 = vsel %vm815_vm10, %v2581_v36, %v2493_v43  ;;  %2876 = vmatpush.bf16.msra.mxu3 %v3434_v47  ;;  %2822 = vmatpush.bf16.msra.mxu0 %v3366_v13  ;;  %v3362_v10 = vor.u32 %v3583_v14, %v3359_v50  ;;  %v2523_v12 = vsel %vm815_vm10, %v5086_v49, %v2504_v23  ;;  %v2528_v18 = vrot.slane %v2521_v5, 4  ;;  %v3658_v36 = vld [vmem:[%s3746_s23] sm:$0xff] }
 0x44e   : > { %v2561_v37 = vsel %vm815_vm10, %v2560_v42, %v2542_v54  ;;  %2858 = vmatpush.bf16.msra.mxu2 %v3370_v62  ;;  %v2527_v48 = vperm.slane %v2523_v12, %v4494_v15  ;;  %v2566_v9 = vrot.slane %v2559_v24, 4  ;;  %v2497_v20 = vsel %vm815_vm10, 0.0, %v2496_v22 }
 0x44f   : > { %2841 = vmatpush.bf16.msra.mxu1 %v3422_v32  ;;  %v2565_v19 = vperm.slane %v2561_v37, %v4494_v15  ;;  %v2529_v23 = vsel %vm815_vm10, %v2528_v18, %v2515_v52  ;;  %v2586_v57 = vperm.slane %v2582_v31, %v4491_v16  ;;  %v2593_v49 = vsel %vm815_vm10, %v2592_v53, %v2497_v20 }
 0x450   : > { %v2533_v30 = vperm.slane %v2529_v23, %v4494_v15  ;;  %v2536_v5 = vrot.slane %v2527_v48, 4  ;;  %v2567_v54 = vsel %vm815_vm10, %v2566_v9, %v2553_v58  ;;  %v2576_v29 = vsel %vm815_vm10, %v2494_v33, %v2475_v21 }
 0x451   : > { %2877 = vmatpush.bf16.msra.mxu3 %v3426_v2  ;;  %v2574_v25 = vrot.slane %v2565_v19, 4  ;;  %2823 = vmatpush.bf16.msra.mxu0 %v3358_v11  ;;  %v2571_v44 = vperm.slane %v2567_v54, %v4494_v15  ;;  %v2597_v52 = vperm.slane %v2593_v49, %v4491_v16  ;;  %v2598_v17 = vrot.slane %v2586_v57, 4 }
 0x452   : > { %2859 = vmatpush.bf16.msra.mxu2 %v3362_v10  ;;  %v2534_v38 = vrot.slane %v2533_v30, 4  ;;  %v2537_v35 = vsel %vm815_vm10, %v2533_v30, %v2536_v5  ;;  %v2587_v51 = vsel %vm815_vm10, %v2498_v28, %v2487_v39  ;;  %v2580_v58 = vperm.slane %v2576_v29, %v4491_v16 }
 0x453   : > { %v2575_v34 = vsel %vm815_vm10, %v2571_v44, %v2574_v25  ;;  %v2572_v60 = vrot.slane %v2571_v44, 4  ;;  %v2604_v0 = vrot.slane %v2597_v52, 4  ;;  %v2591_v41 = vperm.slane %v2587_v51, %v4491_v16 }
 0x454   : > { %v2615_v61 = vpack.c.bf16 %v2575_v34, %v2537_v35  ;;  %v2535_v21 = vsel %vm815_vm10, %v2534_v38, %v2527_v48  ;;  %v2599_v27 = vsel %vm815_vm10, %v2598_v17, %v2580_v58  ;;  %v2652_v56 = vperm.slane %v2650_v45, 0 }
 0x455   : > { %v2573_v33 = vsel %vm815_vm10, %v2572_v60, %v2565_v19  ;;  %v2605_v40 = vsel %vm815_vm10, %v2604_v0, %v2591_v41  ;;  %v2603_v39 = vperm.slane %v2599_v27, %v4494_v15  ;;  %v2653_v22 = vperm.slane %v2650_v45, 1 }
 0x456   : > { %2842 = vmatmul.bf16.vlgmr.msra.gmra.mxu1 %v2615_v61  ;;  %2878 = vmatmul.bf16.vlgmr.msra.gmra.mxu3 %v2615_v61  ;;  %v2614_v8 = vpack.c.bf16 %v2573_v33, %v2535_v21  ;;  %v2609_v28 = vperm.slane %v2605_v40, %v4494_v15 }
 0x457   : > { %v2612_v63 = vrot.slane %v2603_v39, 4 }
 0x458   : > { %2824 = vmatmul.bf16.vlgmr.msra.gmra.mxu0 %v2614_v8  ;;  %2860 = vmatmul.bf16.vlgmr.msra.gmra.mxu2 %v2614_v8  ;;  %v2610_v55 = vrot.slane %v2609_v28, 4 }
 0x459   : > { %v2613_v59 = vsel %vm815_vm10, %v2609_v28, %v2612_v63 }
 0x45a   : > { %v2611_v26 = vsel %vm815_vm10, %v2610_v55, %v2603_v39  ;;  %v2617_v42 = vpack.c.bf16 %v2613_v59, %v2613_v59 }
 0x45b   : > { %v2616_v16 = vpack.c.bf16 %v2611_v26, %v2611_v26 }
 0x466   : > { %2847 = vmatmul.bf16.gmra.mxu1 %v2617_v42  ;;  %2883 = vmatmul.bf16.gmra.mxu3 %v2617_v42 }
 0x468   : > { %2829 = vmatmul.bf16.gmra.mxu0 %v2616_v16  ;;  %2865 = vmatmul.bf16.gmra.mxu2 %v2616_v16 }
 0x4d3   : > { %v2843_v15 = vpop.f32.mrf.mxu1 }
 0x4d5   : > { %v2825_v47 = vpop.f32.mrf.mxu0 }
 0x4d6   : > { %v2826_v14 = vadd.f32 %v2825_v47, %v2652_v56 }
 0x4d8   : > { %v2844_v24 = vadd.f32 %v2843_v15, %v2826_v14 }
 0x4d9   : > { %v2879_v46 = vpop.f32.mrf.mxu3 }
 0x4da   : > { %v2888_v50 = vadd.f32 %v3658_v36, %v2844_v24 }
 0x4db   : > { %v2845_v43 = vpop.f32.mrf.mxu1  ;;  %v2861_v53 = vpop.f32.mrf.mxu2 }
 0x4dc   : > { %2894 = vst [vmem:[%s5240_s25] sm:$0xff] %v2888_v50  ;;  %v2862_v13 = vadd.f32 %v2861_v53, %v2653_v22 }
 0x4dd   : > { %v2827_v62 = vpop.f32.mrf.mxu0 }
 0x4de   : > { %v2880_v31 = vadd.f32 %v2879_v46, %v2862_v13  ;;  %v2828_v32 = vadd.f32 %v2827_v62, %v2652_v56 }
 0x4e0   : > { %v2889_v2 = vadd.f32 %v2880_v31, %v3750_v1  ;;  %v2846_v11 = vadd.f32 %v2845_v43, %v2828_v32 }
 0x4e1   : > { %v2881_v10 = vpop.f32.mrf.mxu3 }
 0x4e2   : > { %2895 = vst [vmem:[%s5240_s25 + $0x8] sm:$0xff] %v2889_v2  ;;  %v2890_v12 = vadd.f32 %v2846_v11, %v3762_v6 }
 0x4e3   : > { %v2848_v18 = vpop.f32.mrf.mxu1  ;;  %v2863_v37 = vpop.f32.mrf.mxu2 }
 0x4e4   : > { %2896 = vst [vmem:[%s5240_s25 + $0x10] sm:$0xff] %v2890_v12  ;;  %v2864_v48 = vadd.f32 %v2863_v37, %v2653_v22 }
 0x4e5   : > { %v2830_v19 = vpop.f32.mrf.mxu0 }
 0x4e6   : > { %v2882_v9 = vadd.f32 %v2881_v10, %v2864_v48  ;;  %v2831_v20 = vadd.f32 %v2830_v19, %v2652_v56 }
 0x4e8   : > { %v2891_v23 = vadd.f32 %v2882_v9, %v3765_v7  ;;  %v2849_v57 = vadd.f32 %v2848_v18, %v2831_v20 }
 0x4e9   : > { %v2884_v49 = vpop.f32.mrf.mxu3 }
 0x4ea   : > { %2897 = vst [vmem:[%s5240_s25 + $0x18] sm:$0xff] %v2891_v23  ;;  %v2892_v1 = vadd.f32 %v2849_v57, %v3754_v3 }
 0x4eb   : > { %v2850_v30 = vpop.f32.mrf.mxu1  ;;  %v2866_v5 = vpop.f32.mrf.mxu2 }
 0x4ec   : > { %2898 = vst [vmem:[%s5240_s25 + $0x20] sm:$0xff] %v2892_v1  ;;  %v2867_v54 = vadd.f32 %v2866_v5, %v2653_v22 }
 0x4ed   : > { %v2832_v6 = vpop.f32.mrf.mxu0 }
 0x4ee   : > { %v2885_v25 = vadd.f32 %v2884_v49, %v2867_v54 }
 0x4f0   : > { %v2893_v29 = vadd.f32 %v2885_v25, %v3757_v4 }
 0x4f1   : > { %v2886_v44 = vpop.f32.mrf.mxu3 }
 0x4f2   : > { %2899 = vst [vmem:[%s5240_s25 + $0x28] sm:$0xff] %v2893_v29 }
 0x4f3   : > { %v2868_v52 = vpop.f32.mrf.mxu2 }
 0x4f4 PF: > { %s21_s17 = sadd.s32 1, %s3665_s17  }
 0x4f5   : > { %p18_p4 = scmp.ge.s32.totalorder %s21_s17, 4  }
 0x4f7   :  { %20 = sbr.rel (!%p18_p4) target bundleno = 1 (0x1), region = 94 }

// kernel: spec_vit_forward.13
= control target key start
LH: loop header
LB: loop body
LE: loop exit
PB: predicated region body
PF: predicated region fallthrough
CT: control target
= control target key end

     0   :  { %v322_v3 = vmov 256.0   ;;  %vm230_vm4 = vcmask 80896   ;;  %s419_s0 = inlined_call_operand.vmem [shape: f32[8,256], index: 0, kind: input, shape index: {}]   ;;  %s420_s3 = inlined_call_operand.vmem [shape: bf16[256,10], index: 3, kind: input, shape index: {}]   ;;  %s421_s4 = inlined_call_operand.vmem [shape: f32[1,10], index: 4, kind: input, shape index: {}]   ;;  %s422_s1 = inlined_call_operand.vmem [shape: f32[1,256], index: 1, kind: input, shape index: {}]   ;;  %s423_s2 = inlined_call_operand.vmem [shape: f32[1,256], index: 2, kind: input, shape index: {}]   ;;  %s424_s5 = inlined_call_operand.vmem [shape: f32[8,10], index: 5, kind: output, shape index: {}]  }
   0x1   :  { %v20_v0 = vld [vmem:[%s419_s0] sm:$0xff]  ;;  %v21_v1 = vld [vmem:[%s419_s0 + $0x8] sm:$0xff]  ;;  %318 = vrcp.f32 %v322_v3  ;;  %v307_v4 = vld [vmem:[%s420_s3 + $0x38] sm:$0xff] }
   0x2   :  { %v24_v2 = vadd.f32 %v21_v1, %v20_v0  ;;  %v315_v5 = vld [vmem:[%s420_s3 + $0x78] sm:$0xff]  ;;  %204 = vmatpush.bf16.msra.mxu0 %v307_v4  ;;  %v306_v19 = vld [vmem:[%s420_s3 + $0x30] sm:$0xff]  ;;  %v305_v21 = vld [vmem:[%s420_s3 + $0x28] sm:$0xff] }
   0x3   :  { %217 = vmatpush.bf16.msra.mxu1 %v315_v5  ;;  %v314_v20 = vld [vmem:[%s420_s3 + $0x70] sm:$0xff]  ;;  %v313_v22 = vld [vmem:[%s420_s3 + $0x68] sm:$0xff]  ;;  %v304_v23 = vld [vmem:[%s420_s3 + $0x20] sm:$0xff] }
   0x4   :  { %25 = vadd.xlane.f32.xlu0 %v24_v2  ;;  %v312_v24 = vld [vmem:[%s420_s3 + $0x60] sm:$0xff]  ;;  %v303_v25 = vld [vmem:[%s420_s3 + $0x18] sm:$0xff]  ;;  %v302_v27 = vld [vmem:[%s420_s3 + $0x10] sm:$0xff] }
   0x5   :  { %v311_v26 = vld [vmem:[%s420_s3 + $0x58] sm:$0xff]  ;;  %v310_v28 = vld [vmem:[%s420_s3 + $0x50] sm:$0xff]  ;;  %v301_v29 = vld [vmem:[%s420_s3 + $0x8] sm:$0xff] }
   0x6   :  { %205 = vmatpush.bf16.msra.mxu0 %v306_v19  ;;  %v309_v30 = vld [vmem:[%s420_s3 + $0x48] sm:$0xff]  ;;  %v300_v31 = vld [vmem:[%s420_s3] sm:$0xff] }
   0x7   :  { %v319_v6 = vpop.eup %318  ;;  %218 = vmatpush.bf16.msra.mxu1 %v314_v20  ;;  %v308_v32 = vld [vmem:[%s420_s3 + $0x40] sm:$0xff] }
   0x8   :  { %v28_v7 = vmul.f32 256.0, %v319_v6  ;;  %vm32_vm0 = vweird.f32 %v319_v6  ;;  %v22_v41 = vld [vmem:[%s422_s1] sm:$0x3] }
   0x9   :  { %v23_v43 = vld [vmem:[%s423_s2] sm:$0x3]  ;;  %v57_v44 = vperm.slane %v22_v41, 0  ;;  %v58_v45 = vperm.slane %v22_v41, 1 }
   0xa   :  { %v29_v8 = vsub.f32 1.0, %v28_v7  ;;  %206 = vmatpush.bf16.msra.mxu0 %v305_v21  ;;  %v64_v48 = vperm.slane %v23_v43, 0  ;;  %v65_v50 = vperm.slane %v23_v43, 1  ;;  %v317_v57 = vld [vmem:[%s421_s4] ss:$0 sm:$0xff] }
   0xb   :  { %219 = vmatpush.bf16.msra.mxu1 %v313_v22 }
   0xc   :  { %v30_v9 = vmul.f32 %v319_v6, %v29_v8 }
   0xe   :  { %v31_v10 = vadd.f32 %v319_v6, %v30_v9  ;;  %207 = vmatpush.bf16.msra.mxu0 %v304_v23 }
   0xf   :  { %220 = vmatpush.bf16.msra.mxu1 %v312_v24 }
  0x10   :  { %v33_v11 = vsel %vm32_vm0, %v319_v6, %v31_v10 }
  0x12   :  { %208 = vmatpush.bf16.msra.mxu0 %v303_v25 }
  0x13   :  { %221 = vmatpush.bf16.msra.mxu1 %v311_v26 }
  0x16   :  { %209 = vmatpush.bf16.msra.mxu0 %v302_v27 }
  0x17   :  { %222 = vmatpush.bf16.msra.mxu1 %v310_v28 }
  0x1a   :  { %210 = vmatpush.bf16.msra.mxu0 %v301_v29 }
  0x1b   :  { %223 = vmatpush.bf16.msra.mxu1 %v309_v30 }
  0x1e   :  { %211 = vmatpush.bf16.msra.mxu0 %v300_v31 }
  0x1f   :  { %224 = vmatpush.bf16.msra.mxu1 %v308_v32 }
  0x77   :  { %v26_v12 = vpop.xlane.xlu0 %25 }
  0x78   :  { %v34_v13 = vmul.f32 %v33_v11, %v26_v12 }
  0x7a   :  { %v35_v14 = vsub.f32 %v20_v0, %v34_v13  ;;  %v36_v15 = vsub.f32 %v21_v1, %v34_v13 }
  0x7c   :  { %v37_v16 = vmul.f32 %v35_v14, %v35_v14  ;;  %v38_v17 = vmul.f32 %v36_v15, %v36_v15 }
  0x7e   :  { %v39_v18 = vadd.f32 %v38_v17, %v37_v16 }
  0x80   :  { %40 = vadd.xlane.f32.xlu0 %v39_v18 }
  0xf3   :  { %v41_v33 = vpop.xlane.xlu0 %40 }
  0xf4   :  { %v42_v34 = vmul.f32 %v41_v33, %v33_v11 }
  0xf6   :  { %v43_v35 = vadd.f32 1e-06, %v42_v34 }
  0xf8   :  { %320 = vrsqrt.f32 %v43_v35  ;;  %vm50_vm2 = vweird.f32 %v43_v35 }
  0xfe   :  { %v321_v36 = vpop.eup %320 }
  0xff   :  { %v45_v37 = vmul.f32 %v321_v36, %v43_v35  ;;  %vm51_vm1 = vweird.f32 %v321_v36 }
 0x100   :  { %vm52_vm3 = vmor %vm50_vm2, %vm51_vm1 }
 0x101   :  { %v46_v38 = vmul.f32 %v321_v36, %v45_v37 }
 0x103   :  { %v47_v39 = vmul.f32 0.5, %v46_v38 }
 0x105   :  { %v48_v40 = vsub.f32 1.5, %v47_v39 }
 0x107   :  { %v49_v42 = vmul.f32 %v321_v36, %v48_v40 }
 0x109   :  { %v53_v46 = vsel %vm52_vm3, %v321_v36, %v49_v42 }
 0x10a   :  { %v54_v47 = vmul.f32 %v53_v46, %v35_v14  ;;  %v55_v49 = vmul.f32 %v53_v46, %v36_v15 }
 0x10c   :  { %v61_v51 = vmul.f32 %v57_v44, %v54_v47  ;;  %v62_v52 = vmul.f32 %v58_v45, %v55_v49 }
 0x10e   :  { %v68_v53 = vadd.f32 %v64_v48, %v61_v51  ;;  %v69_v54 = vadd.f32 %v65_v50, %v62_v52 }
 0x110   :  { %v70_v55 = vpack.c.bf16 %v68_v53, %v68_v53  ;;  %v71_v56 = vpack.c.bf16 %v69_v54, %v69_v54 }
 0x112   :  { %212 = vmatmul.bf16.vlgmr.msra.gmra.mxu0 %v70_v55  ;;  %225 = vmatmul.bf16.vlgmr.msra.gmra.mxu1 %v71_v56 }
 0x18f   :  { %v213_v58 = vpop.f32.mrf.mxu0  ;;  %v226_v59 = vpop.f32.mrf.mxu1 }
 0x190   :  { %v214_v60 = vadd.f32 %v317_v57, %v213_v58 }
 0x192   :  { %v227_v61 = vadd.f32 %v226_v59, %v214_v60 }
 0x194   :  { %231 = vst.msk [vmem:[%s424_s5] sm:$0xff] %vm230_vm4, %v227_v61 }
 0x197   :  { %v215_v62 = vpop.f32.mrf.mxu0  ;;  %v228_v63 = vpop.f32.mrf.mxu1 }

</bundles_post_ra>
